<compile_context>
chip_gen: v5e
topology: v5e:2x2
jax: 0.10.0
libtpu: 0.0.40
codegen_flags: <defaults>
</compile_context>

<pallas_src>
import functools
import math

import jax
import jax.numpy as jnp
from jax.experimental import pallas as pl
from jax.experimental.pallas import tpu as pltpu

LN_EPS = 1e-5  # PyTorch nn.LayerNorm default


def _layer_norm(x, g, b):
    mu = jnp.mean(x, axis=-1, keepdims=True)
    var = jnp.mean((x - mu) ** 2, axis=-1, keepdims=True)
    return (x - mu) * jax.lax.rsqrt(var + LN_EPS) * g + b


_WKEYS = ('wq', 'bq', 'wk', 'bk', 'wv', 'bv', 'wo', 'bo',
          'g_mha', 'b_mha', 'g_ln', 'b_ln',
          'w1', 'b1', 'w2', 'b2', 'g_ff', 'b_ff')


# ---------------------------------------------------------------------------
# Pallas kernel: one EncoderLayer for a block of `block_b` batch elements
# ---------------------------------------------------------------------------
def _encoder_layer_kernel(h, d_k,
                          q_ref, k_ref, v_ref, pos_ref, wg_ref,
                          wq_ref, bq_ref, wk_ref, bk_ref, wv_ref, bv_ref,
                          wo_ref, bo_ref, g_mha_ref, b_mha_ref,
                          g_ln_ref, b_ln_ref,
                          w1_ref, b1_ref, w2_ref, b2_ref, g_ff_ref, b_ff_ref,
                          out_ref):
    f32 = jnp.float32
    bf16 = jnp.bfloat16
    bt, n, d = q_ref.shape

    # Flatten the batch block into lane-dense (bt*n, d) row tiles.
    queries = q_ref[...].astype(f32).reshape(bt * n, d)
    keys = k_ref[...].astype(f32).reshape(bt * n, d)
    values = v_ref[...].astype(f32).reshape(bt * n, d)
    pos = pos_ref[...].astype(f32).reshape(bt * n, d)

    q_in = queries + pos          # MHA query stream (and its internal residual)
    k_in = keys + pos

    # --- QKV projections: bf16 operands on the MXU, f32 accumulation ---------
    q = jnp.dot(q_in.astype(bf16), wq_ref[...],
                preferred_element_type=f32) + bq_ref[...]
    k = jnp.dot(k_in.astype(bf16), wk_ref[...],
                preferred_element_type=f32) + bk_ref[...]
    v = jnp.dot(values.astype(bf16), wv_ref[...],
                preferred_element_type=f32) + bv_ref[...]

    # Fold 1/sqrt(d_k) into Q (one (rows, d) vmul instead of scaling the
    # (h, n, n) logits).
    q = q * (1.0 / math.sqrt(d_k))

    q_bf = q.astype(bf16)
    k_bf = k.astype(bf16)
    v_bf = v.astype(bf16)

    # --- attention: per-batch, per-head 2-D matmuls on static slices ---------
    per_batch = []
    for b in range(bt):
        rows = slice(b * n, (b + 1) * n)
        head_outs = []
        for head in range(h):
            cols = slice(head * d_k, (head + 1) * d_k)
            qh = q_bf[rows, cols]                      # (n, d_k)
            kh = k_bf[rows, cols]                      # (n, d_k)
            vh = v_bf[rows, cols]                      # (n, d_k)
            s = jax.lax.dot_general(                   # Q @ K^T  -> (n, n)
                qh, kh, (((1,), (1,)), ((), ())),
                preferred_element_type=f32)
            # geometry bias: log(clamp(w_g, 1e-6))
            s = s + jnp.log(jnp.maximum(wg_ref[b, head].astype(f32), 1e-6))
            # manual softmax: exp + approx reciprocal (both on the EUP slot)
            m = jnp.max(s, axis=-1, keepdims=True)
            e = jnp.exp(s - m)
            p = e * pl.reciprocal(jnp.sum(e, axis=-1, keepdims=True),
                                  approx=True)
            head_outs.append(jnp.dot(p.astype(bf16), vh,
                                     preferred_element_type=f32))
        per_batch.append(jnp.concatenate(head_outs, axis=-1))   # (n, h*d_k)
    attn = jnp.concatenate(per_batch, axis=0)                   # (bt*n, h*d_k)

    o = jnp.dot(attn.astype(bf16), wo_ref[...],
                preferred_element_type=f32) + bo_ref[...]

    # MHA internal residual (with queries+pos) + LayerNorm
    mha = _layer_norm(q_in + o, g_mha_ref[...], b_mha_ref[...])
    # EncoderLayer residual (with raw queries) + LayerNorm
    x = _layer_norm(queries + mha, g_ln_ref[...], b_ln_ref[...])

    # Position-wise FFN + residual + LayerNorm
    hid = jnp.maximum(
        jnp.dot(x.astype(bf16), w1_ref[...],
                preferred_element_type=f32) + b1_ref[...], 0.0)
    ff = jnp.dot(hid.astype(bf16), w2_ref[...],
                 preferred_element_type=f32) + b2_ref[...]
    out = _layer_norm(x + ff, g_ff_ref[...], b_ff_ref[...])

    out_ref[...] = out.reshape(bt, n, d).astype(out_ref.dtype)


# ---------------------------------------------------------------------------
# Wrapper
# ---------------------------------------------------------------------------
def encoder_layer(queries, keys, values, geometry, pos, params, *,
                  h, d_k, block_b=2):
    bsz, n, d = queries.shape
    assert d == h * d_k
    block_b = min(block_b, bsz)
    assert bsz % block_b == 0, "batch must be divisible by the batch block"

    seq_spec = pl.BlockSpec((block_b, n, d), lambda i: (i, 0, 0))
    geo_spec = pl.BlockSpec((block_b, h, n, n), lambda i: (i, 0, 0, 0))

    def full_spec(arr):
        r = arr.ndim
        return pl.BlockSpec(arr.shape, lambda i, _r=r: (0,) * _r)

    weights = [params[kk] for kk in _WKEYS]
    in_specs = [seq_spec, seq_spec, seq_spec, seq_spec, geo_spec]
    in_specs += [full_spec(w) for w in weights]

    # Explicit VMEM budget: double-buffered per-step blocks + resident weights
    # + headroom for in-kernel intermediates (v7x only has 64 MiB VMEM).
    act_bytes = 5 * block_b * n * d * queries.dtype.itemsize          # q,k,v,pos,out
    geo_bytes = block_b * h * n * n * geometry.dtype.itemsize
    w_bytes = sum(int(w.size) * w.dtype.itemsize for w in weights)
    vmem_limit = int(min(2 * (act_bytes + geo_bytes + w_bytes) + (8 << 20),
                         48 << 20))

    kernel = functools.partial(_encoder_layer_kernel, h, d_k)
    return pl.pallas_call(
        kernel,
        out_shape=jax.ShapeDtypeStruct((bsz, n, d), queries.dtype),
        grid=(bsz // block_b,),
        in_specs=in_specs,
        out_specs=seq_spec,
        compiler_params=pltpu.CompilerParams(
            dimension_semantics=("parallel",),
            vmem_limit_bytes=vmem_limit),
    )(queries, keys, values, pos, geometry, *weights)


# ---------------------------------------------------------------------------
# Deterministic parameter init (synthetic; matmul weights stored bf16)
# ---------------------------------------------------------------------------
def init_params(key, d_model, d_k, d_v, h, d_ff):
    ks = jax.random.split(key, 12)
    s = 0.05
    f32, bf16 = jnp.float32, jnp.bfloat16

    def w(k, shape):
        return (s * jax.random.normal(k, shape, f32)).astype(bf16)

    def b(k, dim):
        return s * jax.random.normal(k, (1, dim), f32)

    return {
        'wq': w(ks[0], (d_model, h * d_k)), 'bq': b(ks[1], h * d_k),
        'wk': w(ks[2], (d_model, h * d_k)), 'bk': b(ks[3], h * d_k),
        'wv': w(ks[4], (d_model, h * d_v)), 'bv': b(ks[5], h * d_v),
        'wo': w(ks[6], (h * d_v, d_model)), 'bo': b(ks[7], d_model),
        'g_mha': jnp.ones((1, d_model), f32), 'b_mha': jnp.zeros((1, d_model), f32),
        'g_ln': jnp.ones((1, d_model), f32), 'b_ln': jnp.zeros((1, d_model), f32),
        'w1': w(ks[8], (d_model, d_ff)), 'b1': b(ks[9], d_ff),
        'w2': w(ks[10], (d_ff, d_model)), 'b2': b(ks[11], d_model),
        'g_ff': jnp.ones((1, d_model), f32), 'b_ff': jnp.zeros((1, d_model), f32),
    }


# ---------------------------------------------------------------------------
# Pure-JAX reference (mirrors the kernel's bf16 MXU operands / f32 accumulation)
# ---------------------------------------------------------------------------
def _ref_encoder_layer(queries, keys_in, values, geometry, pos, p, *, h, d_k):
    f32, bf16 = jnp.float32, jnp.bfloat16

    def mm(x, w):
        return jnp.dot(x.astype(bf16), w.astype(bf16), preferred_element_type=f32)

    bsz, n, d = queries.shape
    q_in = queries + pos
    k_in = keys_in + pos
    q = (mm(q_in, p['wq']) + p['bq']).reshape(bsz, n, h, d_k).transpose(0, 2, 1, 3)
    k = (mm(k_in, p['wk']) + p['bk']).reshape(bsz, n, h, d_k).transpose(0, 2, 1, 3)
    v = (mm(values, p['wv']) + p['bv']).reshape(bsz, n, h, d_k).transpose(0, 2, 1, 3)
    att = jnp.einsum('bhqe,bhke->bhqk', q.astype(bf16), k.astype(bf16),
                     preferred_element_type=f32) / math.sqrt(d_k)
    att = jnp.log(jnp.maximum(geometry, 1e-6)) + att
    att = jax.nn.softmax(att, axis=-1)
    o = jnp.einsum('bhqk,bhke->bhqe', att.astype(bf16), v.astype(bf16),
                   preferred_element_type=f32)
    o = o.transpose(0, 2, 1, 3).reshape(bsz, n, h * d_k)
    o = mm(o, p['wo']) + p['bo']
    mha = _layer_norm(q_in + o, p['g_mha'], p['b_mha'])
    x = _layer_norm(queries + mha, p['g_ln'], p['b_ln'])
    hid = jnp.maximum(mm(x, p['w1']) + p['b1'], 0.0)
    ff = mm(hid, p['w2']) + p['b2']
    return _layer_norm(x + ff, p['g_ff'], p['b_ff'])


# ---------------------------------------------------------------------------
if __name__ == "__main__":
    # Small config consistent with the module (d_model = h * d_k), chosen so the
    # lane dim is 128-dense and rows are multiples of 8.
    batch, seq, d_model, h, d_k, d_ff = 4, 16, 128, 4, 32, 256
    d_v = d_k

    root = jax.random.PRNGKey(0)
    kq, kk, kv, kg, kp, kw = jax.random.split(root, 6)

    queries = jax.random.normal(kq, (batch, seq, d_model), jnp.float32)
    keys_in = jax.random.normal(kk, (batch, seq, d_model), jnp.float32)
    values = jax.random.normal(kv, (batch, seq, d_model), jnp.float32)
    pos = jax.random.normal(kp, (batch, seq, d_model), jnp.float32)
    # relative geometry weights are non-negative (ReLU'd embeddings) in RSTNet
    geometry = jax.random.uniform(kg, (batch, h, seq, seq), jnp.float32,
                                  minval=0.05, maxval=2.0)

    params = init_params(kw, d_model, d_k, d_v, h, d_ff)

    out = encoder_layer(queries, keys_in, values, geometry, pos, params,
                        h=h, d_k=d_k, block_b=2)
    jax.block_until_ready(out)

    ref = _ref_encoder_layer(queries, keys_in, values, geometry, pos, params,
                             h=h, d_k=d_k)
    assert out.shape == (batch, seq, d_model)
    err = float(jnp.max(jnp.abs(out - ref)))
    assert jnp.allclose(out, ref, atol=2e-2, rtol=2e-2), f"max abs err {err}"

    print("KERNEL_OK")
</pallas_src>

<mosaic_0001>
module attributes {stable_mosaic.version = 11 : i64} {
  func.func @_encoder_layer_kernel(%arg0: i32, %arg1: memref<2x16x128xf32, #tpu.memory_space<vmem>>, %arg2: memref<2x16x128xf32, #tpu.memory_space<vmem>>, %arg3: memref<2x16x128xf32, #tpu.memory_space<vmem>>, %arg4: memref<2x16x128xf32, #tpu.memory_space<vmem>>, %arg5: memref<2x4x16x16xf32, #tpu.memory_space<vmem>>, %arg6: memref<128x128xbf16, #tpu.memory_space<vmem>>, %arg7: memref<1x128xf32, #tpu.memory_space<vmem>>, %arg8: memref<128x128xbf16, #tpu.memory_space<vmem>>, %arg9: memref<1x128xf32, #tpu.memory_space<vmem>>, %arg10: memref<128x128xbf16, #tpu.memory_space<vmem>>, %arg11: memref<1x128xf32, #tpu.memory_space<vmem>>, %arg12: memref<128x128xbf16, #tpu.memory_space<vmem>>, %arg13: memref<1x128xf32, #tpu.memory_space<vmem>>, %arg14: memref<1x128xf32, #tpu.memory_space<vmem>>, %arg15: memref<1x128xf32, #tpu.memory_space<vmem>>, %arg16: memref<1x128xf32, #tpu.memory_space<vmem>>, %arg17: memref<1x128xf32, #tpu.memory_space<vmem>>, %arg18: memref<128x256xbf16, #tpu.memory_space<vmem>>, %arg19: memref<1x256xf32, #tpu.memory_space<vmem>>, %arg20: memref<256x128xbf16, #tpu.memory_space<vmem>>, %arg21: memref<1x128xf32, #tpu.memory_space<vmem>>, %arg22: memref<1x128xf32, #tpu.memory_space<vmem>>, %arg23: memref<1x128xf32, #tpu.memory_space<vmem>>, %arg24: memref<2x16x128xf32, #tpu.memory_space<vmem>>) attributes {dimension_semantics = [#tpu.dimension_semantics<parallel>], iteration_bounds = array<i64: 2>, scalar_prefetch = 0 : i64, scratch_operands = 0 : i64, tpu.core_type = #tpu.core_type<tc>, window_params = [{transform_indices = @transform_0, window_bounds = array<i64: 2, 16, 128>}, {transform_indices = @transform_1, window_bounds = array<i64: 2, 16, 128>}, {transform_indices = @transform_2, window_bounds = array<i64: 2, 16, 128>}, {transform_indices = @transform_3, window_bounds = array<i64: 2, 16, 128>}, {transform_indices = @transform_4, window_bounds = array<i64: 2, 4, 16, 16>}, {pipeline_mode = #tpu.pipeline_mode<synchronous>, transform_indices = @transform_5, window_bounds = array<i64: 128, 128>}, {pipeline_mode = #tpu.pipeline_mode<synchronous>, transform_indices = @transform_6, window_bounds = array<i64: 1, 128>}, {pipeline_mode = #tpu.pipeline_mode<synchronous>, transform_indices = @transform_7, window_bounds = array<i64: 128, 128>}, {pipeline_mode = #tpu.pipeline_mode<synchronous>, transform_indices = @transform_8, window_bounds = array<i64: 1, 128>}, {pipeline_mode = #tpu.pipeline_mode<synchronous>, transform_indices = @transform_9, window_bounds = array<i64: 128, 128>}, {pipeline_mode = #tpu.pipeline_mode<synchronous>, transform_indices = @transform_10, window_bounds = array<i64: 1, 128>}, {pipeline_mode = #tpu.pipeline_mode<synchronous>, transform_indices = @transform_11, window_bounds = array<i64: 128, 128>}, {pipeline_mode = #tpu.pipeline_mode<synchronous>, transform_indices = @transform_12, window_bounds = array<i64: 1, 128>}, {pipeline_mode = #tpu.pipeline_mode<synchronous>, transform_indices = @transform_13, window_bounds = array<i64: 1, 128>}, {pipeline_mode = #tpu.pipeline_mode<synchronous>, transform_indices = @transform_14, window_bounds = array<i64: 1, 128>}, {pipeline_mode = #tpu.pipeline_mode<synchronous>, transform_indices = @transform_15, window_bounds = array<i64: 1, 128>}, {pipeline_mode = #tpu.pipeline_mode<synchronous>, transform_indices = @transform_16, window_bounds = array<i64: 1, 128>}, {pipeline_mode = #tpu.pipeline_mode<synchronous>, transform_indices = @transform_17, window_bounds = array<i64: 128, 256>}, {pipeline_mode = #tpu.pipeline_mode<synchronous>, transform_indices = @transform_18, window_bounds = array<i64: 1, 256>}, {pipeline_mode = #tpu.pipeline_mode<synchronous>, transform_indices = @transform_19, window_bounds = array<i64: 256, 128>}, {pipeline_mode = #tpu.pipeline_mode<synchronous>, transform_indices = @transform_20, window_bounds = array<i64: 1, 128>}, {pipeline_mode = #tpu.pipeline_mode<synchronous>, transform_indices = @transform_21, window_bounds = array<i64: 1, 128>}, {pipeline_mode = #tpu.pipeline_mode<synchronous>, transform_indices = @transform_22, window_bounds = array<i64: 1, 128>}, {transform_indices = @transform_23, window_bounds = array<i64: 2, 16, 128>}]} {
    %c0 = arith.constant 0 : index
    %c0_0 = arith.constant 0 : index
    %c0_1 = arith.constant 0 : index
    %0 = vector.load %arg1[%c0, %c0_0, %c0_1] : memref<2x16x128xf32, #tpu.memory_space<vmem>>, vector<2x16x128xf32>
    %1 = vector.shape_cast %0 : vector<2x16x128xf32> to vector<32x128xf32>
    %c0_2 = arith.constant 0 : index
    %c0_3 = arith.constant 0 : index
    %c0_4 = arith.constant 0 : index
    %2 = vector.load %arg2[%c0_2, %c0_3, %c0_4] : memref<2x16x128xf32, #tpu.memory_space<vmem>>, vector<2x16x128xf32>
    %3 = vector.shape_cast %2 : vector<2x16x128xf32> to vector<32x128xf32>
    %c0_5 = arith.constant 0 : index
    %c0_6 = arith.constant 0 : index
    %c0_7 = arith.constant 0 : index
    %4 = vector.load %arg3[%c0_5, %c0_6, %c0_7] : memref<2x16x128xf32, #tpu.memory_space<vmem>>, vector<2x16x128xf32>
    %5 = vector.shape_cast %4 : vector<2x16x128xf32> to vector<32x128xf32>
    %c0_8 = arith.constant 0 : index
    %c0_9 = arith.constant 0 : index
    %c0_10 = arith.constant 0 : index
    %6 = vector.load %arg4[%c0_8, %c0_9, %c0_10] : memref<2x16x128xf32, #tpu.memory_space<vmem>>, vector<2x16x128xf32>
    %7 = vector.shape_cast %6 : vector<2x16x128xf32> to vector<32x128xf32>
    %8 = arith.addf %1, %7 : vector<32x128xf32>
    %9 = arith.addf %3, %7 : vector<32x128xf32>
    %10 = arith.truncf %8 : vector<32x128xf32> to vector<32x128xbf16>
    %c0_11 = arith.constant 0 : index
    %c0_12 = arith.constant 0 : index
    %11 = vector.load %arg6[%c0_11, %c0_12] : memref<128x128xbf16, #tpu.memory_space<vmem>>, vector<128x128xbf16>
    %cst = arith.constant dense<0.000000e+00> : vector<32x128xf32>
    %12 = tpu.matmul %10, %11, %cst {dimension_numbers = #tpu.dot_dimension_numbers<[1], [0], [0], [1], [0, 0, 1, 1], [], []>} : vector<32x128xbf16>, vector<128x128xbf16>, vector<32x128xf32> -> vector<32x128xf32>
    %c0_13 = arith.constant 0 : index
    %c0_14 = arith.constant 0 : index
    %13 = vector.load %arg7[%c0_13, %c0_14] : memref<1x128xf32, #tpu.memory_space<vmem>>, vector<1x128xf32>
    %14 = vector.broadcast %13 : vector<1x128xf32> to vector<32x128xf32>
    %15 = arith.addf %12, %14 : vector<32x128xf32>
    %16 = arith.truncf %9 : vector<32x128xf32> to vector<32x128xbf16>
    %c0_15 = arith.constant 0 : index
    %c0_16 = arith.constant 0 : index
    %17 = vector.load %arg8[%c0_15, %c0_16] : memref<128x128xbf16, #tpu.memory_space<vmem>>, vector<128x128xbf16>
    %cst_17 = arith.constant dense<0.000000e+00> : vector<32x128xf32>
    %18 = tpu.matmul %16, %17, %cst_17 {dimension_numbers = #tpu.dot_dimension_numbers<[1], [0], [0], [1], [0, 0, 1, 1], [], []>} : vector<32x128xbf16>, vector<128x128xbf16>, vector<32x128xf32> -> vector<32x128xf32>
    %c0_18 = arith.constant 0 : index
    %c0_19 = arith.constant 0 : index
    %19 = vector.load %arg9[%c0_18, %c0_19] : memref<1x128xf32, #tpu.memory_space<vmem>>, vector<1x128xf32>
    %20 = vector.broadcast %19 : vector<1x128xf32> to vector<32x128xf32>
    %21 = arith.addf %18, %20 : vector<32x128xf32>
    %22 = arith.truncf %5 : vector<32x128xf32> to vector<32x128xbf16>
    %c0_20 = arith.constant 0 : index
    %c0_21 = arith.constant 0 : index
    %23 = vector.load %arg10[%c0_20, %c0_21] : memref<128x128xbf16, #tpu.memory_space<vmem>>, vector<128x128xbf16>
    %cst_22 = arith.constant dense<0.000000e+00> : vector<32x128xf32>
    %24 = tpu.matmul %22, %23, %cst_22 {dimension_numbers = #tpu.dot_dimension_numbers<[1], [0], [0], [1], [0, 0, 1, 1], [], []>} : vector<32x128xbf16>, vector<128x128xbf16>, vector<32x128xf32> -> vector<32x128xf32>
    %c0_23 = arith.constant 0 : index
    %c0_24 = arith.constant 0 : index
    %25 = vector.load %arg11[%c0_23, %c0_24] : memref<1x128xf32, #tpu.memory_space<vmem>>, vector<1x128xf32>
    %26 = vector.broadcast %25 : vector<1x128xf32> to vector<32x128xf32>
    %27 = arith.addf %24, %26 : vector<32x128xf32>
    %cst_25 = arith.constant 0.176776692 : f32
    %28 = vector.broadcast %cst_25 : f32 to vector<32x128xf32>
    %29 = arith.mulf %15, %28 : vector<32x128xf32>
    %30 = arith.truncf %29 : vector<32x128xf32> to vector<32x128xbf16>
    %31 = arith.truncf %21 : vector<32x128xf32> to vector<32x128xbf16>
    %32 = arith.truncf %27 : vector<32x128xf32> to vector<32x128xbf16>
    %33 = vector.extract_strided_slice %30 {offsets = [0, 0], sizes = [16, 32], strides = [1, 1]} : vector<32x128xbf16> to vector<16x32xbf16>
    %34 = vector.extract_strided_slice %31 {offsets = [0, 0], sizes = [16, 32], strides = [1, 1]} : vector<32x128xbf16> to vector<16x32xbf16>
    %35 = vector.extract_strided_slice %32 {offsets = [0, 0], sizes = [16, 32], strides = [1, 1]} : vector<32x128xbf16> to vector<16x32xbf16>
    %cst_26 = arith.constant dense<0.000000e+00> : vector<16x16xf32>
    %36 = tpu.matmul %33, %34, %cst_26 {dimension_numbers = #tpu.dot_dimension_numbers<[1], [1], [0], [0], [0, 0, 1, 0], [], []>} : vector<16x32xbf16>, vector<16x32xbf16>, vector<16x16xf32> -> vector<16x16xf32>
    %c0_27 = arith.constant 0 : index
    %c0_28 = arith.constant 0 : index
    %c0_29 = arith.constant 0 : index
    %c0_30 = arith.constant 0 : index
    %37 = vector.load %arg5[%c0_27, %c0_28, %c0_29, %c0_30] : memref<2x4x16x16xf32, #tpu.memory_space<vmem>>, vector<1x1x16x16xf32>
    %38 = vector.shape_cast %37 : vector<1x1x16x16xf32> to vector<16x16xf32>
    %cst_31 = arith.constant 9.99999997E-7 : f32
    %39 = vector.broadcast %cst_31 : f32 to vector<16x16xf32>
    %40 = arith.maximumf %38, %39 : vector<16x16xf32>
    %41 = math.log %40 : vector<16x16xf32>
    %42 = arith.addf %36, %41 : vector<16x16xf32>
    %cst_32 = arith.constant dense<0xFF800000> : vector<16xf32>
    %43 = vector.multi_reduction <maximumf>, %42, %cst_32 [1] : vector<16x16xf32> to vector<16xf32>
    %44 = vector.shape_cast %43 : vector<16xf32> to vector<16x1xf32>
    %45 = vector.broadcast %44 : vector<16x1xf32> to vector<16x16xf32>
    %46 = arith.subf %42, %45 : vector<16x16xf32>
    %47 = math.exp %46 : vector<16x16xf32>
    %cst_33 = arith.constant dense<0.000000e+00> : vector<16xf32>
    %48 = vector.multi_reduction <add>, %47, %cst_33 [1] : vector<16x16xf32> to vector<16xf32>
    %49 = vector.shape_cast %48 : vector<16xf32> to vector<16x1xf32>
    %50 = tpu.reciprocal %49 {approx = true} : vector<16x1xf32> -> vector<16x1xf32>
    %51 = vector.broadcast %50 : vector<16x1xf32> to vector<16x16xf32>
    %52 = arith.mulf %47, %51 : vector<16x16xf32>
    %53 = arith.truncf %52 : vector<16x16xf32> to vector<16x16xbf16>
    %cst_34 = arith.constant dense<0.000000e+00> : vector<16x32xf32>
    %54 = tpu.matmul %53, %35, %cst_34 {dimension_numbers = #tpu.dot_dimension_numbers<[1], [0], [0], [1], [0, 0, 1, 1], [], []>} : vector<16x16xbf16>, vector<16x32xbf16>, vector<16x32xf32> -> vector<16x32xf32>
    %55 = vector.extract_strided_slice %30 {offsets = [0, 32], sizes = [16, 32], strides = [1, 1]} : vector<32x128xbf16> to vector<16x32xbf16>
    %56 = vector.extract_strided_slice %31 {offsets = [0, 32], sizes = [16, 32], strides = [1, 1]} : vector<32x128xbf16> to vector<16x32xbf16>
    %57 = vector.extract_strided_slice %32 {offsets = [0, 32], sizes = [16, 32], strides = [1, 1]} : vector<32x128xbf16> to vector<16x32xbf16>
    %cst_35 = arith.constant dense<0.000000e+00> : vector<16x16xf32>
    %58 = tpu.matmul %55, %56, %cst_35 {dimension_numbers = #tpu.dot_dimension_numbers<[1], [1], [0], [0], [0, 0, 1, 0], [], []>} : vector<16x32xbf16>, vector<16x32xbf16>, vector<16x16xf32> -> vector<16x16xf32>
    %c0_36 = arith.constant 0 : index
    %c1 = arith.constant 1 : index
    %c0_37 = arith.constant 0 : index
    %c0_38 = arith.constant 0 : index
    %59 = vector.load %arg5[%c0_36, %c1, %c0_37, %c0_38] : memref<2x4x16x16xf32, #tpu.memory_space<vmem>>, vector<1x1x16x16xf32>
    %60 = vector.shape_cast %59 : vector<1x1x16x16xf32> to vector<16x16xf32>
    %cst_39 = arith.constant 9.99999997E-7 : f32
    %61 = vector.broadcast %cst_39 : f32 to vector<16x16xf32>
    %62 = arith.maximumf %60, %61 : vector<16x16xf32>
    %63 = math.log %62 : vector<16x16xf32>
    %64 = arith.addf %58, %63 : vector<16x16xf32>
    %cst_40 = arith.constant dense<0xFF800000> : vector<16xf32>
    %65 = vector.multi_reduction <maximumf>, %64, %cst_40 [1] : vector<16x16xf32> to vector<16xf32>
    %66 = vector.shape_cast %65 : vector<16xf32> to vector<16x1xf32>
    %67 = vector.broadcast %66 : vector<16x1xf32> to vector<16x16xf32>
    %68 = arith.subf %64, %67 : vector<16x16xf32>
    %69 = math.exp %68 : vector<16x16xf32>
    %cst_41 = arith.constant dense<0.000000e+00> : vector<16xf32>
    %70 = vector.multi_reduction <add>, %69, %cst_41 [1] : vector<16x16xf32> to vector<16xf32>
    %71 = vector.shape_cast %70 : vector<16xf32> to vector<16x1xf32>
    %72 = tpu.reciprocal %71 {approx = true} : vector<16x1xf32> -> vector<16x1xf32>
    %73 = vector.broadcast %72 : vector<16x1xf32> to vector<16x16xf32>
    %74 = arith.mulf %69, %73 : vector<16x16xf32>
    %75 = arith.truncf %74 : vector<16x16xf32> to vector<16x16xbf16>
    %cst_42 = arith.constant dense<0.000000e+00> : vector<16x32xf32>
    %76 = tpu.matmul %75, %57, %cst_42 {dimension_numbers = #tpu.dot_dimension_numbers<[1], [0], [0], [1], [0, 0, 1, 1], [], []>} : vector<16x16xbf16>, vector<16x32xbf16>, vector<16x32xf32> -> vector<16x32xf32>
    %77 = vector.extract_strided_slice %30 {offsets = [0, 64], sizes = [16, 32], strides = [1, 1]} : vector<32x128xbf16> to vector<16x32xbf16>
    %78 = vector.extract_strided_slice %31 {offsets = [0, 64], sizes = [16, 32], strides = [1, 1]} : vector<32x128xbf16> to vector<16x32xbf16>
    %79 = vector.extract_strided_slice %32 {offsets = [0, 64], sizes = [16, 32], strides = [1, 1]} : vector<32x128xbf16> to vector<16x32xbf16>
    %cst_43 = arith.constant dense<0.000000e+00> : vector<16x16xf32>
    %80 = tpu.matmul %77, %78, %cst_43 {dimension_numbers = #tpu.dot_dimension_numbers<[1], [1], [0], [0], [0, 0, 1, 0], [], []>} : vector<16x32xbf16>, vector<16x32xbf16>, vector<16x16xf32> -> vector<16x16xf32>
    %c0_44 = arith.constant 0 : index
    %c2 = arith.constant 2 : index
    %c0_45 = arith.constant 0 : index
    %c0_46 = arith.constant 0 : index
    %81 = vector.load %arg5[%c0_44, %c2, %c0_45, %c0_46] : memref<2x4x16x16xf32, #tpu.memory_space<vmem>>, vector<1x1x16x16xf32>
    %82 = vector.shape_cast %81 : vector<1x1x16x16xf32> to vector<16x16xf32>
    %cst_47 = arith.constant 9.99999997E-7 : f32
    %83 = vector.broadcast %cst_47 : f32 to vector<16x16xf32>
    %84 = arith.maximumf %82, %83 : vector<16x16xf32>
    %85 = math.log %84 : vector<16x16xf32>
    %86 = arith.addf %80, %85 : vector<16x16xf32>
    %cst_48 = arith.constant dense<0xFF800000> : vector<16xf32>
    %87 = vector.multi_reduction <maximumf>, %86, %cst_48 [1] : vector<16x16xf32> to vector<16xf32>
    %88 = vector.shape_cast %87 : vector<16xf32> to vector<16x1xf32>
    %89 = vector.broadcast %88 : vector<16x1xf32> to vector<16x16xf32>
    %90 = arith.subf %86, %89 : vector<16x16xf32>
    %91 = math.exp %90 : vector<16x16xf32>
    %cst_49 = arith.constant dense<0.000000e+00> : vector<16xf32>
    %92 = vector.multi_reduction <add>, %91, %cst_49 [1] : vector<16x16xf32> to vector<16xf32>
    %93 = vector.shape_cast %92 : vector<16xf32> to vector<16x1xf32>
    %94 = tpu.reciprocal %93 {approx = true} : vector<16x1xf32> -> vector<16x1xf32>
    %95 = vector.broadcast %94 : vector<16x1xf32> to vector<16x16xf32>
    %96 = arith.mulf %91, %95 : vector<16x16xf32>
    %97 = arith.truncf %96 : vector<16x16xf32> to vector<16x16xbf16>
    %cst_50 = arith.constant dense<0.000000e+00> : vector<16x32xf32>
    %98 = tpu.matmul %97, %79, %cst_50 {dimension_numbers = #tpu.dot_dimension_numbers<[1], [0], [0], [1], [0, 0, 1, 1], [], []>} : vector<16x16xbf16>, vector<16x32xbf16>, vector<16x32xf32> -> vector<16x32xf32>
    %99 = vector.extract_strided_slice %30 {offsets = [0, 96], sizes = [16, 32], strides = [1, 1]} : vector<32x128xbf16> to vector<16x32xbf16>
    %100 = vector.extract_strided_slice %31 {offsets = [0, 96], sizes = [16, 32], strides = [1, 1]} : vector<32x128xbf16> to vector<16x32xbf16>
    %101 = vector.extract_strided_slice %32 {offsets = [0, 96], sizes = [16, 32], strides = [1, 1]} : vector<32x128xbf16> to vector<16x32xbf16>
    %cst_51 = arith.constant dense<0.000000e+00> : vector<16x16xf32>
    %102 = tpu.matmul %99, %100, %cst_51 {dimension_numbers = #tpu.dot_dimension_numbers<[1], [1], [0], [0], [0, 0, 1, 0], [], []>} : vector<16x32xbf16>, vector<16x32xbf16>, vector<16x16xf32> -> vector<16x16xf32>
    %c0_52 = arith.constant 0 : index
    %c3 = arith.constant 3 : index
    %c0_53 = arith.constant 0 : index
    %c0_54 = arith.constant 0 : index
    %103 = vector.load %arg5[%c0_52, %c3, %c0_53, %c0_54] : memref<2x4x16x16xf32, #tpu.memory_space<vmem>>, vector<1x1x16x16xf32>
    %104 = vector.shape_cast %103 : vector<1x1x16x16xf32> to vector<16x16xf32>
    %cst_55 = arith.constant 9.99999997E-7 : f32
    %105 = vector.broadcast %cst_55 : f32 to vector<16x16xf32>
    %106 = arith.maximumf %104, %105 : vector<16x16xf32>
    %107 = math.log %106 : vector<16x16xf32>
    %108 = arith.addf %102, %107 : vector<16x16xf32>
    %cst_56 = arith.constant dense<0xFF800000> : vector<16xf32>
    %109 = vector.multi_reduction <maximumf>, %108, %cst_56 [1] : vector<16x16xf32> to vector<16xf32>
    %110 = vector.shape_cast %109 : vector<16xf32> to vector<16x1xf32>
    %111 = vector.broadcast %110 : vector<16x1xf32> to vector<16x16xf32>
    %112 = arith.subf %108, %111 : vector<16x16xf32>
    %113 = math.exp %112 : vector<16x16xf32>
    %cst_57 = arith.constant dense<0.000000e+00> : vector<16xf32>
    %114 = vector.multi_reduction <add>, %113, %cst_57 [1] : vector<16x16xf32> to vector<16xf32>
    %115 = vector.shape_cast %114 : vector<16xf32> to vector<16x1xf32>
    %116 = tpu.reciprocal %115 {approx = true} : vector<16x1xf32> -> vector<16x1xf32>
    %117 = vector.broadcast %116 : vector<16x1xf32> to vector<16x16xf32>
    %118 = arith.mulf %113, %117 : vector<16x16xf32>
    %119 = arith.truncf %118 : vector<16x16xf32> to vector<16x16xbf16>
    %cst_58 = arith.constant dense<0.000000e+00> : vector<16x32xf32>
    %120 = tpu.matmul %119, %101, %cst_58 {dimension_numbers = #tpu.dot_dimension_numbers<[1], [0], [0], [1], [0, 0, 1, 1], [], []>} : vector<16x16xbf16>, vector<16x32xbf16>, vector<16x32xf32> -> vector<16x32xf32>
    %121 = tpu.concatenate %54, %76, %98, %120 in 1 : vector<16x32xf32>, vector<16x32xf32>, vector<16x32xf32>, vector<16x32xf32> -> vector<16x128xf32>
    %122 = vector.extract_strided_slice %30 {offsets = [16, 0], sizes = [16, 32], strides = [1, 1]} : vector<32x128xbf16> to vector<16x32xbf16>
    %123 = vector.extract_strided_slice %31 {offsets = [16, 0], sizes = [16, 32], strides = [1, 1]} : vector<32x128xbf16> to vector<16x32xbf16>
    %124 = vector.extract_strided_slice %32 {offsets = [16, 0], sizes = [16, 32], strides = [1, 1]} : vector<32x128xbf16> to vector<16x32xbf16>
    %cst_59 = arith.constant dense<0.000000e+00> : vector<16x16xf32>
    %125 = tpu.matmul %122, %123, %cst_59 {dimension_numbers = #tpu.dot_dimension_numbers<[1], [1], [0], [0], [0, 0, 1, 0], [], []>} : vector<16x32xbf16>, vector<16x32xbf16>, vector<16x16xf32> -> vector<16x16xf32>
    %c1_60 = arith.constant 1 : index
    %c0_61 = arith.constant 0 : index
    %c0_62 = arith.constant 0 : index
    %c0_63 = arith.constant 0 : index
    %126 = vector.load %arg5[%c1_60, %c0_61, %c0_62, %c0_63] : memref<2x4x16x16xf32, #tpu.memory_space<vmem>>, vector<1x1x16x16xf32>
    %127 = vector.shape_cast %126 : vector<1x1x16x16xf32> to vector<16x16xf32>
    %cst_64 = arith.constant 9.99999997E-7 : f32
    %128 = vector.broadcast %cst_64 : f32 to vector<16x16xf32>
    %129 = arith.maximumf %127, %128 : vector<16x16xf32>
    %130 = math.log %129 : vector<16x16xf32>
    %131 = arith.addf %125, %130 : vector<16x16xf32>
    %cst_65 = arith.constant dense<0xFF800000> : vector<16xf32>
    %132 = vector.multi_reduction <maximumf>, %131, %cst_65 [1] : vector<16x16xf32> to vector<16xf32>
    %133 = vector.shape_cast %132 : vector<16xf32> to vector<16x1xf32>
    %134 = vector.broadcast %133 : vector<16x1xf32> to vector<16x16xf32>
    %135 = arith.subf %131, %134 : vector<16x16xf32>
    %136 = math.exp %135 : vector<16x16xf32>
    %cst_66 = arith.constant dense<0.000000e+00> : vector<16xf32>
    %137 = vector.multi_reduction <add>, %136, %cst_66 [1] : vector<16x16xf32> to vector<16xf32>
    %138 = vector.shape_cast %137 : vector<16xf32> to vector<16x1xf32>
    %139 = tpu.reciprocal %138 {approx = true} : vector<16x1xf32> -> vector<16x1xf32>
    %140 = vector.broadcast %139 : vector<16x1xf32> to vector<16x16xf32>
    %141 = arith.mulf %136, %140 : vector<16x16xf32>
    %142 = arith.truncf %141 : vector<16x16xf32> to vector<16x16xbf16>
    %cst_67 = arith.constant dense<0.000000e+00> : vector<16x32xf32>
    %143 = tpu.matmul %142, %124, %cst_67 {dimension_numbers = #tpu.dot_dimension_numbers<[1], [0], [0], [1], [0, 0, 1, 1], [], []>} : vector<16x16xbf16>, vector<16x32xbf16>, vector<16x32xf32> -> vector<16x32xf32>
    %144 = vector.extract_strided_slice %30 {offsets = [16, 32], sizes = [16, 32], strides = [1, 1]} : vector<32x128xbf16> to vector<16x32xbf16>
    %145 = vector.extract_strided_slice %31 {offsets = [16, 32], sizes = [16, 32], strides = [1, 1]} : vector<32x128xbf16> to vector<16x32xbf16>
    %146 = vector.extract_strided_slice %32 {offsets = [16, 32], sizes = [16, 32], strides = [1, 1]} : vector<32x128xbf16> to vector<16x32xbf16>
    %cst_68 = arith.constant dense<0.000000e+00> : vector<16x16xf32>
    %147 = tpu.matmul %144, %145, %cst_68 {dimension_numbers = #tpu.dot_dimension_numbers<[1], [1], [0], [0], [0, 0, 1, 0], [], []>} : vector<16x32xbf16>, vector<16x32xbf16>, vector<16x16xf32> -> vector<16x16xf32>
    %c1_69 = arith.constant 1 : index
    %c1_70 = arith.constant 1 : index
    %c0_71 = arith.constant 0 : index
    %c0_72 = arith.constant 0 : index
    %148 = vector.load %arg5[%c1_69, %c1_70, %c0_71, %c0_72] : memref<2x4x16x16xf32, #tpu.memory_space<vmem>>, vector<1x1x16x16xf32>
    %149 = vector.shape_cast %148 : vector<1x1x16x16xf32> to vector<16x16xf32>
    %cst_73 = arith.constant 9.99999997E-7 : f32
    %150 = vector.broadcast %cst_73 : f32 to vector<16x16xf32>
    %151 = arith.maximumf %149, %150 : vector<16x16xf32>
    %152 = math.log %151 : vector<16x16xf32>
    %153 = arith.addf %147, %152 : vector<16x16xf32>
    %cst_74 = arith.constant dense<0xFF800000> : vector<16xf32>
    %154 = vector.multi_reduction <maximumf>, %153, %cst_74 [1] : vector<16x16xf32> to vector<16xf32>
    %155 = vector.shape_cast %154 : vector<16xf32> to vector<16x1xf32>
    %156 = vector.broadcast %155 : vector<16x1xf32> to vector<16x16xf32>
    %157 = arith.subf %153, %156 : vector<16x16xf32>
    %158 = math.exp %157 : vector<16x16xf32>
    %cst_75 = arith.constant dense<0.000000e+00> : vector<16xf32>
    %159 = vector.multi_reduction <add>, %158, %cst_75 [1] : vector<16x16xf32> to vector<16xf32>
    %160 = vector.shape_cast %159 : vector<16xf32> to vector<16x1xf32>
    %161 = tpu.reciprocal %160 {approx = true} : vector<16x1xf32> -> vector<16x1xf32>
    %162 = vector.broadcast %161 : vector<16x1xf32> to vector<16x16xf32>
    %163 = arith.mulf %158, %162 : vector<16x16xf32>
    %164 = arith.truncf %163 : vector<16x16xf32> to vector<16x16xbf16>
    %cst_76 = arith.constant dense<0.000000e+00> : vector<16x32xf32>
    %165 = tpu.matmul %164, %146, %cst_76 {dimension_numbers = #tpu.dot_dimension_numbers<[1], [0], [0], [1], [0, 0, 1, 1], [], []>} : vector<16x16xbf16>, vector<16x32xbf16>, vector<16x32xf32> -> vector<16x32xf32>
    %166 = vector.extract_strided_slice %30 {offsets = [16, 64], sizes = [16, 32], strides = [1, 1]} : vector<32x128xbf16> to vector<16x32xbf16>
    %167 = vector.extract_strided_slice %31 {offsets = [16, 64], sizes = [16, 32], strides = [1, 1]} : vector<32x128xbf16> to vector<16x32xbf16>
    %168 = vector.extract_strided_slice %32 {offsets = [16, 64], sizes = [16, 32], strides = [1, 1]} : vector<32x128xbf16> to vector<16x32xbf16>
    %cst_77 = arith.constant dense<0.000000e+00> : vector<16x16xf32>
    %169 = tpu.matmul %166, %167, %cst_77 {dimension_numbers = #tpu.dot_dimension_numbers<[1], [1], [0], [0], [0, 0, 1, 0], [], []>} : vector<16x32xbf16>, vector<16x32xbf16>, vector<16x16xf32> -> vector<16x16xf32>
    %c1_78 = arith.constant 1 : index
    %c2_79 = arith.constant 2 : index
    %c0_80 = arith.constant 0 : index
    %c0_81 = arith.constant 0 : index
    %170 = vector.load %arg5[%c1_78, %c2_79, %c0_80, %c0_81] : memref<2x4x16x16xf32, #tpu.memory_space<vmem>>, vector<1x1x16x16xf32>
    %171 = vector.shape_cast %170 : vector<1x1x16x16xf32> to vector<16x16xf32>
    %cst_82 = arith.constant 9.99999997E-7 : f32
    %172 = vector.broadcast %cst_82 : f32 to vector<16x16xf32>
    %173 = arith.maximumf %171, %172 : vector<16x16xf32>
    %174 = math.log %173 : vector<16x16xf32>
    %175 = arith.addf %169, %174 : vector<16x16xf32>
    %cst_83 = arith.constant dense<0xFF800000> : vector<16xf32>
    %176 = vector.multi_reduction <maximumf>, %175, %cst_83 [1] : vector<16x16xf32> to vector<16xf32>
    %177 = vector.shape_cast %176 : vector<16xf32> to vector<16x1xf32>
    %178 = vector.broadcast %177 : vector<16x1xf32> to vector<16x16xf32>
    %179 = arith.subf %175, %178 : vector<16x16xf32>
    %180 = math.exp %179 : vector<16x16xf32>
    %cst_84 = arith.constant dense<0.000000e+00> : vector<16xf32>
    %181 = vector.multi_reduction <add>, %180, %cst_84 [1] : vector<16x16xf32> to vector<16xf32>
    %182 = vector.shape_cast %181 : vector<16xf32> to vector<16x1xf32>
    %183 = tpu.reciprocal %182 {approx = true} : vector<16x1xf32> -> vector<16x1xf32>
    %184 = vector.broadcast %183 : vector<16x1xf32> to vector<16x16xf32>
    %185 = arith.mulf %180, %184 : vector<16x16xf32>
    %186 = arith.truncf %185 : vector<16x16xf32> to vector<16x16xbf16>
    %cst_85 = arith.constant dense<0.000000e+00> : vector<16x32xf32>
    %187 = tpu.matmul %186, %168, %cst_85 {dimension_numbers = #tpu.dot_dimension_numbers<[1], [0], [0], [1], [0, 0, 1, 1], [], []>} : vector<16x16xbf16>, vector<16x32xbf16>, vector<16x32xf32> -> vector<16x32xf32>
    %188 = vector.extract_strided_slice %30 {offsets = [16, 96], sizes = [16, 32], strides = [1, 1]} : vector<32x128xbf16> to vector<16x32xbf16>
    %189 = vector.extract_strided_slice %31 {offsets = [16, 96], sizes = [16, 32], strides = [1, 1]} : vector<32x128xbf16> to vector<16x32xbf16>
    %190 = vector.extract_strided_slice %32 {offsets = [16, 96], sizes = [16, 32], strides = [1, 1]} : vector<32x128xbf16> to vector<16x32xbf16>
    %cst_86 = arith.constant dense<0.000000e+00> : vector<16x16xf32>
    %191 = tpu.matmul %188, %189, %cst_86 {dimension_numbers = #tpu.dot_dimension_numbers<[1], [1], [0], [0], [0, 0, 1, 0], [], []>} : vector<16x32xbf16>, vector<16x32xbf16>, vector<16x16xf32> -> vector<16x16xf32>
    %c1_87 = arith.constant 1 : index
    %c3_88 = arith.constant 3 : index
    %c0_89 = arith.constant 0 : index
    %c0_90 = arith.constant 0 : index
    %192 = vector.load %arg5[%c1_87, %c3_88, %c0_89, %c0_90] : memref<2x4x16x16xf32, #tpu.memory_space<vmem>>, vector<1x1x16x16xf32>
    %193 = vector.shape_cast %192 : vector<1x1x16x16xf32> to vector<16x16xf32>
    %cst_91 = arith.constant 9.99999997E-7 : f32
    %194 = vector.broadcast %cst_91 : f32 to vector<16x16xf32>
    %195 = arith.maximumf %193, %194 : vector<16x16xf32>
    %196 = math.log %195 : vector<16x16xf32>
    %197 = arith.addf %191, %196 : vector<16x16xf32>
    %cst_92 = arith.constant dense<0xFF800000> : vector<16xf32>
    %198 = vector.multi_reduction <maximumf>, %197, %cst_92 [1] : vector<16x16xf32> to vector<16xf32>
    %199 = vector.shape_cast %198 : vector<16xf32> to vector<16x1xf32>
    %200 = vector.broadcast %199 : vector<16x1xf32> to vector<16x16xf32>
    %201 = arith.subf %197, %200 : vector<16x16xf32>
    %202 = math.exp %201 : vector<16x16xf32>
    %cst_93 = arith.constant dense<0.000000e+00> : vector<16xf32>
    %203 = vector.multi_reduction <add>, %202, %cst_93 [1] : vector<16x16xf32> to vector<16xf32>
    %204 = vector.shape_cast %203 : vector<16xf32> to vector<16x1xf32>
    %205 = tpu.reciprocal %204 {approx = true} : vector<16x1xf32> -> vector<16x1xf32>
    %206 = vector.broadcast %205 : vector<16x1xf32> to vector<16x16xf32>
    %207 = arith.mulf %202, %206 : vector<16x16xf32>
    %208 = arith.truncf %207 : vector<16x16xf32> to vector<16x16xbf16>
    %cst_94 = arith.constant dense<0.000000e+00> : vector<16x32xf32>
    %209 = tpu.matmul %208, %190, %cst_94 {dimension_numbers = #tpu.dot_dimension_numbers<[1], [0], [0], [1], [0, 0, 1, 1], [], []>} : vector<16x16xbf16>, vector<16x32xbf16>, vector<16x32xf32> -> vector<16x32xf32>
    %210 = tpu.concatenate %143, %165, %187, %209 in 1 : vector<16x32xf32>, vector<16x32xf32>, vector<16x32xf32>, vector<16x32xf32> -> vector<16x128xf32>
    %211 = tpu.concatenate %121, %210 in 0 : vector<16x128xf32>, vector<16x128xf32> -> vector<32x128xf32>
    %212 = arith.truncf %211 : vector<32x128xf32> to vector<32x128xbf16>
    %c0_95 = arith.constant 0 : index
    %c0_96 = arith.constant 0 : index
    %213 = vector.load %arg12[%c0_95, %c0_96] : memref<128x128xbf16, #tpu.memory_space<vmem>>, vector<128x128xbf16>
    %cst_97 = arith.constant dense<0.000000e+00> : vector<32x128xf32>
    %214 = tpu.matmul %212, %213, %cst_97 {dimension_numbers = #tpu.dot_dimension_numbers<[1], [0], [0], [1], [0, 0, 1, 1], [], []>} : vector<32x128xbf16>, vector<128x128xbf16>, vector<32x128xf32> -> vector<32x128xf32>
    %c0_98 = arith.constant 0 : index
    %c0_99 = arith.constant 0 : index
    %215 = vector.load %arg13[%c0_98, %c0_99] : memref<1x128xf32, #tpu.memory_space<vmem>>, vector<1x128xf32>
    %216 = vector.broadcast %215 : vector<1x128xf32> to vector<32x128xf32>
    %217 = arith.addf %214, %216 : vector<32x128xf32>
    %218 = arith.addf %8, %217 : vector<32x128xf32>
    %c0_100 = arith.constant 0 : index
    %c0_101 = arith.constant 0 : index
    %219 = vector.load %arg14[%c0_100, %c0_101] : memref<1x128xf32, #tpu.memory_space<vmem>>, vector<1x128xf32>
    %c0_102 = arith.constant 0 : index
    %c0_103 = arith.constant 0 : index
    %220 = vector.load %arg15[%c0_102, %c0_103] : memref<1x128xf32, #tpu.memory_space<vmem>>, vector<1x128xf32>
    %cst_104 = arith.constant dense<0.000000e+00> : vector<32xf32>
    %221 = vector.multi_reduction <add>, %218, %cst_104 [1] : vector<32x128xf32> to vector<32xf32>
    %222 = vector.shape_cast %221 : vector<32xf32> to vector<32x1xf32>
    %cst_105 = arith.constant 1.280000e+02 : f32
    %223 = vector.broadcast %cst_105 : f32 to vector<32x1xf32>
    %224 = arith.divf %222, %223 : vector<32x1xf32>
    %225 = vector.broadcast %224 : vector<32x1xf32> to vector<32x128xf32>
    %226 = arith.subf %218, %225 : vector<32x128xf32>
    %227 = arith.mulf %226, %226 : vector<32x128xf32>
    %cst_106 = arith.constant dense<0.000000e+00> : vector<32xf32>
    %228 = vector.multi_reduction <add>, %227, %cst_106 [1] : vector<32x128xf32> to vector<32xf32>
    %229 = vector.shape_cast %228 : vector<32xf32> to vector<32x1xf32>
    %cst_107 = arith.constant 1.280000e+02 : f32
    %230 = vector.broadcast %cst_107 : f32 to vector<32x1xf32>
    %231 = arith.divf %229, %230 : vector<32x1xf32>
    %232 = vector.broadcast %224 : vector<32x1xf32> to vector<32x128xf32>
    %233 = arith.subf %218, %232 : vector<32x128xf32>
    %cst_108 = arith.constant 9.99999974E-6 : f32
    %234 = vector.broadcast %cst_108 : f32 to vector<32x1xf32>
    %235 = arith.addf %231, %234 : vector<32x1xf32>
    %236 = math.rsqrt %235 : vector<32x1xf32>
    %237 = vector.broadcast %236 : vector<32x1xf32> to vector<32x128xf32>
    %238 = arith.mulf %233, %237 : vector<32x128xf32>
    %239 = vector.broadcast %219 : vector<1x128xf32> to vector<32x128xf32>
    %240 = arith.mulf %238, %239 : vector<32x128xf32>
    %241 = vector.broadcast %220 : vector<1x128xf32> to vector<32x128xf32>
    %242 = arith.addf %240, %241 : vector<32x128xf32>
    %243 = arith.addf %1, %242 : vector<32x128xf32>
    %c0_109 = arith.constant 0 : index
    %c0_110 = arith.constant 0 : index
    %244 = vector.load %arg16[%c0_109, %c0_110] : memref<1x128xf32, #tpu.memory_space<vmem>>, vector<1x128xf32>
    %c0_111 = arith.constant 0 : index
    %c0_112 = arith.constant 0 : index
    %245 = vector.load %arg17[%c0_111, %c0_112] : memref<1x128xf32, #tpu.memory_space<vmem>>, vector<1x128xf32>
    %cst_113 = arith.constant dense<0.000000e+00> : vector<32xf32>
    %246 = vector.multi_reduction <add>, %243, %cst_113 [1] : vector<32x128xf32> to vector<32xf32>
    %247 = vector.shape_cast %246 : vector<32xf32> to vector<32x1xf32>
    %cst_114 = arith.constant 1.280000e+02 : f32
    %248 = vector.broadcast %cst_114 : f32 to vector<32x1xf32>
    %249 = arith.divf %247, %248 : vector<32x1xf32>
    %250 = vector.broadcast %249 : vector<32x1xf32> to vector<32x128xf32>
    %251 = arith.subf %243, %250 : vector<32x128xf32>
    %252 = arith.mulf %251, %251 : vector<32x128xf32>
    %cst_115 = arith.constant dense<0.000000e+00> : vector<32xf32>
    %253 = vector.multi_reduction <add>, %252, %cst_115 [1] : vector<32x128xf32> to vector<32xf32>
    %254 = vector.shape_cast %253 : vector<32xf32> to vector<32x1xf32>
    %cst_116 = arith.constant 1.280000e+02 : f32
    %255 = vector.broadcast %cst_116 : f32 to vector<32x1xf32>
    %256 = arith.divf %254, %255 : vector<32x1xf32>
    %257 = vector.broadcast %249 : vector<32x1xf32> to vector<32x128xf32>
    %258 = arith.subf %243, %257 : vector<32x128xf32>
    %cst_117 = arith.constant 9.99999974E-6 : f32
    %259 = vector.broadcast %cst_117 : f32 to vector<32x1xf32>
    %260 = arith.addf %256, %259 : vector<32x1xf32>
    %261 = math.rsqrt %260 : vector<32x1xf32>
    %262 = vector.broadcast %261 : vector<32x1xf32> to vector<32x128xf32>
    %263 = arith.mulf %258, %262 : vector<32x128xf32>
    %264 = vector.broadcast %244 : vector<1x128xf32> to vector<32x128xf32>
    %265 = arith.mulf %263, %264 : vector<32x128xf32>
    %266 = vector.broadcast %245 : vector<1x128xf32> to vector<32x128xf32>
    %267 = arith.addf %265, %266 : vector<32x128xf32>
    %268 = arith.truncf %267 : vector<32x128xf32> to vector<32x128xbf16>
    %c0_118 = arith.constant 0 : index
    %c0_119 = arith.constant 0 : index
    %269 = vector.load %arg18[%c0_118, %c0_119] : memref<128x256xbf16, #tpu.memory_space<vmem>>, vector<128x256xbf16>
    %cst_120 = arith.constant dense<0.000000e+00> : vector<32x256xf32>
    %270 = tpu.matmul %268, %269, %cst_120 {dimension_numbers = #tpu.dot_dimension_numbers<[1], [0], [0], [1], [0, 0, 1, 1], [], []>} : vector<32x128xbf16>, vector<128x256xbf16>, vector<32x256xf32> -> vector<32x256xf32>
    %c0_121 = arith.constant 0 : index
    %c0_122 = arith.constant 0 : index
    %271 = vector.load %arg19[%c0_121, %c0_122] : memref<1x256xf32, #tpu.memory_space<vmem>>, vector<1x256xf32>
    %272 = vector.broadcast %271 : vector<1x256xf32> to vector<32x256xf32>
    %273 = arith.addf %270, %272 : vector<32x256xf32>
    %cst_123 = arith.constant 0.000000e+00 : f32
    %274 = vector.broadcast %cst_123 : f32 to vector<32x256xf32>
    %275 = arith.maximumf %273, %274 : vector<32x256xf32>
    %276 = arith.truncf %275 : vector<32x256xf32> to vector<32x256xbf16>
    %c0_124 = arith.constant 0 : index
    %c0_125 = arith.constant 0 : index
    %277 = vector.load %arg20[%c0_124, %c0_125] : memref<256x128xbf16, #tpu.memory_space<vmem>>, vector<256x128xbf16>
    %cst_126 = arith.constant dense<0.000000e+00> : vector<32x128xf32>
    %278 = tpu.matmul %276, %277, %cst_126 {dimension_numbers = #tpu.dot_dimension_numbers<[1], [0], [0], [1], [0, 0, 1, 1], [], []>} : vector<32x256xbf16>, vector<256x128xbf16>, vector<32x128xf32> -> vector<32x128xf32>
    %c0_127 = arith.constant 0 : index
    %c0_128 = arith.constant 0 : index
    %279 = vector.load %arg21[%c0_127, %c0_128] : memref<1x128xf32, #tpu.memory_space<vmem>>, vector<1x128xf32>
    %280 = vector.broadcast %279 : vector<1x128xf32> to vector<32x128xf32>
    %281 = arith.addf %278, %280 : vector<32x128xf32>
    %282 = arith.addf %267, %281 : vector<32x128xf32>
    %c0_129 = arith.constant 0 : index
    %c0_130 = arith.constant 0 : index
    %283 = vector.load %arg22[%c0_129, %c0_130] : memref<1x128xf32, #tpu.memory_space<vmem>>, vector<1x128xf32>
    %c0_131 = arith.constant 0 : index
    %c0_132 = arith.constant 0 : index
    %284 = vector.load %arg23[%c0_131, %c0_132] : memref<1x128xf32, #tpu.memory_space<vmem>>, vector<1x128xf32>
    %cst_133 = arith.constant dense<0.000000e+00> : vector<32xf32>
    %285 = vector.multi_reduction <add>, %282, %cst_133 [1] : vector<32x128xf32> to vector<32xf32>
    %286 = vector.shape_cast %285 : vector<32xf32> to vector<32x1xf32>
    %cst_134 = arith.constant 1.280000e+02 : f32
    %287 = vector.broadcast %cst_134 : f32 to vector<32x1xf32>
    %288 = arith.divf %286, %287 : vector<32x1xf32>
    %289 = vector.broadcast %288 : vector<32x1xf32> to vector<32x128xf32>
    %290 = arith.subf %282, %289 : vector<32x128xf32>
    %291 = arith.mulf %290, %290 : vector<32x128xf32>
    %cst_135 = arith.constant dense<0.000000e+00> : vector<32xf32>
    %292 = vector.multi_reduction <add>, %291, %cst_135 [1] : vector<32x128xf32> to vector<32xf32>
    %293 = vector.shape_cast %292 : vector<32xf32> to vector<32x1xf32>
    %cst_136 = arith.constant 1.280000e+02 : f32
    %294 = vector.broadcast %cst_136 : f32 to vector<32x1xf32>
    %295 = arith.divf %293, %294 : vector<32x1xf32>
    %296 = vector.broadcast %288 : vector<32x1xf32> to vector<32x128xf32>
    %297 = arith.subf %282, %296 : vector<32x128xf32>
    %cst_137 = arith.constant 9.99999974E-6 : f32
    %298 = vector.broadcast %cst_137 : f32 to vector<32x1xf32>
    %299 = arith.addf %295, %298 : vector<32x1xf32>
    %300 = math.rsqrt %299 : vector<32x1xf32>
    %301 = vector.broadcast %300 : vector<32x1xf32> to vector<32x128xf32>
    %302 = arith.mulf %297, %301 : vector<32x128xf32>
    %303 = vector.broadcast %283 : vector<1x128xf32> to vector<32x128xf32>
    %304 = arith.mulf %302, %303 : vector<32x128xf32>
    %305 = vector.broadcast %284 : vector<1x128xf32> to vector<32x128xf32>
    %306 = arith.addf %304, %305 : vector<32x128xf32>
    %307 = vector.shape_cast %306 : vector<32x128xf32> to vector<2x16x128xf32>
    %c0_138 = arith.constant 0 : index
    %c0_139 = arith.constant 0 : index
    %c0_140 = arith.constant 0 : index
    %308 = vector.load %arg24[%c0_138, %c0_139, %c0_140] : memref<2x16x128xf32, #tpu.memory_space<vmem>>, vector<2x16x128xf32>
    tpu.vector_store %arg24[%c0_138, %c0_139, %c0_140], %307 {strides = array<i32>} : memref<2x16x128xf32, #tpu.memory_space<vmem>>, vector<2x16x128xf32>,
    return
  }
  func.func @transform_0(%arg0: i32) -> (i32, i32, i32) {
    %c0_i32 = arith.constant 0 : i32
    %c0_i32_0 = arith.constant 0 : i32
    %c0_i32_1 = arith.constant 0 : i32
    return %arg0, %c0_i32, %c0_i32_0 : i32, i32, i32
  }
  func.func @transform_1(%arg0: i32) -> (i32, i32, i32) {
    %c0_i32 = arith.constant 0 : i32
    %c0_i32_0 = arith.constant 0 : i32
    %c0_i32_1 = arith.constant 0 : i32
    return %arg0, %c0_i32, %c0_i32_0 : i32, i32, i32
  }
  func.func @transform_2(%arg0: i32) -> (i32, i32, i32) {
    %c0_i32 = arith.constant 0 : i32
    %c0_i32_0 = arith.constant 0 : i32
    %c0_i32_1 = arith.constant 0 : i32
    return %arg0, %c0_i32, %c0_i32_0 : i32, i32, i32
  }
  func.func @transform_3(%arg0: i32) -> (i32, i32, i32) {
    %c0_i32 = arith.constant 0 : i32
    %c0_i32_0 = arith.constant 0 : i32
    %c0_i32_1 = arith.constant 0 : i32
    return %arg0, %c0_i32, %c0_i32_0 : i32, i32, i32
  }
  func.func @transform_4(%arg0: i32) -> (i32, i32, i32, i32) {
    %c0_i32 = arith.constant 0 : i32
    %c0_i32_0 = arith.constant 0 : i32
    %c0_i32_1 = arith.constant 0 : i32
    %c0_i32_2 = arith.constant 0 : i32
    return %arg0, %c0_i32, %c0_i32_0, %c0_i32_1 : i32, i32, i32, i32
  }
  func.func @transform_5(%arg0: i32) -> (i32, i32) {
    %c0_i32 = arith.constant 0 : i32
    %c0_i32_0 = arith.constant 0 : i32
    %c0_i32_1 = arith.constant 0 : i32
    return %c0_i32, %c0_i32_0 : i32, i32
  }
  func.func @transform_6(%arg0: i32) -> (i32, i32) {
    %c0_i32 = arith.constant 0 : i32
    %c0_i32_0 = arith.constant 0 : i32
    %c0_i32_1 = arith.constant 0 : i32
    return %c0_i32, %c0_i32_0 : i32, i32
  }
  func.func @transform_7(%arg0: i32) -> (i32, i32) {
    %c0_i32 = arith.constant 0 : i32
    %c0_i32_0 = arith.constant 0 : i32
    %c0_i32_1 = arith.constant 0 : i32
    return %c0_i32, %c0_i32_0 : i32, i32
  }
  func.func @transform_8(%arg0: i32) -> (i32, i32) {
    %c0_i32 = arith.constant 0 : i32
    %c0_i32_0 = arith.constant 0 : i32
    %c0_i32_1 = arith.constant 0 : i32
    return %c0_i32, %c0_i32_0 : i32, i32
  }
  func.func @transform_9(%arg0: i32) -> (i32, i32) {
    %c0_i32 = arith.constant 0 : i32
    %c0_i32_0 = arith.constant 0 : i32
    %c0_i32_1 = arith.constant 0 : i32
    return %c0_i32, %c0_i32_0 : i32, i32
  }
  func.func @transform_10(%arg0: i32) -> (i32, i32) {
    %c0_i32 = arith.constant 0 : i32
    %c0_i32_0 = arith.constant 0 : i32
    %c0_i32_1 = arith.constant 0 : i32
    return %c0_i32, %c0_i32_0 : i32, i32
  }
  func.func @transform_11(%arg0: i32) -> (i32, i32) {
    %c0_i32 = arith.constant 0 : i32
    %c0_i32_0 = arith.constant 0 : i32
    %c0_i32_1 = arith.constant 0 : i32
    return %c0_i32, %c0_i32_0 : i32, i32
  }
  func.func @transform_12(%arg0: i32) -> (i32, i32) {
    %c0_i32 = arith.constant 0 : i32
    %c0_i32_0 = arith.constant 0 : i32
    %c0_i32_1 = arith.constant 0 : i32
    return %c0_i32, %c0_i32_0 : i32, i32
  }
  func.func @transform_13(%arg0: i32) -> (i32, i32) {
    %c0_i32 = arith.constant 0 : i32
    %c0_i32_0 = arith.constant 0 : i32
    %c0_i32_1 = arith.constant 0 : i32
    return %c0_i32, %c0_i32_0 : i32, i32
  }
  func.func @transform_14(%arg0: i32) -> (i32, i32) {
    %c0_i32 = arith.constant 0 : i32
    %c0_i32_0 = arith.constant 0 : i32
    %c0_i32_1 = arith.constant 0 : i32
    return %c0_i32, %c0_i32_0 : i32, i32
  }
  func.func @transform_15(%arg0: i32) -> (i32, i32) {
    %c0_i32 = arith.constant 0 : i32
    %c0_i32_0 = arith.constant 0 : i32
    %c0_i32_1 = arith.constant 0 : i32
    return %c0_i32, %c0_i32_0 : i32, i32
  }
  func.func @transform_16(%arg0: i32) -> (i32, i32) {
    %c0_i32 = arith.constant 0 : i32
    %c0_i32_0 = arith.constant 0 : i32
    %c0_i32_1 = arith.constant 0 : i32
    return %c0_i32, %c0_i32_0 : i32, i32
  }
  func.func @transform_17(%arg0: i32) -> (i32, i32) {
    %c0_i32 = arith.constant 0 : i32
    %c0_i32_0 = arith.constant 0 : i32
    %c0_i32_1 = arith.constant 0 : i32
    return %c0_i32, %c0_i32_0 : i32, i32
  }
  func.func @transform_18(%arg0: i32) -> (i32, i32) {
    %c0_i32 = arith.constant 0 : i32
    %c0_i32_0 = arith.constant 0 : i32
    %c0_i32_1 = arith.constant 0 : i32
    return %c0_i32, %c0_i32_0 : i32, i32
  }
  func.func @transform_19(%arg0: i32) -> (i32, i32) {
    %c0_i32 = arith.constant 0 : i32
    %c0_i32_0 = arith.constant 0 : i32
    %c0_i32_1 = arith.constant 0 : i32
    return %c0_i32, %c0_i32_0 : i32, i32
  }
  func.func @transform_20(%arg0: i32) -> (i32, i32) {
    %c0_i32 = arith.constant 0 : i32
    %c0_i32_0 = arith.constant 0 : i32
    %c0_i32_1 = arith.constant 0 : i32
    return %c0_i32, %c0_i32_0 : i32, i32
  }
  func.func @transform_21(%arg0: i32) -> (i32, i32) {
    %c0_i32 = arith.constant 0 : i32
    %c0_i32_0 = arith.constant 0 : i32
    %c0_i32_1 = arith.constant 0 : i32
    return %c0_i32, %c0_i32_0 : i32, i32
  }
  func.func @transform_22(%arg0: i32) -> (i32, i32) {
    %c0_i32 = arith.constant 0 : i32
    %c0_i32_0 = arith.constant 0 : i32
    %c0_i32_1 = arith.constant 0 : i32
    return %c0_i32, %c0_i32_0 : i32, i32
  }
  func.func @transform_23(%arg0: i32) -> (i32, i32, i32) {
    %c0_i32 = arith.constant 0 : i32
    %c0_i32_0 = arith.constant 0 : i32
    %c0_i32_1 = arith.constant 0 : i32
    return %arg0, %c0_i32, %c0_i32_0 : i32, i32, i32
  }
}

</mosaic_0001>

<bundles_post_ra>
// kernel: tpu_custom_call.1
= control target key start
LH: loop header
LB: loop body
LE: loop exit
PB: predicated region body
PF: predicated region fallthrough
CT: control target
= control target key end

     0   :  { %s4969_s0 = inlined_call_operand.hbm [shape: f32[4,16,128], index: 0, kind: input, shape index: {}]   ;;  %s4970_s1 = inlined_call_operand.hbm [shape: f32[4,16,128], index: 1, kind: input, shape index: {}]   ;;  %s4971_s2 = inlined_call_operand.hbm [shape: f32[4,16,128], index: 2, kind: input, shape index: {}]   ;;  %s4972_s3 = inlined_call_operand.hbm [shape: f32[4,16,128], index: 3, kind: input, shape index: {}]   ;;  %s4973_s4 = inlined_call_operand.hbm [shape: f32[4,4,16,16], index: 4, kind: input, shape index: {}]   ;;  %s4974_s5 = inlined_call_operand.hbm [shape: bf16[128,128], index: 5, kind: input, shape index: {}]   ;;  %s4975_s6 = inlined_call_operand.vmem [shape: f32[1,128], index: 6, kind: input, shape index: {}]   ;;  %s4976_s7 = inlined_call_operand.hbm [shape: bf16[128,128], index: 7, kind: input, shape index: {}]   ;;  %s4977_s8 = inlined_call_operand.vmem [shape: f32[1,128], index: 8, kind: input, shape index: {}]   ;;  %s4978_s9 = inlined_call_operand.hbm [shape: bf16[128,128], index: 9, kind: input, shape index: {}]   ;;  %s4979_s10 = inlined_call_operand.vmem [shape: f32[1,128], index: 10, kind: input, shape index: {}]   ;;  %s4980_s11 = inlined_call_operand.hbm [shape: bf16[128,128], index: 11, kind: input, shape index: {}]   ;;  %s4981_s12 = inlined_call_operand.vmem [shape: f32[1,128], index: 12, kind: input, shape index: {}]   ;;  %s4982_s13 = inlined_call_operand.vmem [shape: f32[1,128], index: 13, kind: input, shape index: {}]   ;;  %s4983_s14 = inlined_call_operand.vmem [shape: f32[1,128], index: 14, kind: input, shape index: {}]   ;;  %s4984_s15 = inlined_call_operand.vmem [shape: f32[1,128], index: 15, kind: input, shape index: {}]   ;;  %s4985_s16 = inlined_call_operand.vmem [shape: f32[1,128], index: 16, kind: input, shape index: {}]   ;;  %s4986_s17 = inlined_call_operand.hbm [shape: bf16[128,256], index: 17, kind: input, shape index: {}]   ;;  %s4987_s18 = inlined_call_operand.vmem [shape: f32[1,256], index: 18, kind: input, shape index: {}]   ;;  %s4988_s19 = inlined_call_operand.hbm [shape: bf16[256,128], index: 19, kind: input, shape index: {}]   ;;  %s4989_s20 = inlined_call_operand.vmem [shape: f32[1,128], index: 20, kind: input, shape index: {}]   ;;  %s4990_s21 = inlined_call_operand.vmem [shape: f32[1,128], index: 21, kind: input, shape index: {}]   ;;  %s4991_s22 = inlined_call_operand.vmem [shape: f32[1,128], index: 22, kind: input, shape index: {}]   ;;  %s4992_s23 = inlined_call_operand.hbm [shape: f32[4,16,128], index: 23, kind: output, shape index: {}]  }
   0x1   :  { %5017 = sst [smem:[#allocation34_spill]] %s4969_s0 }
   0x2   :  { %5018 = sst [smem:[#allocation35_spill]] %s4970_s1 }
   0x3   :  { %5019 = sst [smem:[#allocation36_spill]] %s4971_s2 }
   0x4   :  { %5020 = sst [smem:[#allocation37_spill]] %s4972_s3 }
   0x5   :  { %5021 = sst [smem:[#allocation38_spill]] %s4973_s4 }
   0x6   :  { %5022 = sst [smem:[#allocation39_spill]] %s4974_s5 }
   0x7   :  { %5023 = sst [smem:[#allocation40_spill]] %s4975_s6 }
   0x8   :  { %5024 = sst [smem:[#allocation41_spill]] %s4976_s7 }
   0x9   :  { %5025 = sst [smem:[#allocation42_spill]] %s4977_s8 }
   0xa   :  { %5026 = sst [smem:[#allocation43_spill]] %s4978_s9 }
   0xb   :  { %5027 = sst [smem:[#allocation44_spill]] %s4979_s10 }
   0xc   :  { %5028 = sst [smem:[#allocation45_spill]] %s4980_s11 }
   0xd   :  { %5029 = sst [smem:[#allocation46_spill]] %s4981_s12 }
   0xe   :  { %5030 = sst [smem:[#allocation47_spill]] %s4982_s13 }
   0xf   :  { %5031 = sst [smem:[#allocation48_spill]] %s4983_s14 }
  0x10   :  { %5032 = sst [smem:[#allocation49_spill]] %s4984_s15 }
  0x11   :  { %5033 = sst [smem:[#allocation50_spill]] %s4985_s16 }
  0x12   :  { %5034 = sst [smem:[#allocation51_spill]] %s4986_s17 }
  0x13   :  { %5035 = sst [smem:[#allocation52_spill]] %s4987_s18 }
  0x14   :  { %5036 = sst [smem:[#allocation53_spill]] %s4988_s19 }
  0x15   :  { %5037 = sst [smem:[#allocation54_spill]] %s4989_s20 }
  0x16   :  { %5038 = sst [smem:[#allocation55_spill]] %s4990_s21 }
  0x17   :  { %5039 = sst [smem:[#allocation56_spill]] %s4991_s22 }
  0x18   :  { %5040 = sst [smem:[#allocation57_spill]] %s4992_s23 }
  0x19   :  { %28 = vsyncpa [#allocation3], 0 }
  0x1a   :  { %30 = vsyncpa [#allocation3 + $0x1], 0 }
  0x1b   :  { %31 = vsyncpa [#allocation6], 0 }
  0x1c   :  { %33 = vsyncpa [#allocation6 + $0x1], 0 }
  0x1d   :  { %34 = vsyncpa [#allocation9], 0 }
  0x1e   :  { %36 = vsyncpa [#allocation9 + $0x1], 0 }
  0x1f   :  { %37 = vsyncpa [#allocation12], 0 }
  0x20   :  { %38 = vsyncpa [#allocation15], 0 }
  0x21   :  { %39 = vsyncpa [#allocation18], 0 }
  0x22   :  { %40 = vsyncpa [#allocation4], 0 }
  0x23   :  { %42 = vsyncpa [#allocation4 + $0x1], 0  ;;  %s4225_s4 = smov 0   ;;  %s4227_s30 = smov 0  }
  0x24   :  { %s4229_s24 = smov 0   ;;  %s4231_s25 = smov 0  }
  0x25 LB: > { %5041 = sst [smem:[#allocation28_spill]] %s4075_s4  ;;  %s4249_s6 = sadd.s32 4294967295, %s4087_s25   ;;  %s4087_s25 = sphi %s4231_s25, %s5092_s25   ;;  %s4083_s24 = sphi %s4229_s24, %s5094_s24   ;;  %s4079_s30 = sphi %s4227_s30, %s5096_s30   ;;  %s4075_s4 = sphi %s4225_s4, %s5095_s4  }
  0x26   : > { %5042 = sst [smem:[#allocation29_spill]] %s4083_s24  ;;  %p2958_p0 = scmp.ge.s32.totalorder %s4087_s25, 1 }
  0x27   : > { %s5043_s26 = sld [smem:[#allocation39_spill]]  ;;  %p5014_p1 = scmp.eq.s32.totalorder %s4249_s6, 0 }
  0x28   : > { %p587_p2 = scmp.lt.s32.totalorder %s4087_s25, 3  ;;  %s4089_s7 = smov [#allocation11]  }
  0x29   : > { %s600_s28 = sshll.u32 %s4089_s7, 4  ;;  %s5045_s9 = sld [smem:[#allocation43_spill]]  ;;  %s601_s28 = int_to_ptr.vmem [resolvable:$true] %s600_s28 }
  0x2a   : > { %p4254_p3 = pnand %p2958_p0, %p587_p2  ;;  %s5047_s17 = sld [smem:[#allocation51_spill]] }
  0x2b   : > { %s4090_s23 = smov [#allocation14]   ;;  %s4999_s29 = smov 64  }
  0x2c   : > { %p3403_p4 = pneg %p4254_p3  ;;  %s634_s22 = sshll.u32 %s4090_s23, 4  ;;  %s635_s22 = int_to_ptr.vmem [resolvable:$true] %s634_s22 }
  0x2d   : > { %s598_s2 = sshll.u32 %s5043_s26, 4  ;;  %s5001_s3 = smov 4   ;;  %s599_s2 = int_to_ptr.hbm [resolvable:$true] %s598_s2 }
  0x2e   : > { %p4266_p6 = pnand %p3403_p4, %p5014_p1  ;;  %s4093_s23 = smov [#allocation17]  }
  0x2f   : > { %s632_s0 = sshll.u32 %s5045_s9, 4  ;;  %s680_s1 = sshll.u32 %s4093_s23, 4  ;;  %s633_s0 = int_to_ptr.hbm [resolvable:$true] %s632_s0  ;;  %s681_s1 = int_to_ptr.vmem [resolvable:$true] %s680_s1 }
  0x30   : > { %s678_s7 = sshll.u32 %s5047_s17, 4  ;;  %s5003_s26 = smov 128   ;;  %s679_s7 = int_to_ptr.hbm [resolvable:$true] %s678_s7 }
  0x31   : > { %3406 = dma.hbm_to_vmem [thread:$0]  (!%p4266_p6), %s599_s2, 1024, %s601_s28, [#allocation12], %s4999_s29, %s4999_s29, %s5001_s3  }
  0x32   : > { %3412 = dma.hbm_to_vmem [thread:$0]  (!%p4266_p6), %s633_s0, 1024, %s635_s22, [#allocation15], %s4999_s29, %s4999_s29, %s5001_s3  }
  0x33   : > { %s5005_s9 = smov 8   ;;  %s2957_s2 = sadd.s32 4294967294, %s4087_s25  }
  0x34   : > { %3418 = dma.hbm_to_vmem [thread:$0]  (!%p4266_p6), %s679_s7, 2048, %s681_s1, [#allocation18], %s5003_s26, %s5003_s26, %s5005_s9  }
  0x35   : > { %s4290_s28 = sadd.s32 1, %s4087_s25   ;;  %s55_s17 = sadd.s32 1, %s4083_s24 }
  0x36   : > { %5048 = sst [smem:[#allocation30_spill]] %s4290_s28  ;;  %s52_s22 = ssub.s32 %s4087_s25, %s4290_s28 }
  0x37   : > { %p62_p7 = scmp.ne.s32.totalorder %s4083_s24, %s4079_s30  ;;  %p53_p8 = scmp.eq.s32.totalorder %s52_s22, 0 }
  0x38   : > { %p63_p9 = scmp.eq.s32.totalorder %s4087_s25, 0  ;;  %p68_p10 = scmp.ne.s32.totalorder %s4079_s30, %s4075_s4 }
  0x39   : > { %p574_p11 = scmp.eq.s32.totalorder %s4249_s6, 1  ;;  %p580_p2 = scmp.eq.s32.totalorder %s2957_s2, 1 }
  0x3a   : > { %s4302_s0 = scalar_select %p53_p8, %s4083_s24, %s55_s17  }
  0x3b   : > { %p64_p12 = por %p63_p9, %p62_p7  ;;  %p4306_p13 = por %p5014_p1, %p68_p10 }
  0x3c   : > { %5049 = sst [smem:[#allocation31_spill]] %s4302_s0  ;;  %p4310_p0 = por %p574_p11, %p62_p7 }
  0x3d   : > { %p3448_p4 = scmp.lt.s32.totalorder %s4087_s25, 2  ;;  %s4316_s1 = sand.u32 1, %s4083_s24  }
  0x3e   : > { %s5051_s23 = scalar_select %p4310_p0, 1, 0 }
  0x3f   : > { %p4318_p5 = por %p580_p2, %p68_p10  ;;  %s4323_s17 = sshll.u32 %s4316_s1, 5 }
  0x40   : > { %5052 = sst [smem:[#allocation32_spill]] %s5051_s23  ;;  %s4326_s29 = sshll.u32 %s4087_s25, 5 }
  0x41   : > { %s5053_s22 = scalar_select %p4318_p5, 1, 0 }
  0x42   : > { %p4328_p8 = pnand %p3448_p4, %p64_p12  ;;  %s743_s2 = sand.u32 1, %s4087_s25  }
  0x43   : > { %5054 = sst [smem:[#allocation33_spill]] %s5053_s22  ;;  %s747_s28 = scalar_lea.vmem [#allocation5], %s4323_s17 }
  0x44   : > { %s5056_s0 = sld [smem:[#allocation35_spill]]  ;;  %s756_s4 = sshll.u32 %s747_s28, 4  ;;  %s757_s4 = int_to_ptr.vmem [resolvable:$true] %s756_s4 }
  0x45   : > { %s4338_s22 = scalar_lea.sflag [#allocation6], %s743_s2  ;;  %p4342_p9 = pneg %p4328_p8 }
  0x4a   : > { %s753_s24 = scalar_lea.hbm %s5056_s0, %s4326_s29 }
  0x4b   : > { %s754_s23 = sshll.u32 %s753_s24, 4  ;;  %s3768_s24 = scalar_lea.hbm %s5056_s0, 64  ;;  %s755_s23 = int_to_ptr.hbm [resolvable:$true] %s754_s23 }
  0x4c   : > { %s3761_s21 = sshra.s32 %s755_s23, 4  ;;  %s3762_s21 = int_to_ptr.hbm [resolvable:$true] %s3761_s21 }
  0x4d   : > { %s3763_s20 = scalar_lea.hbm %s3762_s21, 32  ;;  %p3769_p12 = scmp.lt.s32.totalorder %s3762_s21, %s5056_s0 }
  0x4e   : > { %p3764_p7 = scmp.ne.s32.totalorder %s3762_s21, %s3763_s20  ;;  %p3770_p2 = scmp.lt.s32.totalorder %s3768_s24, %s3763_s20 }
  0x50   : > { %p3766_p10 = pnand %p4342_p9, %p3764_p7  ;;  %p3771_p4 = por %p3770_p2, %p3769_p12 }
  0x52   : > { %p3767_p11 = pneg %p3766_p10 }
  0x54   : > { %p3772_p1 = pnand %p3771_p4, %p3767_p11 }
  0x56   : > { %3775 = shalt.err (!%p3772_p1)
}
  0x57   : > { %s5058_s15 = smov 8   ;;  %s5059_s14 = smov 128  }
  0x58   : > { %3428 = dma.hbm_to_vmem [thread:$0]  (!%p4328_p8), %s755_s23, 512, %s757_s4, %s4338_s22, %s5059_s14, %s5059_s14, %s5058_s15  }
  0x59   : > { %s5060_s13 = sld [smem:[#allocation37_spill]]  ;;  %s793_s21 = scalar_lea.vmem [#allocation8], %s4323_s17 }
  0x5a   : > { %s802_s20 = sshll.u32 %s793_s21, 4  ;;  %s4365_s24 = scalar_lea.sflag [#allocation9], %s743_s2  ;;  %s803_s20 = int_to_ptr.vmem [resolvable:$true] %s802_s20 }
  0x5f   : > { %s799_s12 = scalar_lea.hbm %s5060_s13, %s4326_s29  ;;  %s3798_s23 = scalar_lea.hbm %s5060_s13, 64 }
  0x60   : > { %s800_s16 = sshll.u32 %s799_s12, 4  ;;  %s801_s16 = int_to_ptr.hbm [resolvable:$true] %s800_s16 }
  0x61   : > { %s3791_s28 = sshra.s32 %s801_s16, 4  ;;  %s3792_s28 = int_to_ptr.hbm [resolvable:$true] %s3791_s28 }
  0x62   : > { %s3793_s0 = scalar_lea.hbm %s3792_s28, 32  ;;  %p3799_p11 = scmp.lt.s32.totalorder %s3792_s28, %s5060_s13 }
  0x63   : > { %p3794_p1 = scmp.ne.s32.totalorder %s3792_s28, %s3793_s0  ;;  %p3800_p12 = scmp.lt.s32.totalorder %s3798_s23, %s3793_s0 }
  0x65   : > { %p3796_p7 = pnand %p3794_p1, %p4342_p9  ;;  %p3801_p2 = por %p3800_p12, %p3799_p11 }
  0x67   : > { %p3797_p10 = pneg %p3796_p7 }
  0x69   : > { %p3802_p4 = pnand %p3801_p2, %p3797_p10 }
  0x6b   : > { %3805 = shalt.err (!%p3802_p4)
}
  0x6c   : > { %3434 = dma.hbm_to_vmem [thread:$0]  (!%p4328_p8), %s801_s16, 512, %s803_s20, %s4365_s24, %s5059_s14, %s5059_s14, %s5058_s15  }
  0x6d   : > { %s5061_s2 = sld [smem:[#allocation41_spill]]  ;;  %s4096_s28 = smov [#allocation13]  }
  0x6e   : > { %s617_s0 = sshll.u32 %s4096_s28, 4  ;;  %s5062_s11 = sld [smem:[#allocation45_spill]]  ;;  %s618_s0 = int_to_ptr.vmem [resolvable:$true] %s617_s0 }
  0x6f   : > { %s5063_s26 = smov 4   ;;  %s5064_s13 = smov 64  }
  0x70   : > { %s4097_s16 = smov [#allocation16]   ;;  %s5065_s19 = sld [smem:[#allocation53_spill]] }
  0x71   : > { %s651_s20 = sshll.u32 %s4097_s16, 4  ;;  %s4098_s28 = smov [#allocation19]   ;;  %s652_s20 = int_to_ptr.vmem [resolvable:$true] %s651_s20 }
  0x72   : > { %s697_s4 = sshll.u32 %s4098_s28, 4  ;;  %s5066_s23 = sld [smem:[#allocation34_spill]]  ;;  %s698_s4 = int_to_ptr.vmem [resolvable:$true] %s697_s4 }
  0x73   : > { %s615_s21 = sshll.u32 %s5061_s2, 4  ;;  %s724_s12 = scalar_lea.vmem [#allocation2], %s4323_s17  ;;  %s616_s21 = int_to_ptr.hbm [resolvable:$true] %s615_s21 }
  0x74   : > { %s649_s9 = sshll.u32 %s5062_s11, 4  ;;  %s733_s10 = sshll.u32 %s724_s12, 4  ;;  %s650_s9 = int_to_ptr.hbm [resolvable:$true] %s649_s9  ;;  %s734_s10 = int_to_ptr.vmem [resolvable:$true] %s733_s10 }
  0x75   : > { %3409 = dma.hbm_to_vmem [thread:$0]  (!%p4266_p6), %s616_s21, 1024, %s618_s0, [#allocation12], %s5064_s13, %s5064_s13, %s5063_s26  }
  0x76   : > { %s695_s2 = sshll.u32 %s5065_s19, 4  ;;  %s721_s19 = scalar_lea.sflag [#allocation3], %s4316_s1  ;;  %s696_s2 = int_to_ptr.hbm [resolvable:$true] %s695_s2 }
  0x77   : > { %3415 = dma.hbm_to_vmem [thread:$0]  (!%p4266_p6), %s650_s9, 1024, %s652_s20, [#allocation15], %s5064_s13, %s5064_s13, %s5063_s26  }
  0x78   : > { %s730_s11 = scalar_lea.hbm %s5066_s23, %s4326_s29  ;;  %s3918_s5 = scalar_lea.hbm %s5066_s23, 64 }
  0x79   : > { %3421 = dma.hbm_to_vmem [thread:$0]  (!%p4266_p6), %s696_s2, 2048, %s698_s4, [#allocation18], %s5064_s13, %s5064_s13, %s5063_s26  }
  0x7a   : > { %s731_s16 = sshll.u32 %s730_s11, 4  ;;  %s732_s16 = int_to_ptr.hbm [resolvable:$true] %s731_s16 }
  0x7b   : > { %s3911_s9 = sshra.s32 %s732_s16, 4  ;;  %s3912_s9 = int_to_ptr.hbm [resolvable:$true] %s3911_s9 }
  0x7c   : > { %s3913_s20 = scalar_lea.hbm %s3912_s9, 32  ;;  %p3919_p6 = scmp.lt.s32.totalorder %s3912_s9, %s5066_s23 }
  0x7d   : > { %p3914_p1 = scmp.ne.s32.totalorder %s3912_s9, %s3913_s20  ;;  %p3920_p11 = scmp.lt.s32.totalorder %s3918_s5, %s3913_s20 }
  0x7f   : > { %p3916_p7 = pnand %p3914_p1, %p4342_p9  ;;  %p3921_p12 = por %p3920_p11, %p3919_p6 }
  0x81   : > { %p3917_p10 = pneg %p3916_p7 }
  0x83   : > { %p3922_p2 = pnand %p3921_p12, %p3917_p10 }
  0x85   : > { %3925 = shalt.err (!%p3922_p2)
}
  0x86   : > { %3425 = dma.hbm_to_vmem [thread:$0]  (!%p4328_p8), %s732_s16, 512, %s734_s10, %s721_s19, %s5059_s14, %s5059_s14, %s5058_s15  }
  0x87   : > { %s5067_s26 = sld [smem:[#allocation36_spill]]  ;;  %s770_s8 = scalar_lea.vmem [#allocation7], %s4323_s17 }
  0x88   : > { %s779_s12 = sshll.u32 %s770_s8, 4  ;;  %s780_s12 = int_to_ptr.vmem [resolvable:$true] %s779_s12 }
  0x8d   : > { %s776_s2 = scalar_lea.hbm %s5067_s26, %s4326_s29  ;;  %s3948_s19 = scalar_lea.hbm %s5067_s26, 64 }
  0x8e   : > { %s777_s4 = sshll.u32 %s776_s2, 4  ;;  %s778_s4 = int_to_ptr.hbm [resolvable:$true] %s777_s4 }
  0x8f   : > { %s3941_s9 = sshra.s32 %s778_s4, 4  ;;  %s3942_s9 = int_to_ptr.hbm [resolvable:$true] %s3941_s9 }
  0x90   : > { %s3943_s20 = scalar_lea.hbm %s3942_s9, 32  ;;  %p3949_p10 = scmp.lt.s32.totalorder %s3942_s9, %s5067_s26 }
  0x91   : > { %p3944_p4 = scmp.ne.s32.totalorder %s3942_s9, %s3943_s20  ;;  %p3950_p6 = scmp.lt.s32.totalorder %s3948_s19, %s3943_s20 }
  0x93   : > { %p3946_p1 = pnand %p3944_p4, %p4342_p9  ;;  %p3951_p11 = por %p3950_p6, %p3949_p10 }
  0x95   : > { %p3947_p7 = pneg %p3946_p1 }
  0x97   : > { %p3952_p12 = pnand %p3951_p11, %p3947_p7 }
  0x99   : > { %3955 = shalt.err (!%p3952_p12)
}
  0x9a   : > { %3431 = dma.hbm_to_vmem [thread:$0]  (!%p4328_p8), %s778_s4, 512, %s780_s12, %s4338_s22, %s5059_s14, %s5059_s14, %s5058_s15  }
  0x9b   : > { %s2982_s29 = sshll.u32 %s4316_s1, 7  ;;  %s3300_s17 = sshll.u32 %s4087_s25, 7 }
  0x9c   : > { %s5068_s11 = sld [smem:[#allocation38_spill]]  ;;  %s816_s8 = scalar_lea.vmem [#allocation10], %s2982_s29 }
  0x9d   : > { %s825_s9 = sshll.u32 %s816_s8, 4  ;;  %s826_s9 = int_to_ptr.vmem [resolvable:$true] %s825_s9 }
  0xa2   : > { %s822_s13 = scalar_lea.hbm %s5068_s11, %s3300_s17  ;;  %s3978_s1 = scalar_lea.hbm %s5068_s11, 256 }
  0xa3   : > { %s823_s2 = sshll.u32 %s822_s13, 4  ;;  %s824_s2 = int_to_ptr.hbm [resolvable:$true] %s823_s2 }
  0xa4   : > { %s3971_s20 = sshra.s32 %s824_s2, 4  ;;  %s3972_s20 = int_to_ptr.hbm [resolvable:$true] %s3971_s20 }
  0xa5   : > { %s3973_s28 = scalar_lea.hbm %s3972_s20, 128  ;;  %p3979_p7 = scmp.lt.s32.totalorder %s3972_s20, %s5068_s11 }
  0xa6   : > { %p3974_p2 = scmp.ne.s32.totalorder %s3972_s20, %s3973_s28  ;;  %p3980_p10 = scmp.lt.s32.totalorder %s3978_s1, %s3973_s28 }
  0xa8   : > { %p3976_p4 = pnand %p3974_p2, %p4342_p9  ;;  %p3981_p6 = por %p3980_p10, %p3979_p7 }
  0xaa   : > { %p3977_p1 = pneg %p3976_p4 }
  0xac   : > { %p3982_p11 = pnand %p3981_p6, %p3977_p1 }
  0xae   : > { %3985 = shalt.err (!%p3982_p11)
}
  0xaf   : > { %3437 = dma.hbm_to_vmem [thread:$0]  (!%p4328_p8), %s824_s2, 2048, %s826_s9, %s4365_s24, %s5059_s14, %s5059_s14, %s5058_s15  }
  0xb0   : > { %837 = sbr.rel (%p4254_p3) target bundleno = 2792 (0xae8), region = 112  ;;  %s4465_s18 = sand.u32 (!%p4254_p3), 1, %s4079_s30  }
  0xb1   : > { %s4468_s19 = sshll.u32 (!%p4254_p3), %s4465_s18, 5  ;;  %s840_s16 = scalar_lea.sflag (!%p4254_p3), [#allocation3], %s4465_s18 }
  0xb2   : > { %s4472_s10 = scalar_lea.vmem (!%p4254_p3), [#allocation2], %s4468_s19 }
  0xb5   : > { %4046 = dma.done.wait (%p4306_p13), %s840_s16, 512  }
  0xb6   : > { %4048 = vsyncadd (%p4306_p13), %s840_s16, 4294966784  ;;  %s849_s14 = sand.u32 1, %s4249_s6   ;;  %s4480_s27 = scalar_lea.vmem [#allocation5], %s4468_s19 }
  0xb7   : > { %s850_s15 = scalar_lea.sflag [#allocation6], %s849_s14 }
  0xb8   : > { %4050 = dma.done.wait (%p4306_p13), %s850_s15, 1024  }
  0xb9   : > { %4052 = vsyncadd (%p4306_p13), %s850_s15, 4294966272  ;;  %s4487_s3 = scalar_lea.vmem [#allocation7], %s4468_s19  ;;  %s870_s24 = scalar_lea.sflag [#allocation9], %s849_s14 }
  0xba   : > { %s4490_s29 = scalar_lea.vmem [#allocation8], %s4468_s19 }
  0xbb   : > { %4054 = dma.done.wait (%p4306_p13), %s870_s24, 2560  }
  0xbc   : > { %4056 = vsyncadd (%p4306_p13), %s870_s24, 4294964736  ;;  %s2991_s17 = sshll.u32 %s4465_s18, 7  ;;  %p5069_p3 = scmp.eq.s32.totalorder %s4249_s6, 0 }
  0xbd   : > { %s4497_s5 = scalar_lea.vmem [#allocation10], %s2991_s17 }
  0xbe   : > { %4058 = dma.done.wait (%p5069_p3), [#allocation12], 2048   ;;  %p5070_p8 = pmov %p5069_p3 }
  0xbf   : > { %p5071_p9 = pmov %p5069_p3 }
  0xc0   : > { %4060 = vsyncadd (%p5070_p8), [#allocation12], 4294965248 }
  0xc1   : > { %4062 = dma.done.wait (%p5071_p9), [#allocation15], 2048   ;;  %p5072_p12 = pmov %p5069_p3 }
  0xc2   : > { %p5073_p2 = pmov %p5069_p3 }
  0xc3   : > { %4064 = vsyncadd (%p5072_p12), [#allocation15], 4294965248 }
  0xc4   : > { %4066 = dma.done.wait (%p5073_p2), [#allocation18], 4096   ;;  %p5074_p13 = pmov %p5073_p2 }
  0xc5   : > { %v3308_v0 = vld [vmem:[#allocation11 + $0x38] sm:$0xff]  ;;  %v3307_v2 = vld [vmem:[#allocation11 + $0x30] sm:$0xff]  ;;  %v3306_v4 = vld [vmem:[#allocation11 + $0x28] sm:$0xff]  ;;  %s5075_s13 = sld [smem:[#allocation42_spill]]  ;;  %vm1329_vm0 = vcmask 261120   ;;  %s4099_s20 = smov 96  }
  0xc6   : > { %4068 = vsyncadd (%p5074_p13), [#allocation18], 4294963200  ;;  %v3316_v1 = vld [vmem:[#allocation13 + $0x38] sm:$0xff]  ;;  %1098 = vmatpush.bf16.msra.mxu0 %v3308_v0  ;;  %v3315_v3 = vld [vmem:[#allocation13 + $0x30] sm:$0xff]  ;;  %s5076_s9 = sld [smem:[#allocation40_spill]]  ;;  %s4100_s1 = smov 64  }
  0xc7   : > { %1187 = vmatpush.bf16.msra.mxu1 %v3316_v1  ;;  %v3314_v5 = vld [vmem:[#allocation13 + $0x28] sm:$0xff]  ;;  %v3305_v6 = vld [vmem:[#allocation11 + $0x20] sm:$0xff]  ;;  %v3304_v8 = vld [vmem:[#allocation11 + $0x18] sm:$0xff]  ;;  %s5077_s22 = sld [smem:[#allocation44_spill]]  ;;  %s4101_s4 = smov 32   ;;  %vm1350_vm1 = vcmask 130048  }
  0xc8   : > { %v3313_v7 = vld [vmem:[#allocation13 + $0x20] sm:$0xff]  ;;  %v3312_v9 = vld [vmem:[#allocation13 + $0x18] sm:$0xff]  ;;  %v3303_v11 = vld [vmem:[#allocation11 + $0x10] sm:$0xff]  ;;  %vm1651_vm2 = vcmask 523264   ;;  %vm1654_vm3 = vcmask 785408   ;;  %s5078_s14 = sld [smem:[#allocation46_spill]] }
  0xc9   : > { %v3324_v10 = vld [vmem:[#allocation14 + $0x38] sm:$0xff]  ;;  %v3311_v12 = vld [vmem:[#allocation13 + $0x10] sm:$0xff]  ;;  %v3302_v14 = vld [vmem:[#allocation11 + $0x8] sm:$0xff]  ;;  %s5080_s17 = sld [smem:[#allocation48_spill]] }
  0xca   : > { %1099 = vmatpush.bf16.msra.mxu0 %v3307_v2  ;;  %1276 = vmatpush.bf16.msra.mxu2 %v3324_v10  ;;  %v3323_v13 = vld [vmem:[#allocation14 + $0x30] sm:$0xff]  ;;  %v3310_v15 = vld [vmem:[#allocation13 + $0x8] sm:$0xff]  ;;  %v1004_v16 = vld [vmem:[%s4472_s10] sm:$0xff]  ;;  %s5081_s7 = sld [smem:[#allocation49_spill]] }
  0xcb   : > { %1188 = vmatpush.bf16.msra.mxu1 %v3315_v3  ;;  %v1005_v17 = vld [vmem:[%s4472_s10 + $0x8] sm:$0xff]  ;;  %v1016_v18 = vld [vmem:[%s4490_s29] sm:$0xff]  ;;  %v3320_v32 = vld [vmem:[#allocation14 + $0x18] sm:$0xff]  ;;  %s5082_s2 = sld [smem:[#allocation50_spill]] }
  0xcc   : > { %v1017_v19 = vld [vmem:[%s4490_s29 + $0x8] sm:$0xff]  ;;  %v1008_v20 = vld [vmem:[%s4480_s27] sm:$0xff]  ;;  %v4517_v23 = vadd.f32 %v1016_v18, %v1004_v16  ;;  %v3319_v33 = vld [vmem:[#allocation14 + $0x10] sm:$0xff]  ;;  %s5085_s12 = sld [smem:[#allocation55_spill]] }
  0xcd   : > { %v1009_v21 = vld [vmem:[%s4480_s27 + $0x8] sm:$0xff]  ;;  %v4519_v24 = vadd.f32 %v1017_v19, %v1005_v17  ;;  %v1024_v25 = vadd.f32 %v1016_v18, %v1008_v20  ;;  %v3301_v27 = vld [vmem:[#allocation11] sm:$0xff]  ;;  %v1010_v34 = vld [vmem:[%s4480_s27 + $0x10] sm:$0xff]  ;;  %s5086_s15 = sld [smem:[#allocation56_spill]] }
  0xce   : > { %1100 = vmatpush.bf16.msra.mxu0 %v3306_v4  ;;  %1277 = vmatpush.bf16.msra.mxu2 %v3323_v13  ;;  %v3322_v22 = vld [vmem:[#allocation14 + $0x28] sm:$0xff]  ;;  %v1025_v26 = vadd.f32 %v1017_v19, %v1009_v21  ;;  %v3309_v28 = vld [vmem:[#allocation13] sm:$0xff]  ;;  %v1011_v35 = vld [vmem:[%s4480_s27 + $0x18] sm:$0xff]  ;;  %s4925_s27 = scalar_lea.vmem [#allocation20], %s4468_s19  ;;  %s3366_s19 = sshll.u32 %s4249_s6, 5 }
  0xcf   : > { %1189 = vmatpush.bf16.msra.mxu1 %v3314_v5  ;;  %v3321_v29 = vld [vmem:[#allocation14 + $0x20] sm:$0xff]  ;;  %v1028_v30 = vpack.c.bf16 %v4519_v24, %v4517_v23  ;;  %v1018_v36 = vld [vmem:[%s4490_s29 + $0x10] sm:$0xff]  ;;  %v1019_v37 = vld [vmem:[%s4490_s29 + $0x18] sm:$0xff]  ;;  %s5087_s29 = sld [smem:[#allocation57_spill]]  ;;  %s2725_s6 = scalar_lea.sflag [#allocation4], %s4465_s18 }
  0xd0   : > { %v1117_v31 = vpack.c.bf16 %v1025_v26, %v1024_v25  ;;  %v3318_v38 = vld [vmem:[#allocation14 + $0x8] sm:$0xff]  ;;  %v1026_v39 = vadd.f32 %v1018_v36, %v1010_v34  ;;  %v1027_v40 = vadd.f32 %v1019_v37, %v1011_v35  ;;  %v3317_v41 = vld [vmem:[#allocation14] sm:$0xff]  ;;  %v1006_v3 = vld [vmem:[%s4472_s10 + $0x10] sm:$0xff] }
  0xd1   : > { %v1012_v42 = vld [vmem:[%s4487_s3] sm:$0xff]  ;;  %v1013_v43 = vld [vmem:[%s4487_s3 + $0x8] sm:$0xff]  ;;  %v1007_v4 = vld [vmem:[%s4472_s10 + $0x18] sm:$0xff]  ;;  %v4547_v5 = vadd.f32 %v1018_v36, %v1006_v3 }
  0xd2   : > { %1101 = vmatpush.bf16.msra.mxu0 %v3305_v6  ;;  %1278 = vmatpush.bf16.msra.mxu2 %v3322_v22  ;;  %v1118_v44 = vpack.c.bf16 %v1027_v40, %v1026_v39  ;;  %v1206_v45 = vpack.c.bf16 %v1013_v43, %v1012_v42  ;;  %v3535_v48 = vld [vmem:[%s5075_s13] ss:$0 sm:$0xff]  ;;  %v4549_v6 = vadd.f32 %v1019_v37, %v1007_v4  ;;  %v1312_v40 = vld [vmem:[%s4497_s5 + $0x8] sm:$0xff] }
  0xd3   : > { %1190 = vmatpush.bf16.msra.mxu1 %v3313_v7  ;;  %v4535_v49 = vld [vmem:[%s5076_s9] ss:$0 sm:$0xff] }
  0xd4   : > { %v4556_v10 = vld [vmem:[%s5077_s22] ss:$0 sm:$0xff]  ;;  %s5084_s22 = sld [smem:[#allocation54_spill]] }
  0xd5   : > { %v1311_v37 = vld [vmem:[%s4497_s5] sm:$0xff]  ;;  %s4021_s9 = scalar_lea.hbm %s5087_s29, 64 }
  0xd6   : > { %1102 = vmatpush.bf16.msra.mxu0 %v3304_v8  ;;  %1279 = vmatpush.bf16.msra.mxu2 %v3321_v29  ;;  %v1029_v8 = vpack.c.bf16 %v4549_v6, %v4547_v5  ;;  %v1313_v39 = vmax.f32 %v1311_v37, 1e-06 }
  0xd7   : > { %1191 = vmatpush.bf16.msra.mxu1 %v3312_v9 }
  0xd8   : > { %3545 = vlog2.f32 %v1313_v39 }
  0xda   : > { %1103 = vmatpush.bf16.msra.mxu0 %v3303_v11  ;;  %1280 = vmatpush.bf16.msra.mxu2 %v3320_v32 }
  0xdb   : > { %1192 = vmatpush.bf16.msra.mxu1 %v3311_v12 }
  0xde   : > { %1104 = vmatpush.bf16.msra.mxu0 %v3302_v14  ;;  %1281 = vmatpush.bf16.msra.mxu2 %v3319_v33  ;;  %v3546_v42 = vpop.eup %3545 }
  0xdf   : > { %1193 = vmatpush.bf16.msra.mxu1 %v3310_v15  ;;  %v1316_v43 = vmul.f32 0.6931472, %v3546_v42 }
  0xe2   : > { %1105 = vmatpush.bf16.msra.mxu0 %v3301_v27  ;;  %1282 = vmatpush.bf16.msra.mxu2 %v3318_v38 }
  0xe3   : > { %1194 = vmatpush.bf16.msra.mxu1 %v3309_v28 }
  0xe5   : > { %1106 = vmatmul.bf16.vlgmr.msra.gmra.mxu0 %v1028_v30 }
  0xe6   : > { %1195 = vmatmul.bf16.vlgmr.msra.gmra.mxu1 %v1117_v31  ;;  %1283 = vmatpush.bf16.msra.mxu2 %v3317_v41  ;;  %v1314_v41 = vmax.f32 %v1312_v40, 1e-06 }
  0xe8   : > { %3547 = vlog2.f32 %v1314_v41 }
  0xe9   : > { %1284 = vmatmul.bf16.vlgmr.msra.gmra.mxu2 %v1206_v45 }
  0xf5   : > { %1111 = vmatmul.bf16.gmra.mxu0 %v1029_v8 }
  0xf6   : > { %1200 = vmatmul.bf16.gmra.mxu1 %v1118_v44 }
 0x162   : > { %v1107_v46 = vpop.f32.mrf.mxu0 }
 0x163   : > { %v1196_v47 = vpop.f32.mrf.mxu1  ;;  %v1108_v53 = vadd.f32 %v4535_v49, %v1107_v46 }
 0x164   : > { %v1197_v50 = vadd.f32 %v3535_v48, %v1196_v47 }
 0x165   : > { %v1295_v59 = vmul.f32 0.17677669, %v1108_v53 }
 0x166   : > { %v1303_v54 = vpack.c.bf16 %v1197_v50, %v1197_v50 }
 0x167   : > { %v1299_v1 = vpack.c.bf16 %v1295_v59, %v1295_v59 }
 0x168   : > { %v1326_v60 = vunpack.c.l.b16 %v1303_v54 }
 0x169   : > { %v1321_v9 = vunpack.c.l.b16 %v1299_v1  ;;  %v3101_v1 = vld [vmem:[%s4497_s5 + $0x20] sm:$0xff] }
 0x16a   : > { %v1109_v51 = vpop.f32.mrf.mxu0 }
 0x16b   : > { %v1198_v52 = vpop.f32.mrf.mxu1  ;;  %v1110_v55 = vadd.f32 %v4535_v49, %v1109_v51 }
 0x16c   : > { %v1199_v56 = vadd.f32 %v3535_v48, %v1198_v52  ;;  %v1285_v12 = vpop.f32.mrf.mxu2 }
 0x16d   : > { %v1296_v57 = vmul.f32 0.17677669, %v1110_v55  ;;  %v1286_v16 = vadd.f32 %v4556_v10, %v1285_v12 }
 0x16e   : > { %v1304_v58 = vpack.c.bf16 %v1199_v56, %v1199_v56 }
 0x16f   : > { %v1300_v62 = vpack.c.bf16 %v1296_v57, %v1296_v57  ;;  %v1307_v19 = vpack.c.bf16 %v1286_v16, %v1286_v16 }
 0x170   : > { %v1327_v61 = vunpack.c.l.b16 %v1304_v58 }
 0x171   : > { %v1322_v7 = vunpack.c.l.b16 %v1300_v62  ;;  %v1376_v26 = vunpack.c.l.b16 %v1307_v19 }
 0x172   : > { %v4539_v63 = vpack.c.b16 %v1327_v61, %v1326_v60  ;;  %v1112_v45 = vpop.f32.mrf.mxu0 }
 0x173   : > { %v1201_v0 = vpop.f32.mrf.mxu1  ;;  %v4558_v11 = vpack.c.b16 %v1322_v7, %v1321_v9  ;;  %v1113_v47 = vadd.f32 %v4535_v49, %v1112_v45 }
 0x174   : > { %1408 = vrot.lane.b32.xlu2 %v4539_v63, %s4099_s20  ;;  %v1334_v2 = vsel %vm1329_vm0, %v4539_v63, 0  ;;  %v1202_v14 = vadd.f32 %v3535_v48, %v1201_v0  ;;  %v1287_v20 = vpop.f32.mrf.mxu2 }
 0x175   : > { %1343 = vmatpush.bf16.xpose.msra.mxu3 %v1334_v2  ;;  %v1288_v21 = vadd.f32 %v4556_v10, %v1287_v20  ;;  %v1297_v52 = vmul.f32 0.17677669, %v1113_v47  ;;  %v1476_v2 = vmax.f32 %v3101_v1, 1e-06 }
 0x176   : > { %v1305_v17 = vpack.c.bf16 %v1202_v14, %v1202_v14 }
 0x177   : > { %v1308_v27 = vpack.c.bf16 %v1288_v21, %v1288_v21  ;;  %v1301_v56 = vpack.c.bf16 %v1297_v52, %v1297_v52  ;;  %3549 = vlog2.f32 %v1476_v2 }
 0x178   : > { %v1673_v22 = vunpack.c.l.b16 %v1305_v17 }
 0x179   : > { %v1377_v28 = vunpack.c.l.b16 %v1308_v27  ;;  %v1668_v60 = vunpack.c.l.b16 %v1301_v56  ;;  %v3102_v56 = vld [vmem:[%s4497_s5 + $0x28] sm:$0xff] }
 0x17a   : > { %v1114_v54 = vpop.f32.mrf.mxu0 }
 0x17b   : > { %v1203_v13 = vpop.f32.mrf.mxu1  ;;  %v4568_v30 = vpack.c.b16 %v1377_v28, %v1376_v26  ;;  %v1115_v57 = vadd.f32 %v4535_v49, %v1114_v54 }
 0x17c   : > { %1406 = vrot.lane.b32.xlu2 %v4558_v11, %s4099_s20  ;;  %3095 = vmatmul.msk.bf16.vlgmr.msra.gmra.mxu3 %vm1329_vm0, %v4558_v11  ;;  %v1204_v15 = vadd.f32 %v3535_v48, %v1203_v13  ;;  %v3548_v48 = vpop.eup %3547 }
 0x17d   : > { %1390 = vmatpush.bf16.msrb.mxu3 %v4568_v30  ;;  %v1318_v51 = vmul.f32 0.6931472, %v3548_v48  ;;  %v1298_v59 = vmul.f32 0.17677669, %v1115_v57  ;;  %v3550_v49 = vpop.eup %3549  ;;  %v3106_v57 = vld [vmem:[%s4497_s5 + $0x38] sm:$0xff] }
 0x17e   : > { %v1306_v18 = vpack.c.bf16 %v1204_v15, %v1204_v15  ;;  %v1479_v3 = vmul.f32 0.6931472, %v3550_v49 }
 0x17f   : > { %v1302_v61 = vpack.c.bf16 %v1298_v59, %v1298_v59  ;;  %v1553_v59 = vmax.f32 %v3106_v57, 1e-06 }
 0x180   : > { %v1674_v25 = vunpack.c.l.b16 %v1306_v18 }
 0x181   : > { %v1669_v62 = vunpack.c.l.b16 %v1302_v61  ;;  %v3109_v61 = vld [vmem:[%s4497_s5 + $0x40] sm:$0xff] }
 0x182   : > { %v1675_v29 = vpack.c.b16 %v1674_v25, %v1673_v22 }
 0x183   : > { %v1670_v0 = vpack.c.b16 %v1669_v62, %v1668_v60  ;;  %v3113_v62 = vld [vmem:[%s4497_s5 + $0x50] sm:$0xff] }
 0x184   : > { %1484 = vrot.lane.b32.xlu2 %v4539_v63, %s4100_s1  ;;  %v1680_v9 = vsel %vm1329_vm0, %v1675_v29, 0 }
 0x185   : > { %1689 = vmatpush.bf16.xpose.msrb.mxu0 %v1680_v9 }
 0x18c   : > { %1753 = vrot.lane.b32.xlu2 %v1675_v29, %s4099_s20  ;;  %3111 = vmatmul.msk.bf16.vlgmr.msrb.gmra.mxu0 %vm1329_vm0, %v1670_v0 }
 0x194   : > { %1482 = vrot.lane.b32.xlu2 %v4558_v11, %s4100_s1 }
 0x19c   : > { %1905 = vrot.lane.b32.xlu2 %v1675_v29, %s4101_s4 }
 0x1a4   : > { %1827 = vrot.lane.b32.xlu2 %v1670_v0, %s4100_s1 }
 0x1ce   : > { %v1409_v31 = vpop.permute.xlu2 %1408 }
 0x1cf   : > { %v1414_v32 = vsel %vm1329_vm0, %v1409_v31, 0  ;;  %v1014_v31 = vld [vmem:[%s4487_s3 + $0x10] sm:$0xff] }
 0x1d0   : > { %1423 = vmatpush.bf16.xpose.msra.mxu3 %v1414_v32  ;;  %v1015_v32 = vld [vmem:[%s4487_s3 + $0x18] sm:$0xff]  ;;  %s5079_s3 = sld [smem:[#allocation47_spill]] }
 0x1d6   : > { %v4576_v33 = vpop.permute.xlu2 %1406 }
 0x1de   : > { %v1485_v34 = vpop.permute.xlu2 %1484 }
 0x1df   : > { %v1490_v35 = vsel %vm1329_vm0, %v1485_v34, 0  ;;  %v1207_v34 = vpack.c.bf16 %v1015_v32, %v1014_v31  ;;  %v3118_v31 = vld [vmem:[%s4497_s5 + $0x68] sm:$0xff] }
 0x1e0   : > { %1499 = vmatpush.bf16.xpose.msrb.mxu1 %v1490_v35 }
 0x1e1   : > { %1289 = vmatmul.bf16.gmra.mxu2 %v1207_v34 }
 0x1e6   : > { %v4579_v36 = vpop.permute.xlu2 %1753 }
 0x1e7   : > { %v1759_v21 = vsel %vm1329_vm0, %v4579_v36, 0 }
 0x1ee   : > { %v1483_v38 = vpop.permute.xlu2 %1482 }
 0x1ef   : > { %3103 = vmatmul.msk.bf16.vlgmr.msrb.gmra.mxu1 %vm1329_vm0, %v1483_v38 }
 0x1ff   : > { %v1345_v44 = vpop.f32.mrf.mxu3 }
 0x200   : > { %v1346_v46 = vadd.f32 %v1345_v44, %v1316_v43 }
 0x202   : > { %v1351_v50 = vsel %vm1350_vm1, %v1346_v46, -inf }
 0x203   : > { %1352 = vmax.xlane.f32.xlu0 %v1351_v50 }
 0x207   : > { %v1347_v53 = vpop.f32.mrf.mxu3 }
 0x208   : > { %v1348_v55 = vadd.f32 %v1347_v53, %v1318_v51 }
 0x209   : > { %v1691_v2 = vpop.f32.mrf.mxu0 }
 0x20a   : > { %v1354_v58 = vsel %vm1350_vm1, %v1348_v55, -inf }
 0x20b   : > { %1355 = vmax.xlane.f32.xlu0 %v1354_v58  ;;  %v1477_v58 = vmax.f32 %v3102_v56, 1e-06 }
 0x21f   : > { %1560 = vrot.lane.b32.xlu0 %v4539_v63, %s4101_s4 }
 0x227   : > { %1751 = vrot.lane.b32.xlu0 %v1670_v0, %s4099_s20 }
 0x22f   : > { %1829 = vrot.lane.b32.xlu0 %v1675_v29, %s4100_s1  ;;  %v1906_v29 = vpop.permute.xlu2 %1905 }
 0x237   : > { %v1828_v35 = vpop.permute.xlu2 %1827 }
 0x264   : > { %v1290_v45 = vpop.f32.mrf.mxu2 }
 0x26c   : > { %v1501_v4 = vpop.f32.mrf.mxu1  ;;  %v1292_v48 = vpop.f32.mrf.mxu2 }
 0x26d   : > { %v4594_v7 = vadd.f32 %v1501_v4, %v1479_v3  ;;  %v1293_v50 = vadd.f32 %v4556_v10, %v1292_v48  ;;  %v1745_v3 = vmax.f32 %v3113_v62, 1e-06  ;;  %v3098_v48 = vld [vmem:[%s4497_s5 + $0x18] sm:$0xff] }
 0x26e   : > { %v1401_v56 = vmax.f32 %v3098_v48, 1e-06 }
 0x26f   : > { %v1506_v8 = vsel %vm1350_vm1, %v4594_v7, -inf  ;;  %v1310_v52 = vpack.c.bf16 %v1293_v50, %v1293_v50 }
 0x270   : > { %1507 = vmax.xlane.f32.xlu0 %v1506_v8 }
 0x271   : > { %v1722_v53 = vunpack.c.l.b16 %v1310_v52 }
 0x276   : > { %v1353_v63 = vpop.xlane.xlu0 %1352 }
 0x277   : > { %v1357_v12 = vsub.f32 %v1346_v46, %v1353_v63  ;;  %v1291_v46 = vadd.f32 %v4556_v10, %v1290_v45  ;;  %v3110_v63 = vld [vmem:[%s4497_s5 + $0x48] sm:$0xff] }
 0x279   : > { %v1359_v13 = vmul.f32 1.442695, %v1357_v12  ;;  %v1309_v47 = vpack.c.bf16 %v1291_v46, %v1291_v46  ;;  %v3097_v46 = vld [vmem:[%s4497_s5 + $0x10] sm:$0xff] }
 0x27b   : > { %3551 = vpow2.f32 %v1359_v13  ;;  %v1721_v51 = vunpack.c.l.b16 %v1309_v47  ;;  %v1503_v13 = vpop.f32.mrf.mxu1 }
 0x27d   : > { %v4621_v54 = vpack.c.b16 %v1722_v53, %v1721_v51  ;;  %v1400_v53 = vmax.f32 %v3097_v46, 1e-06 }
 0x27e   : > { %v1356_v14 = vpop.xlane.xlu0 %1355 }
 0x27f   : > { %v1358_v15 = vsub.f32 %v1348_v55, %v1356_v14  ;;  %v3117_v14 = vld [vmem:[%s4497_s5 + $0x60] sm:$0xff] }
 0x281   : > { %v3552_v16 = vpop.eup %3551  ;;  %v1361_v17 = vmul.f32 1.442695, %v1358_v15 }
 0x282   : > { %v1363_v18 = vsel %vm1350_vm1, %v3552_v16, 0.0 }
 0x283   : > { %3553 = vpow2.f32 %v1361_v17  ;;  %1364 = vadd.xlane.f32.xlu1 %v1363_v18  ;;  %v1661_v17 = vmax.f32 %v3110_v63, 1e-06 }
 0x289   : > { %v3554_v19 = vpop.eup %3553 }
 0x28a   : > { %v1366_v20 = vsel %vm1350_vm1, %v3554_v19, 0.0 }
 0x28b   : > { %1367 = vadd.xlane.f32.xlu1 %v1366_v20  ;;  %v1821_v20 = vmax.f32 %v3117_v14, 1e-06 }
 0x291   : > { %v1561_v22 = vpop.permute.xlu0 %1560 }
 0x292   : > { %v1566_v25 = vsel %vm1329_vm0, %v1561_v22, 0 }
 0x293   : > { %1575 = vmatpush.bf16.xpose.msrb.mxu2 %v1566_v25 }
 0x299   : > { %v1752_v26 = vpop.permute.xlu0 %1751 }
 0x29b   : > { %1768 = vmatpush.bf16.xpose.msra.mxu2 %v1759_v21 }
 0x2a1   : > { %v1830_v27 = vpop.permute.xlu0 %1829 }
 0x2a2   : > { %v1835_v28 = vsel %vm1329_vm0, %v1830_v27, 0 }
 0x2a3   : > { %1844 = vmatpush.bf16.xpose.msra.mxu0 %v1835_v28  ;;  %v1693_v28 = vpop.f32.mrf.mxu0 }
 0x2a4   : > { %1558 = vrot.lane.b32.xlu1 %v4558_v11, %s4101_s4  ;;  %v1911_v11 = vsel %vm1329_vm0, %v1906_v29, 0 }
 0x2aa   : > { %3119 = vmatmul.msk.bf16.vlgmr.msra.gmra.mxu0 %vm1329_vm0, %v1828_v35 }
 0x2ac   : > { %1903 = vrot.lane.b32.xlu1 %v1670_v0, %s4101_s4  ;;  %v1660_v0 = vmax.f32 %v3109_v61, 1e-06 }
 0x2f6   : > { %v1365_v36 = vpop.xlane.xlu1 %1364 }
 0x2f7   : > { %3555 = vrcp.f32 %v1365_v36  ;;  %v3121_v36 = vld [vmem:[%s4497_s5 + $0x70] sm:$0xff] }
 0x2fd   : > { %v3556_v38 = vpop.eup %3555 }
 0x2fe   : > { %v1368_v37 = vpop.xlane.xlu1 %1367  ;;  %v1371_v40 = vmul.f32 %v3556_v38, %v3552_v16  ;;  %v3114_v16 = vld [vmem:[%s4497_s5 + $0x58] sm:$0xff] }
 0x2ff   : > { %3557 = vrcp.f32 %v1368_v37  ;;  %v1746_v25 = vmax.f32 %v3114_v16, 1e-06  ;;  %v1822_v37 = vmax.f32 %v3118_v31, 1e-06 }
 0x305   : > { %v3558_v39 = vpop.eup %3557 }
 0x306   : > { %v1372_v41 = vmul.f32 %v3558_v39, %v3554_v19 }
 0x308   : > { %v1373_v42 = vpack.c.bf16 %v1372_v41, %v1371_v40 }
 0x30a   : > { %3096 = vmatmul.msk.bf16.vlgmr.msrb.gmra.mxu3 %vm1350_vm1, %v1373_v42  ;;  %v1897_v42 = vmax.f32 %v3121_v36, 1e-06 }
 0x316   : > { %v1559_v43 = vpop.permute.xlu1 %1558 }
 0x317   : > { %3107 = vmatmul.msk.bf16.vlgmr.msrb.gmra.mxu2 %vm1329_vm0, %v1559_v43 }
 0x318   : > { %1920 = vmatpush.bf16.xpose.msrb.mxu2 %v1911_v11 }
 0x31a   : > { %3099 = vmatmul.msk.bf16.vlgmr.msra.gmra.mxu3 %vm1329_vm0, %v4576_v33  ;;  %v3105_v33 = vld [vmem:[%s4497_s5 + $0x30] sm:$0xff] }
 0x31b   : > { %v1552_v55 = vmax.f32 %v3105_v33, 1e-06 }
 0x31d   : > { %3559 = vlog2.f32 %v1552_v55  ;;  %v3122_v55 = vld [vmem:[%s4497_s5 + $0x78] sm:$0xff]  ;;  %s2738_s5 = sshll.u32 %s4925_s27, 4  ;;  %s2739_s5 = int_to_ptr.vmem [resolvable:$true] %s2738_s5 }
 0x31e   : > { %v1904_v44 = vpop.permute.xlu1 %1903  ;;  %3561 = vlog2.f32 %v1477_v58  ;;  %v1898_v61 = vmax.f32 %v3122_v55, 1e-06 }
 0x31f   : > { %3563 = vlog2.f32 %v1553_v59 }
 0x320   : > { %3565 = vlog2.f32 %v1660_v0 }
 0x321   : > { %3567 = vlog2.f32 %v1745_v3 }
 0x322   : > { %3569 = vlog2.f32 %v1661_v17 }
 0x323   : > { %v3560_v60 = vpop.eup %3559  ;;  %3571 = vlog2.f32 %v1821_v20 }
 0x324   : > { %v1555_v10 = vmul.f32 0.6931472, %v3560_v60  ;;  %v3562_v1 = vpop.eup %3561  ;;  %3573 = vlog2.f32 %v1746_v25 }
 0x325   : > { %v3564_v8 = vpop.eup %3563  ;;  %v1481_v9 = vmul.f32 0.6931472, %v3562_v1  ;;  %3575 = vlog2.f32 %v1822_v37  ;;  %v1508_v37 = vpop.xlane.xlu0 %1507 }
 0x326   : > { %v1557_v15 = vmul.f32 0.6931472, %v3564_v8  ;;  %v3566_v21 = vpop.eup %3565  ;;  %3577 = vlog2.f32 %v1897_v42  ;;  %v1512_v42 = vsub.f32 %v4594_v7, %v1508_v37 }
 0x327   : > { %3115 = vmatmul.msk.bf16.vlgmr.msra.gmra.mxu2 %vm1329_vm0, %v1752_v26  ;;  %v4637_v19 = vadd.f32 %v1503_v13, %v1481_v9  ;;  %v3568_v27 = vpop.eup %3567  ;;  %v1663_v29 = vmul.f32 0.6931472, %v3566_v21  ;;  %v1846_v45 = vpop.f32.mrf.mxu0  ;;  %3579 = vlog2.f32 %v1400_v53 }
 0x328   : > { %v1748_v35 = vmul.f32 0.6931472, %v3568_v27  ;;  %v3570_v39 = vpop.eup %3569  ;;  %3581 = vlog2.f32 %v1401_v56 }
 0x329   : > { %v1509_v34 = vsel %vm1350_vm1, %v4637_v19, -inf  ;;  %v4647_v38 = vadd.f32 %v1691_v2, %v1663_v29  ;;  %v3572_v11 = vpop.eup %3571  ;;  %v1665_v47 = vmul.f32 0.6931472, %v3570_v39  ;;  %3583 = vlog2.f32 %v1898_v61 }
 0x32a   : > { %v1824_v52 = vmul.f32 0.6931472, %v3572_v11 }
 0x32b   : > { %v1696_v50 = vsel %vm1350_vm1, %v4647_v38, -inf  ;;  %v4660_v57 = vadd.f32 %v1693_v28, %v1665_v47 }
 0x32c   : > { %v4662_v59 = vadd.f32 %v1846_v45, %v1824_v52 }
 0x32e   : > { %v1851_v8 = vsel %vm1350_vm1, %v4662_v59, -inf }
 0x32f   : > { %v1848_v3 = vpop.f32.mrf.mxu0 }
 0x337   : > { %3123 = vmatmul.msk.bf16.vlgmr.msrb.gmra.mxu2 %vm1329_vm0, %v1904_v44  ;;  %v3574_v44 = vpop.eup %3573 }
 0x338   : > { %v1750_v33 = vmul.f32 0.6931472, %v3574_v44  ;;  %v3576_v58 = vpop.eup %3575  ;;  %v1514_v44 = vmul.f32 1.442695, %v1512_v42 }
 0x339   : > { %v3578_v62 = vpop.eup %3577  ;;  %v1826_v1 = vmul.f32 0.6931472, %v3576_v58 }
 0x33a   : > { %v1900_v9 = vmul.f32 0.6931472, %v3578_v62  ;;  %v3580_v63 = vpop.eup %3579 }
 0x33b   : > { %v3582_v13 = vpop.eup %3581  ;;  %v1403_v17 = vmul.f32 0.6931472, %v3580_v63 }
 0x33c   : > { %v3584_v16 = vpop.eup %3583  ;;  %v1405_v20 = vmul.f32 0.6931472, %v3582_v13 }
 0x33d   : > { %v1902_v27 = vmul.f32 0.6931472, %v3584_v16 }
 0x38d   : > { %v4635_v18 = vpop.f32.mrf.mxu3 }
 0x395   : > { %v4649_v40 = vpop.f32.mrf.mxu3 }
 0x39a   : > { %v1577_v49 = vpop.f32.mrf.mxu2 }
 0x39b   : > { %v4628_v4 = vadd.f32 %v1577_v49, %v1555_v10  ;;  %v1699_v49 = vsel %vm1350_vm1, %v4660_v57, -inf }
 0x39d   : > { %v1582_v12 = vsel %vm1350_vm1, %v4628_v4, -inf  ;;  %v1425_v0 = vpop.f32.mrf.mxu3 }
 0x39e   : > { %1583 = vmax.xlane.f32.xlu2 %v1582_v12  ;;  %v4672_v12 = vadd.f32 %v1848_v3, %v1826_v1  ;;  %v1426_v28 = vadd.f32 %v1425_v0, %v1403_v17 }
 0x3a2   : > { %v1579_v22 = vpop.f32.mrf.mxu2 }
 0x3a3   : > { %v4639_v26 = vadd.f32 %v1579_v22, %v1557_v15  ;;  %v1854_v22 = vsel %vm1350_vm1, %v4672_v12, -inf }
 0x3a5   : > { %v1585_v32 = vsel %vm1350_vm1, %v4639_v26, -inf  ;;  %v1427_v25 = vpop.f32.mrf.mxu3 }
 0x3a6   : > { %1586 = vmax.xlane.f32.xlu1 %v1585_v32  ;;  %1510 = vmax.xlane.f32.xlu2 %v1509_v34  ;;  %v1428_v29 = vadd.f32 %v1427_v25, %v1405_v20 }
 0x3a8   : > { %v1433_v34 = vsel %vm1350_vm1, %v1428_v29, -inf }
 0x3aa   : > { %v1770_v41 = vpop.f32.mrf.mxu2 }
 0x3ab   : > { %v4651_v43 = vadd.f32 %v1770_v41, %v1748_v35  ;;  %v1430_v35 = vsel %vm1350_vm1, %v1426_v28, -inf }
 0x3ad   : > { %v1775_v51 = vsel %vm1350_vm1, %v4651_v43, -inf }
 0x3ae   : > { %1697 = vmax.xlane.f32.xlu2 %v1696_v50  ;;  %1776 = vmax.xlane.f32.xlu1 %v1775_v51 }
 0x3b2   : > { %v1772_v60 = vpop.f32.mrf.mxu2 }
 0x3b3   : > { %v4664_v10 = vadd.f32 %v1772_v60, %v1750_v33 }
 0x3b5   : > { %v1778_v2 = vsel %vm1350_vm1, %v4664_v10, -inf }
 0x3b6   : > { %1779 = vmax.xlane.f32.xlu0 %v1778_v2  ;;  %1700 = vmax.xlane.f32.xlu1 %v1699_v49 }
 0x3b7   : > { %1852 = vmax.xlane.f32.xlu2 %v1851_v8 }
 0x3ba   : > { %v1922_v14 = vpop.f32.mrf.mxu2 }
 0x3bb   : > { %v4674_v15 = vadd.f32 %v1922_v14, %v1900_v9 }
 0x3bd   : > { %v1927_v21 = vsel %vm1350_vm1, %v4674_v15, -inf }
 0x3be   : > { %1928 = vmax.xlane.f32.xlu0 %v1927_v21  ;;  %1855 = vmax.xlane.f32.xlu1 %v1854_v22 }
 0x3c2   : > { %v1924_v31 = vpop.f32.mrf.mxu2 }
 0x3c3   : > { %v4680_v32 = vadd.f32 %v1924_v31, %v1902_v27 }
 0x3c5   : > { %v1930_v36 = vsel %vm1350_vm1, %v4680_v32, -inf }
 0x3c6   : > { %1434 = vmax.xlane.f32.xlu0 %v1433_v34  ;;  %1431 = vmax.xlane.f32.xlu1 %v1430_v35 }
 0x3c7   : > { %1931 = vmax.xlane.f32.xlu2 %v1930_v36 }
 0x3da   : > { %1453 = vrot.lane.b32.xlu0 %v4568_v30, %s4099_s20 }
 0x411   : > { %v1584_v39 = vpop.xlane.xlu2 %1583 }
 0x412   : > { %v1588_v41 = vsub.f32 %v4628_v4, %v1584_v39 }
 0x414   : > { %v1590_v11 = vmul.f32 1.442695, %v1588_v41 }
 0x416   : > { %3585 = vpow2.f32 %v1590_v11 }
 0x417   : > { %3587 = vpow2.f32 %v1514_v44 }
 0x419   : > { %v1587_v45 = vpop.xlane.xlu1 %1586  ;;  %v1511_v46 = vpop.xlane.xlu2 %1510 }
 0x41a   : > { %v1589_v47 = vsub.f32 %v4639_v26, %v1587_v45  ;;  %v1513_v51 = vsub.f32 %v4637_v19, %v1511_v46 }
 0x41c   : > { %v4691_v48 = vpop.eup %3585  ;;  %v1592_v50 = vmul.f32 1.442695, %v1589_v47  ;;  %v1516_v4 = vmul.f32 1.442695, %v1513_v51 }
 0x41d   : > { %v1594_v52 = vsel %vm1350_vm1, %v4691_v48, 0.0  ;;  %v4696_v53 = vpop.eup %3587 }
 0x41e   : > { %3589 = vpow2.f32 %v1592_v50  ;;  %1595 = vadd.xlane.f32.xlu2 %v1594_v52  ;;  %v1518_v55 = vsel %vm1350_vm1, %v4696_v53, 0.0 }
 0x41f   : > { %3591 = vpow2.f32 %v1516_v4 }
 0x421   : > { %v1777_v7 = vpop.xlane.xlu1 %1776  ;;  %v1698_v13 = vpop.xlane.xlu2 %1697 }
 0x422   : > { %v1781_v3 = vsub.f32 %v4651_v43, %v1777_v7  ;;  %v1702_v16 = vsub.f32 %v4647_v38, %v1698_v13 }
 0x424   : > { %v4698_v33 = vpop.eup %3589  ;;  %v1783_v63 = vmul.f32 1.442695, %v1781_v3  ;;  %v1704_v21 = vmul.f32 1.442695, %v1702_v16 }
 0x425   : > { %v1597_v26 = vsel %vm1350_vm1, %v4698_v33, 0.0  ;;  %v4706_v58 = vpop.eup %3591 }
 0x426   : > { %1598 = vadd.xlane.f32.xlu1 %v1597_v26  ;;  %1519 = vadd.xlane.f32.xlu2 %v1518_v55  ;;  %v1521_v60 = vsel %vm1350_vm1, %v4706_v58, 0.0 }
 0x429   : > { %v1701_v19 = vpop.xlane.xlu1 %1700  ;;  %v4704_v56 = vpop.xlane.xlu0 %1779 }
 0x42a   : > { %v1703_v38 = vsub.f32 %v4660_v57, %v1701_v19  ;;  %v1853_v31 = vpop.xlane.xlu2 %1852  ;;  %v1782_v51 = vsub.f32 %v4664_v10, %v4704_v56 }
 0x42b   : > { %v1857_v39 = vsub.f32 %v4662_v59, %v1853_v31 }
 0x42c   : > { %v1785_v4 = vmul.f32 1.442695, %v1782_v51 }
 0x42e   : > { %1522 = vadd.xlane.f32.xlu1 %v1521_v60 }
 0x431   : > { %v1856_v61 = vpop.xlane.xlu1 %1855  ;;  %v1929_v62 = vpop.xlane.xlu0 %1928 }
 0x432   : > { %v1933_v34 = vsub.f32 %v4674_v15, %v1929_v62  ;;  %v1859_v15 = vmul.f32 1.442695, %v1857_v39  ;;  %v1858_v45 = vsub.f32 %v4672_v12, %v1856_v61 }
 0x434   : > { %v1935_v36 = vmul.f32 1.442695, %v1933_v34  ;;  %v1861_v46 = vmul.f32 1.442695, %v1858_v45 }
 0x439   : > { %v1432_v0 = vpop.xlane.xlu1 %1431  ;;  %v1435_v1 = vpop.xlane.xlu0 %1434 }
 0x43a   : > { %v1436_v2 = vsub.f32 %v1426_v28, %v1432_v0  ;;  %v1437_v49 = vsub.f32 %v1428_v29, %v1435_v1  ;;  %v1706_v28 = vmul.f32 1.442695, %v1703_v38  ;;  %v1932_v57 = vpop.xlane.xlu2 %1931 }
 0x43b   : > { %v1934_v41 = vsub.f32 %v4680_v32, %v1932_v57 }
 0x43c   : > { %v1438_v8 = vmul.f32 1.442695, %v1436_v2  ;;  %v1440_v9 = vmul.f32 1.442695, %v1437_v49 }
 0x43d   : > { %v1937_v11 = vmul.f32 1.442695, %v1934_v41 }
 0x43e   : > { %3593 = vpow2.f32 %v1438_v8  ;;  %1605 = vrot.lane.b32.xlu2 %v4568_v30, %s4101_s4 }
 0x43f   : > { %3595 = vpow2.f32 %v1440_v9 }
 0x440   : > { %3597 = vpow2.f32 %v1783_v63 }
 0x441   : > { %3599 = vpow2.f32 %v1704_v21 }
 0x442   : > { %3601 = vpow2.f32 %v1706_v28 }
 0x443   : > { %3603 = vpow2.f32 %v1935_v36 }
 0x444   : > { %v4713_v14 = vpop.eup %3593  ;;  %3605 = vpow2.f32 %v1859_v15 }
 0x445   : > { %v1442_v17 = vsel %vm1350_vm1, %v4713_v14, 0.0  ;;  %v4718_v20 = vpop.eup %3595  ;;  %3607 = vpow2.f32 %v1937_v11 }
 0x446   : > { %1443 = vadd.xlane.f32.xlu1 %v1442_v17  ;;  %1798 = vrot.lane.b32.xlu2 %v4621_v54, %s4099_s20  ;;  %v1445_v43 = vsel %vm1350_vm1, %v4718_v20, 0.0  ;;  %v4724_v22 = vpop.eup %3597  ;;  %3609 = vpow2.f32 %v1861_v46 }
 0x447   : > { %1446 = vadd.xlane.f32.xlu0 %v1445_v43  ;;  %v1787_v27 = vsel %vm1350_vm1, %v4724_v22, 0.0  ;;  %v4729_v29 = vpop.eup %3599  ;;  %3611 = vpow2.f32 %v1785_v4 }
 0x448   : > { %v1708_v35 = vsel %vm1350_vm1, %v4729_v29, 0.0  ;;  %v4734_v37 = vpop.eup %3601 }
 0x449   : > { %v1711_v42 = vsel %vm1350_vm1, %v4734_v37, 0.0  ;;  %v4742_v44 = vpop.eup %3603 }
 0x44a   : > { %v1939_v59 = vsel %vm1350_vm1, %v4742_v44, 0.0 }
 0x44c   : > { %v1454_v25 = vpop.permute.xlu0 %1453 }
 0x44d   : > { %1466 = vmatpush.bf16.msrb.mxu3 %v1454_v25 }
 0x44e   : > { %1788 = vadd.xlane.f32.xlu1 %v1787_v27 }
 0x456   : > { %1709 = vadd.xlane.f32.xlu1 %v1708_v35 }
 0x45b   : > { %1529 = vrot.lane.b32.xlu0 %v4568_v30, %s4100_s1  ;;  %v4747_v30 = vpop.eup %3605 }
 0x45c   : > { %v4749_v32 = vpop.eup %3607  ;;  %v1863_v47 = vsel %vm1350_vm1, %v4747_v30, 0.0 }
 0x45d   : > { %v1942_v50 = vsel %vm1350_vm1, %v4749_v32, 0.0  ;;  %v4755_v12 = vpop.eup %3609 }
 0x45e   : > { %1712 = vadd.xlane.f32.xlu1 %v1711_v42  ;;  %v1866_v52 = vsel %vm1350_vm1, %v4755_v12, 0.0  ;;  %v4761_v7 = vpop.eup %3611 }
 0x45f   : > { %v1790_v26 = vsel %vm1350_vm1, %v4761_v7, 0.0 }
 0x466   : > { %1940 = vadd.xlane.f32.xlu1 %v1939_v59 }
 0x46e   : > { %1864 = vadd.xlane.f32.xlu1 %v1863_v47 }
 0x46f   : > { %1943 = vadd.xlane.f32.xlu2 %v1942_v50 }
 0x476   : > { %1867 = vadd.xlane.f32.xlu1 %v1866_v52 }
 0x485   : > { %1791 = vadd.xlane.f32.xlu0 %v1790_v26 }
 0x48f   : > { %1950 = vrot.lane.b32.xlu1 %v4621_v54, %s4101_s4 }
 0x491   : > { %v1596_v55 = vpop.xlane.xlu2 %1595 }
 0x499   : > { %v1520_v19 = vpop.xlane.xlu2 %1519  ;;  %1874 = vrot.lane.b32.xlu0 %v4621_v54, %s4100_s1  ;;  %v1599_v56 = vpop.xlane.xlu1 %1598 }
 0x4a1   : > { %v1606_v10 = vpop.permute.xlu2 %1605  ;;  %v1523_v60 = vpop.xlane.xlu1 %1522 }
 0x4a2   : > { %1618 = vmatpush.bf16.msra.mxu3 %v1606_v10 }
 0x4a9   : > { %v1799_v9 = vpop.permute.xlu2 %1798 }
 0x4b9   : > { %v1444_v61 = vpop.xlane.xlu1 %1443 }
 0x4ba   : > { %3613 = vrcp.f32 %v1444_v61  ;;  %v1447_v62 = vpop.xlane.xlu0 %1446 }
 0x4bb   : > { %3615 = vrcp.f32 %v1447_v62 }
 0x4bc   : > { %3617 = vrcp.f32 %v1523_v60 }
 0x4bd   : > { %3619 = vrcp.f32 %v1520_v19 }
 0x4be   : > { %3621 = vrcp.f32 %v1599_v56 }
 0x4bf   : > { %3623 = vrcp.f32 %v1596_v55 }
 0x4c0   : > { %v3614_v0 = vpop.eup %3613 }
 0x4c1   : > { %v1450_v1 = vmul.f32 %v3614_v0, %v4713_v14  ;;  %v1789_v2 = vpop.xlane.xlu1 %1788  ;;  %v3616_v49 = vpop.eup %3615 }
 0x4c2   : > { %v1451_v3 = vmul.f32 %v3616_v49, %v4718_v20  ;;  %v3618_v63 = vpop.eup %3617 }
 0x4c3   : > { %v3620_v16 = vpop.eup %3619  ;;  %v1527_v17 = vmul.f32 %v3618_v63, %v4706_v58  ;;  %v3331_v63 = vld [vmem:[#allocation16 + $0x30] sm:$0xff] }
 0x4c4   : > { %v1452_v8 = vpack.c.bf16 %v1451_v3, %v1450_v1  ;;  %v3622_v43 = vpop.eup %3621  ;;  %v1526_v14 = vmul.f32 %v3620_v16, %v4696_v53  ;;  %v3330_v16 = vld [vmem:[#allocation16 + $0x28] sm:$0xff] }
 0x4c5   : > { %v3624_v38 = vpop.eup %3623  ;;  %v1603_v25 = vmul.f32 %v3622_v43, %v4698_v33 }
 0x4c6   : > { %3100 = vmatmul.msk.bf16.vlgmr.msrb.gmra.mxu3 %vm1350_vm1, %v1452_v8  ;;  %v1528_v20 = vpack.c.bf16 %v1527_v17, %v1526_v14  ;;  %v1602_v28 = vmul.f32 %v3624_v38, %v4691_v48  ;;  %v3332_v8 = vld [vmem:[#allocation16 + $0x38] sm:$0xff]  ;;  %v3329_v14 = vld [vmem:[#allocation16 + $0x20] sm:$0xff]  ;;  %v3327_v38 = vld [vmem:[#allocation16 + $0x10] sm:$0xff] }
 0x4c7   : > { %1811 = vmatpush.bf16.msrb.mxu3 %v1799_v9  ;;  %2070 = vmatpush.bf16.msrb.mxu0 %v3332_v8 }
 0x4c8   : > { %v1604_v31 = vpack.c.bf16 %v1603_v25, %v1602_v28  ;;  %v3325_v25 = vld [vmem:[#allocation16] sm:$0xff] }
 0x4c9   : > { %v1710_v13 = vpop.xlane.xlu1 %1709 }
 0x4cb   : > { %2071 = vmatpush.bf16.msrb.mxu0 %v3331_v63 }
 0x4cd   : > { %v1530_v21 = vpop.permute.xlu0 %1529 }
 0x4ce   : > { %1542 = vmatpush.bf16.msra.mxu1 %v1530_v21  ;;  %v3328_v21 = vld [vmem:[#allocation16 + $0x18] sm:$0xff] }
 0x4cf   : > { %2072 = vmatpush.bf16.msrb.mxu0 %v3330_v16 }
 0x4d1   : > { %v1713_v27 = vpop.xlane.xlu1 %1712  ;;  %3104 = vmatmul.msk.bf16.vlgmr.msra.gmra.mxu1 %vm1350_vm1, %v1528_v20  ;;  %v3326_v20 = vld [vmem:[#allocation16 + $0x8] sm:$0xff] }
 0x4d2   : > { %1735 = vmatpush.bf16.msrb.mxu1 %v4621_v54  ;;  %3625 = vrcp.f32 %v1713_v27 }
 0x4d3   : > { %3627 = vrcp.f32 %v1710_v13  ;;  %2073 = vmatpush.bf16.msrb.mxu0 %v3329_v14 }
 0x4d4   : > { %3629 = vrcp.f32 %v1789_v2 }
 0x4d6   : > { %3108 = vmatmul.msk.bf16.vlgmr.msra.gmra.mxu3 %vm1350_vm1, %v1604_v31 }
 0x4d7   : > { %2074 = vmatpush.bf16.msrb.mxu0 %v3328_v21 }
 0x4d8   : > { %v3626_v58 = vpop.eup %3625 }
 0x4d9   : > { %v3628_v53 = vpop.eup %3627  ;;  %v1717_v34 = vmul.f32 %v3626_v58, %v4734_v37  ;;  %v1941_v54 = vpop.xlane.xlu1 %1940 }
 0x4da   : > { %v1716_v35 = vmul.f32 %v3628_v53, %v4729_v29  ;;  %v3630_v48 = vpop.eup %3629 }
 0x4db   : > { %v1795_v42 = vmul.f32 %v3630_v48, %v4724_v22  ;;  %2075 = vmatpush.bf16.msrb.mxu0 %v3327_v38 }
 0x4dc   : > { %v1718_v36 = vpack.c.bf16 %v1717_v34, %v1716_v35 }
 0x4df   : > { %2076 = vmatpush.bf16.msrb.mxu0 %v3326_v20 }
 0x4e1   : > { %3112 = vmatmul.msk.bf16.vlgmr.msrb.gmra.mxu1 %vm1350_vm1, %v1718_v36  ;;  %v1865_v33 = vpop.xlane.xlu1 %1864 }
 0x4e2   : > { %v1944_v29 = vpop.xlane.xlu2 %1943 }
 0x4e3   : > { %2077 = vmatpush.bf16.msrb.mxu0 %v3325_v25 }
 0x4e9   : > { %v1868_v57 = vpop.xlane.xlu1 %1867 }
 0x4f8   : > { %v1792_v39 = vpop.xlane.xlu0 %1791 }
 0x4f9   : > { %3631 = vrcp.f32 %v1792_v39 }
 0x4fa   : > { %3633 = vrcp.f32 %v1868_v57 }
 0x4fb   : > { %3635 = vrcp.f32 %v1865_v33 }
 0x4fc   : > { %3637 = vrcp.f32 %v1944_v29 }
 0x4fd   : > { %3639 = vrcp.f32 %v1941_v54 }
 0x4ff   : > { %v3632_v41 = vpop.eup %3631 }
 0x500   : > { %v1796_v15 = vmul.f32 %v3632_v41, %v4761_v7  ;;  %v3634_v45 = vpop.eup %3633 }
 0x501   : > { %v1951_v11 = vpop.permute.xlu1 %1950  ;;  %v3636_v59 = vpop.eup %3635  ;;  %v1872_v46 = vmul.f32 %v3634_v45, %v4755_v12 }
 0x502   : > { %1963 = vmatpush.bf16.msra.mxu3 %v1951_v11  ;;  %v1797_v37 = vpack.c.bf16 %v1796_v15, %v1795_v42  ;;  %v3638_v47 = vpop.eup %3637  ;;  %v1871_v50 = vmul.f32 %v3636_v59, %v4747_v30 }
 0x503   : > { %v3640_v51 = vpop.eup %3639  ;;  %v1948_v4 = vmul.f32 %v3638_v47, %v4749_v32 }
 0x504   : > { %3116 = vmatmul.msk.bf16.vlgmr.msrb.gmra.mxu3 %vm1350_vm1, %v1797_v37  ;;  %v1873_v52 = vpack.c.bf16 %v1872_v46, %v1871_v50  ;;  %v1947_v7 = vmul.f32 %v3640_v51, %v4742_v44 }
 0x506   : > { %v1949_v26 = vpack.c.bf16 %v1948_v4, %v1947_v7 }
 0x50b   : > { %v1875_v22 = vpop.permute.xlu0 %1874 }
 0x50c   : > { %1887 = vmatpush.bf16.msra.mxu1 %v1875_v22 }
 0x50f   : > { %3120 = vmatmul.msk.bf16.vlgmr.msra.gmra.mxu1 %vm1350_vm1, %v1873_v52 }
 0x514   : > { %3124 = vmatmul.msk.bf16.vlgmr.msra.gmra.mxu3 %vm1350_vm1, %v1949_v26 }
 0x549   : > { %v1468_v55 = vpop.f32.mrf.mxu3 }
 0x54e   : > { %v1544_v19 = vpop.f32.mrf.mxu1 }
 0x551   : > { %v1470_v10 = vpop.f32.mrf.mxu3 }
 0x552   : > { %v3504_v12 = vpack.i.bf16 %v1470_v10, %v1468_v55  ;;  %v3537_v55 = vld [vmem:[%s5078_s14] ss:$0 sm:$0xff] }
 0x554   : > { %3505 = vrot.lane.b32.xlu0 %v3504_v12, %s4101_s4 }
 0x556   : > { %v1546_v30 = vpop.f32.mrf.mxu1 }
 0x557   : > { %v3509_v56 = vpack.i.bf16 %v1546_v30, %v1544_v19 }
 0x559   : > { %v1620_v60 = vpop.f32.mrf.mxu3  ;;  %3510 = vrot.lane.b32.xlu2 %v3509_v56, %s4100_s1 }
 0x55e   : > { %v1737_v62 = vpop.f32.mrf.mxu1 }
 0x561   : > { %v1622_v61 = vpop.f32.mrf.mxu3 }
 0x562   : > { %v3514_v32 = vpack.i.bf16 %v1622_v61, %v1620_v60 }
 0x564   : > { %3515 = vrot.lane.b32.xlu1 %v3514_v32, %s4099_s20 }
 0x566   : > { %v1739_v44 = vpop.f32.mrf.mxu1 }
 0x587   : > { %v1813_v0 = vpop.f32.mrf.mxu3 }
 0x58c   : > { %v1889_v1 = vpop.f32.mrf.mxu1 }
 0x58f   : > { %v1815_v2 = vpop.f32.mrf.mxu3 }
 0x590   : > { %v3524_v49 = vpack.i.bf16 %v1815_v2, %v1813_v0  ;;  %v4102_v2 = vmov 128.0  }
 0x591   : > { %3641 = vrcp.f32 %v4102_v2 }
 0x592   : > { %3525 = vrot.lane.b32.xlu0 %v3524_v49, %s4101_s4 }
 0x594   : > { %v1891_v3 = vpop.f32.mrf.mxu1 }
 0x595   : > { %v3519_v9 = vpack.i.bf16 %v1891_v3, %v1889_v1 }
 0x597   : > { %v1965_v13 = vpop.f32.mrf.mxu3  ;;  %3520 = vrot.lane.b32.xlu1 %v3519_v9, %s4100_s1  ;;  %v3642_v49 = vpop.eup %3641 }
 0x598   : > { %vm2108_vm4 = vweird.f32 %v3642_v49 }
 0x59f   : > { %v1967_v17 = vpop.f32.mrf.mxu3 }
 0x5a0   : > { %v3529_v43 = vpack.i.bf16 %v1967_v17, %v1965_v13 }
 0x5a2   : > { %3530 = vrot.lane.b32.xlu0 %v3529_v43, %s4099_s20  ;;  %s5083_s20 = sld [smem:[#allocation52_spill]] }
 0x5b3   : > { %v3511_v58 = vpop.permute.xlu2 %3510 }
 0x5b4   : > { %v3513_v35 = vunpack.i.h.bf16 %v3511_v58  ;;  %v3512_v36 = vunpack.i.l.bf16 %v3511_v58 }
 0x5c6   : > { %v3506_v27 = vpop.permute.xlu0 %3505 }
 0x5c7   : > { %v3508_v28 = vunpack.i.h.bf16 %v3506_v27  ;;  %v3507_v31 = vunpack.i.l.bf16 %v3506_v27 }
 0x5c9   : > { %v1650_v53 = vsel %vm1329_vm0, %v4649_v40, %v3508_v28  ;;  %v1649_v34 = vsel %vm1329_vm0, %v4635_v18, %v3507_v31 }
 0x5ca   : > { %v1652_v39 = vsel %vm1651_vm2, %v1649_v34, %v3512_v36  ;;  %v1653_v48 = vsel %vm1651_vm2, %v1650_v53, %v3513_v35 }
 0x5d6   : > { %v3516_v54 = vpop.permute.xlu1 %3515 }
 0x5d7   : > { %v3518_v33 = vunpack.i.h.bf16 %v3516_v54  ;;  %v3517_v57 = vunpack.i.l.bf16 %v3516_v54 }
 0x5d9   : > { %v1655_v41 = vsel %vm1654_vm3, %v1652_v39, %v3517_v57  ;;  %v1656_v42 = vsel %vm1654_vm3, %v1653_v48, %v3518_v33 }
 0x5da   : > { %v2000_v15 = vpack.c.bf16 %v1656_v42, %v1655_v41 }
 0x5dc   : > { %2078 = vmatmul.bf16.vlgmr.msrb.gmra.mxu0 %v2000_v15 }
 0x604   : > { %v3526_v40 = vpop.permute.xlu0 %3525 }
 0x605   : > { %v3528_v18 = vunpack.i.h.bf16 %v3526_v40  ;;  %v3527_v29 = vunpack.i.l.bf16 %v3526_v40 }
 0x607   : > { %v1995_v46 = vsel %vm1329_vm0, %v1739_v44, %v3528_v18  ;;  %v1994_v47 = vsel %vm1329_vm0, %v1737_v62, %v3527_v29  ;;  %v3538_v18 = vld [vmem:[%s5079_s3] ss:$0 sm:$0xff] }
 0x609   : > { %v3521_v11 = vpop.permute.xlu1 %3520 }
 0x60a   : > { %v3523_v37 = vunpack.i.h.bf16 %v3521_v11  ;;  %v3522_v45 = vunpack.i.l.bf16 %v3521_v11 }
 0x60c   : > { %v1996_v51 = vsel %vm1651_vm2, %v1994_v47, %v3522_v45  ;;  %v1997_v52 = vsel %vm1651_vm2, %v1995_v46, %v3523_v37 }
 0x614   : > { %v3531_v59 = vpop.permute.xlu0 %3530 }
 0x615   : > { %v3533_v50 = vunpack.i.h.bf16 %v3531_v59  ;;  %v3532_v22 = vunpack.i.l.bf16 %v3531_v59  ;;  %v3539_v59 = vld [vmem:[%s5080_s17] ss:$0 sm:$0xff]  ;;  %s2737_s17 = scalar_lea.hbm %s5087_s29, %s3366_s19 }
 0x617   : > { %v1998_v4 = vsel %vm1654_vm3, %v1996_v51, %v3532_v22  ;;  %v1999_v7 = vsel %vm1654_vm3, %v1997_v52, %v3533_v50  ;;  %v3667_v52 = vld [vmem:[%s4472_s10] sm:$0xff] }
 0x618   : > { %v2001_v26 = vpack.c.bf16 %v1999_v7, %v1998_v4 }
 0x61a   : > { %2083 = vmatmul.bf16.gmra.mxu0 %v2001_v26 }
 0x659   : > { %v2079_v19 = vpop.f32.mrf.mxu0 }
 0x65a   : > { %v2080_v10 = vadd.f32 %v3537_v55, %v2079_v19 }
 0x65c   : > { %v2089_v12 = vadd.f32 %v2080_v10, %v4517_v23  ;;  %v2104_v23 = vmul.f32 128.0, %v3642_v49  ;;  %v3668_v10 = vld [vmem:[%s4472_s10 + $0x8] sm:$0xff] }
 0x65e   : > { %2095 = vadd.xlane.f32.xlu1 %v2089_v12  ;;  %v2105_v3 = vsub.f32 1.0, %v2104_v23 }
 0x660   : > { %v2106_v8 = vmul.f32 %v3642_v49, %v2105_v3 }
 0x661   : > { %v2081_v30 = vpop.f32.mrf.mxu0 }
 0x662   : > { %v2082_v56 = vadd.f32 %v3537_v55, %v2081_v30  ;;  %v2107_v9 = vadd.f32 %v3642_v49, %v2106_v8 }
 0x664   : > { %v2090_v60 = vadd.f32 %v2082_v56, %v4519_v24  ;;  %v4818_v24 = vsel %vm2108_vm4, %v3642_v49, %v2107_v9 }
 0x666   : > { %2097 = vadd.xlane.f32.xlu0 %v2090_v60 }
 0x697   : > { %v2084_v61 = vpop.f32.mrf.mxu0 }
 0x698   : > { %v2085_v32 = vadd.f32 %v3537_v55, %v2084_v61 }
 0x69a   : > { %v2091_v62 = vadd.f32 %v2085_v32, %v4547_v5 }
 0x69c   : > { %2099 = vadd.xlane.f32.xlu2 %v2091_v62 }
 0x69f   : > { %v2086_v44 = vpop.f32.mrf.mxu0 }
 0x6a0   : > { %v2087_v0 = vadd.f32 %v3537_v55, %v2086_v44 }
 0x6a2   : > { %v2092_v1 = vadd.f32 %v2087_v0, %v4549_v6 }
 0x6a4   : > { %2101 = vadd.xlane.f32.xlu1 %v2092_v1 }
 0x6d1   : > { %v2096_v63 = vpop.xlane.xlu1 %2095 }
 0x6d2   : > { %v2110_v13 = vmul.f32 %v4818_v24, %v2096_v63 }
 0x6d4   : > { %v2114_v5 = vsub.f32 %v2089_v12, %v2110_v13 }
 0x6d6   : > { %v2118_v16 = vmul.f32 %v2114_v5, %v2114_v5 }
 0x6d8   : > { %2122 = vadd.xlane.f32.xlu0 %v2118_v16 }
 0x6d9   : > { %v2098_v17 = vpop.xlane.xlu0 %2097 }
 0x6da   : > { %v2111_v6 = vmul.f32 %v4818_v24, %v2098_v17 }
 0x6dc   : > { %v2115_v43 = vsub.f32 %v2090_v60, %v2111_v6 }
 0x6de   : > { %v2119_v14 = vmul.f32 %v2115_v43, %v2115_v43 }
 0x6e0   : > { %2124 = vadd.xlane.f32.xlu2 %v2119_v14  ;;  %v3669_v14 = vld [vmem:[%s4472_s10 + $0x10] sm:$0xff] }
 0x70f   : > { %v2100_v21 = vpop.xlane.xlu2 %2099 }
 0x710   : > { %v2112_v38 = vmul.f32 %v4818_v24, %v2100_v21 }
 0x712   : > { %v4823_v20 = vsub.f32 %v2091_v62, %v2112_v38 }
 0x714   : > { %v2120_v25 = vmul.f32 %v4823_v20, %v4823_v20 }
 0x716   : > { %2126 = vadd.xlane.f32.xlu1 %v2120_v25 }
 0x717   : > { %v2102_v27 = vpop.xlane.xlu1 %2101 }
 0x718   : > { %v2113_v28 = vmul.f32 %v4818_v24, %v2102_v27 }
 0x71a   : > { %v4828_v31 = vsub.f32 %v2092_v1, %v2113_v28 }
 0x71c   : > { %v2121_v58 = vmul.f32 %v4828_v31, %v4828_v31 }
 0x71e   : > { %2128 = vadd.xlane.f32.xlu0 %v2121_v58  ;;  %v3670_v58 = vld [vmem:[%s4472_s10 + $0x18] sm:$0xff] }
 0x74b   : > { %v2123_v53 = vpop.xlane.xlu0 %2122 }
 0x74c   : > { %v2130_v34 = vmul.f32 %v2123_v53, %v4818_v24 }
 0x74e   : > { %v2134_v35 = vadd.f32 1e-05, %v2130_v34 }
 0x750   : > { %3643 = vrsqrt.f32 %v2134_v35  ;;  %vm2144_vm6 = vweird.f32 %v2134_v35 }
 0x753   : > { %v2125_v36 = vpop.xlane.xlu2 %2124 }
 0x754   : > { %v2131_v54 = vmul.f32 %v2125_v36, %v4818_v24 }
 0x756   : > { %v3644_v33 = vpop.eup %3643  ;;  %v2135_v57 = vadd.f32 1e-05, %v2131_v54 }
 0x757   : > { %v2139_v39 = vmul.f32 %v3644_v33, %v2134_v35  ;;  %vm2145_vm5 = vweird.f32 %v3644_v33 }
 0x758   : > { %3645 = vrsqrt.f32 %v2135_v57  ;;  %vm2146_vm7 = vmor %vm2144_vm6, %vm2145_vm5  ;;  %vm2154_vm9 = vweird.f32 %v2135_v57 }
 0x759   : > { %v2140_v48 = vmul.f32 %v3644_v33, %v2139_v39 }
 0x75b   : > { %v2141_v41 = vmul.f32 0.5, %v2140_v48 }
 0x75d   : > { %v2142_v42 = vsub.f32 1.5, %v2141_v41 }
 0x75e   : > { %v3646_v15 = vpop.eup %3645 }
 0x75f   : > { %v2143_v40 = vmul.f32 %v3644_v33, %v2142_v42  ;;  %v2149_v11 = vmul.f32 %v3646_v15, %v2135_v57  ;;  %vm2155_vm8 = vweird.f32 %v3646_v15 }
 0x760   : > { %vm2156_vm10 = vmor %vm2154_vm9, %vm2155_vm8 }
 0x761   : > { %v2150_v29 = vmul.f32 %v3646_v15, %v2149_v11  ;;  %v2147_v37 = vsel %vm2146_vm7, %v3644_v33, %v2143_v40 }
 0x762   : > { %v2178_v45 = vmul.f32 %v2147_v37, %v2114_v5  ;;  %v3348_v37 = vld [vmem:[#allocation17 + $0x74] sm:$0xf0] }
 0x763   : > { %v2151_v46 = vmul.f32 0.5, %v2150_v29  ;;  %v3215_v29 = vld [vmem:[#allocation17 + $0x70] sm:$0xf] }
 0x764   : > { %v2185_v47 = vmul.f32 %v3538_v18, %v2178_v45  ;;  %v3347_v45 = vld [vmem:[#allocation17 + $0x74] sm:$0xf] }
 0x765   : > { %v2152_v50 = vsub.f32 1.5, %v2151_v46  ;;  %v3217_v46 = vld [vmem:[#allocation17 + $0x78] sm:$0xf0] }
 0x766   : > { %v2192_v22 = vadd.f32 %v3539_v59, %v2185_v47  ;;  %v3220_v47 = vor.u32 %v3347_v45, %v3217_v46 }
 0x767   : > { %v2153_v51 = vmul.f32 %v3646_v15, %v2152_v50  ;;  %v3207_v50 = vld [vmem:[#allocation17 + $0x60] sm:$0xf] }
 0x768   : > { %v2196_v4 = vadd.f32 %v3667_v52, %v2192_v22  ;;  %2419 = vmatpush.bf16.msra.mxu2 %v3220_v47  ;;  %v3346_v22 = vld [vmem:[#allocation17 + $0x64] sm:$0xf0] }
 0x769   : > { %v2157_v7 = vsel %vm2156_vm10, %v3646_v15, %v2153_v51  ;;  %v3345_v51 = vld [vmem:[#allocation17 + $0x64] sm:$0xf]  ;;  %v3208_v52 = vor.u32 %v3346_v22, %v3207_v50 }
 0x76a   : > { %2202 = vadd.xlane.f32.xlu2 %v2196_v4  ;;  %v2179_v26 = vmul.f32 %v2157_v7, %v2115_v43 }
 0x76c   : > { %v2186_v55 = vmul.f32 %v3538_v18, %v2179_v26  ;;  %v3199_v26 = vld [vmem:[#allocation17 + $0x50] sm:$0xf] }
 0x76e   : > { %v2193_v19 = vadd.f32 %v3539_v59, %v2186_v55  ;;  %v3344_v55 = vld [vmem:[#allocation17 + $0x54] sm:$0xf0] }
 0x770   : > { %v2197_v12 = vadd.f32 %v3668_v10, %v2193_v19  ;;  %v3343_v19 = vld [vmem:[#allocation17 + $0x54] sm:$0xf]  ;;  %v3200_v10 = vor.u32 %v3344_v55, %v3199_v26  ;;  %v3541_v55 = vld [vmem:[%s5082_s2] ss:$0 sm:$0xff] }
 0x772   : > { %2204 = vadd.xlane.f32.xlu1 %v2197_v12 }
 0x789   : > { %v2127_v30 = vpop.xlane.xlu1 %2126 }
 0x78a   : > { %v2132_v56 = vmul.f32 %v2127_v30, %v4818_v24 }
 0x78c   : > { %v2136_v60 = vadd.f32 1e-05, %v2132_v56  ;;  %v3191_v56 = vld [vmem:[#allocation17 + $0x40] sm:$0xf] }
 0x78e   : > { %3647 = vrsqrt.f32 %v2136_v60  ;;  %vm2164_vm12 = vweird.f32 %v2136_v60 }
 0x791   : > { %v2129_v61 = vpop.xlane.xlu0 %2128 }
 0x792   : > { %v2133_v32 = vmul.f32 %v2129_v61, %v4818_v24  ;;  %v3341_v61 = vld [vmem:[#allocation17 + $0x44] sm:$0xf] }
 0x794   : > { %v3648_v62 = vpop.eup %3647  ;;  %v2137_v44 = vadd.f32 1e-05, %v2133_v32 }
 0x795   : > { %v2159_v0 = vmul.f32 %v3648_v62, %v2136_v60  ;;  %vm2165_vm11 = vweird.f32 %v3648_v62  ;;  %v3342_v60 = vld [vmem:[#allocation17 + $0x44] sm:$0xf0] }
 0x796   : > { %3649 = vrsqrt.f32 %v2137_v44  ;;  %vm2166_vm13 = vmor %vm2164_vm12, %vm2165_vm11  ;;  %vm2174_vm15 = vweird.f32 %v2137_v44  ;;  %v3192_v32 = vor.u32 %v3342_v60, %v3191_v56 }
 0x797   : > { %v2160_v1 = vmul.f32 %v3648_v62, %v2159_v0  ;;  %v3183_v0 = vld [vmem:[#allocation17 + $0x30] sm:$0xf] }
 0x799   : > { %v2161_v2 = vmul.f32 0.5, %v2160_v1  ;;  %v3340_v1 = vld [vmem:[#allocation17 + $0x34] sm:$0xf0] }
 0x79b   : > { %v2162_v49 = vsub.f32 1.5, %v2161_v2  ;;  %v3339_v2 = vld [vmem:[#allocation17 + $0x34] sm:$0xf] }
 0x79c   : > { %v3650_v23 = vpop.eup %3649 }
 0x79d   : > { %v2163_v3 = vmul.f32 %v3648_v62, %v2162_v49  ;;  %v2169_v8 = vmul.f32 %v3650_v23, %v2137_v44  ;;  %vm2175_vm14 = vweird.f32 %v3650_v23  ;;  %v3184_v49 = vor.u32 %v3340_v1, %v3183_v0  ;;  %v3363_v0 = vld [vmem:[#allocation19 + $0x70] sm:$0xff] }
 0x79e   : > { %vm2176_vm0 = vmor %vm2174_vm15, %vm2175_vm14 }
 0x79f   : > { %v2170_v9 = vmul.f32 %v3650_v23, %v2169_v8  ;;  %v2167_v63 = vsel %vm2166_vm13, %v3648_v62, %v2163_v3  ;;  %v3193_v62 = vld [vmem:[#allocation17 + $0x48] sm:$0xf0]  ;;  %v3175_v8 = vld [vmem:[#allocation17 + $0x20] sm:$0xf] }
 0x7a0   : > { %v2180_v13 = vmul.f32 %v2167_v63, %v4823_v20  ;;  %v3196_v44 = vor.u32 %v3341_v61, %v3193_v62  ;;  %v3337_v63 = vld [vmem:[#allocation17 + $0x24] sm:$0xf]  ;;  %v3364_v61 = vld [vmem:[#allocation19 + $0x78] sm:$0xff] }
 0x7a1   : > { %v2171_v5 = vmul.f32 0.5, %v2170_v9  ;;  %v3338_v9 = vld [vmem:[#allocation17 + $0x24] sm:$0xf0]  ;;  %2601 = vmatpush.bf16.msra.mxu0 %v3364_v61 }
 0x7a2   : > { %v2187_v16 = vmul.f32 %v3538_v18, %v2180_v13  ;;  %v3176_v13 = vor.u32 %v3338_v9, %v3175_v8 }
 0x7a3   : > { %v2172_v17 = vsub.f32 1.5, %v2171_v5  ;;  %v3177_v5 = vld [vmem:[#allocation17 + $0x28] sm:$0xf0] }
 0x7a4   : > { %v2194_v6 = vadd.f32 %v3539_v59, %v2187_v16  ;;  %v3180_v16 = vor.u32 %v3337_v63, %v3177_v5  ;;  %v3353_v63 = vld [vmem:[#allocation19 + $0x20] sm:$0xff] }
 0x7a5   : > { %v2173_v43 = vmul.f32 %v3650_v23, %v2172_v17  ;;  %v3167_v17 = vld [vmem:[#allocation17 + $0x10] sm:$0xf]  ;;  %2602 = vmatpush.bf16.msra.mxu0 %v3363_v0 }
 0x7a6   : > { %v2198_v21 = vadd.f32 %v3669_v14, %v2194_v6  ;;  %v3336_v6 = vld [vmem:[#allocation17 + $0x14] sm:$0xf0] }
 0x7a7   : > { %v2177_v38 = vsel %vm2176_vm0, %v3650_v23, %v2173_v43  ;;  %v3185_v23 = vld [vmem:[#allocation17 + $0x38] sm:$0xf0]  ;;  %v3335_v43 = vld [vmem:[#allocation17 + $0x14] sm:$0xf]  ;;  %v3168_v14 = vor.u32 %v3336_v6, %v3167_v17 }
 0x7a8   : > { %2206 = vadd.xlane.f32.xlu0 %v2198_v21  ;;  %v2181_v25 = vmul.f32 %v2177_v38, %v4828_v31  ;;  %v3188_v3 = vor.u32 %v3339_v2, %v3185_v23  ;;  %v3159_v38 = vld [vmem:[#allocation17] sm:$0xf]  ;;  %v3354_v23 = vld [vmem:[#allocation19 + $0x28] sm:$0xff] }
 0x7aa   : > { %v2188_v27 = vmul.f32 %v3538_v18, %v2181_v25  ;;  %v3334_v25 = vld [vmem:[#allocation17 + $0x4] sm:$0xf0] }
 0x7ac   : > { %v2195_v28 = vadd.f32 %v3539_v59, %v2188_v27  ;;  %v3216_v59 = vor.u32 %v3348_v37, %v3215_v29 }
 0x7ae   : > { %v2199_v53 = vadd.f32 %v3670_v58, %v2195_v28  ;;  %2400 = vmatpush.bf16.msrb.mxu1 %v3216_v59  ;;  %v3333_v58 = vld [vmem:[#allocation17 + $0x4] sm:$0xf] }
 0x7b0   : > { %2208 = vadd.xlane.f32.xlu2 %v2199_v53 }
 0x7b2   : > { %2401 = vmatpush.bf16.msrb.mxu1 %v3208_v52 }
 0x7b6   : > { %2402 = vmatpush.bf16.msrb.mxu1 %v3200_v10 }
 0x7ba   : > { %2403 = vmatpush.bf16.msrb.mxu1 %v3192_v32 }
 0x7be   : > { %2404 = vmatpush.bf16.msrb.mxu1 %v3184_v49 }
 0x7c2   : > { %2405 = vmatpush.bf16.msrb.mxu1 %v3176_v13 }
 0x7c6   : > { %2406 = vmatpush.bf16.msrb.mxu1 %v3168_v14 }
 0x7dd   : > { %v2203_v20 = vpop.xlane.xlu2 %2202 }
 0x7de   : > { %v2210_v34 = vmul.f32 %v2203_v20, %v4818_v24 }
 0x7e0   : > { %v4849_v35 = vsub.f32 %v2196_v4, %v2210_v34  ;;  %v3209_v4 = vld [vmem:[#allocation17 + $0x68] sm:$0xf0]  ;;  %v3160_v34 = vor.u32 %v3334_v25, %v3159_v38 }
 0x7e1   : > { %v3212_v7 = vor.u32 %v3345_v51, %v3209_v4  ;;  %v3540_v51 = vld [vmem:[%s5081_s7] ss:$0 sm:$0xff]  ;;  %s2740_s7 = sshll.u32 %s2737_s17, 4  ;;  %s2741_s7 = int_to_ptr.hbm [resolvable:$true] %s2740_s7 }
 0x7e2   : > { %v2218_v36 = vmul.f32 %v4849_v35, %v4849_v35  ;;  %2407 = vmatpush.bf16.msrb.mxu1 %v3160_v34  ;;  %s4015_s0 = sshra.s32 %s2741_s7, 4  ;;  %s4016_s0 = int_to_ptr.hbm [resolvable:$true] %s4015_s0 }
 0x7e3   : > { %2420 = vmatpush.bf16.msra.mxu2 %v3212_v7  ;;  %s4017_s13 = scalar_lea.hbm %s4016_s0, 32  ;;  %p4022_p10 = scmp.lt.s32.totalorder %s4016_s0, %s5087_s29 }
 0x7e4   : > { %2222 = vadd.xlane.f32.xlu1 %v2218_v36  ;;  %p4018_p4 = scmp.ne.s32.totalorder %s4016_s0, %s4017_s13  ;;  %p4023_p6 = scmp.lt.s32.totalorder %s4021_s9, %s4017_s13 }
 0x7e5   : > { %v2205_v54 = vpop.xlane.xlu1 %2204 }
 0x7e6   : > { %v2211_v33 = vmul.f32 %v2205_v54, %v4818_v24  ;;  %p4019_p1 = pnand %p4018_p4, %p4310_p0  ;;  %p4024_p11 = por %p4023_p6, %p4022_p10 }
 0x7e8   : > { %v4854_v57 = vsub.f32 %v2197_v12, %v2211_v33  ;;  %v3201_v12 = vld [vmem:[#allocation17 + $0x58] sm:$0xf0]  ;;  %p4020_p7 = pneg %p4019_p1 }
 0x7e9   : > { %v3204_v30 = vor.u32 %v3343_v19, %v3201_v12 }
 0x7ea   : > { %v2219_v31 = vmul.f32 %v4854_v57, %v4854_v57  ;;  %p4025_p3 = pnand %p4024_p11, %p4020_p7 }
 0x7eb   : > { %2421 = vmatpush.bf16.msra.mxu2 %v3204_v30 }
 0x7ec   : > { %2224 = vadd.xlane.f32.xlu0 %v2219_v31 }
 0x7ef   : > { %2422 = vmatpush.bf16.msra.mxu2 %v3196_v44  ;;  %v3355_v44 = vld [vmem:[#allocation19 + $0x30] sm:$0xff] }
 0x7f3   : > { %2423 = vmatpush.bf16.msra.mxu2 %v3188_v3  ;;  %v3362_v3 = vld [vmem:[#allocation19 + $0x68] sm:$0xff] }
 0x7f4   : > { %2603 = vmatpush.bf16.msra.mxu0 %v3362_v3  ;;  %v3542_v3 = vld [vmem:[%s5084_s22] ss:$0 sm:$0xff] }
 0x7f7   : > { %2424 = vmatpush.bf16.msra.mxu2 %v3180_v16 }
 0x81b   : > { %v2207_v39 = vpop.xlane.xlu0 %2206 }
 0x81c   : > { %v2212_v48 = vmul.f32 %v2207_v39, %v4818_v24 }
 0x81e   : > { %v4859_v41 = vsub.f32 %v2198_v21, %v2212_v48  ;;  %v3169_v21 = vld [vmem:[#allocation17 + $0x18] sm:$0xf0] }
 0x81f   : > { %v3172_v28 = vor.u32 %v3335_v43, %v3169_v21 }
 0x820   : > { %v2220_v42 = vmul.f32 %v4859_v41, %v4859_v41 }
 0x821   : > { %2425 = vmatpush.bf16.msra.mxu2 %v3172_v28 }
 0x822   : > { %2226 = vadd.xlane.f32.xlu2 %v2220_v42 }
 0x823   : > { %v2209_v15 = vpop.xlane.xlu2 %2208 }
 0x824   : > { %v2213_v40 = vmul.f32 %v2209_v15, %v4818_v24 }
 0x826   : > { %v4864_v11 = vsub.f32 %v2199_v53, %v2213_v40  ;;  %v3161_v53 = vld [vmem:[#allocation17 + $0x8] sm:$0xf0] }
 0x827   : > { %v3164_v36 = vor.u32 %v3333_v58, %v3161_v53 }
 0x828   : > { %v2221_v18 = vmul.f32 %v4864_v11, %v4864_v11 }
 0x829   : > { %2426 = vmatpush.bf16.msra.mxu2 %v3164_v36 }
 0x82a   : > { %2228 = vadd.xlane.f32.xlu1 %v2221_v18 }
 0x857   : > { %v2223_v27 = vpop.xlane.xlu1 %2222 }
 0x858   : > { %v2230_v20 = vmul.f32 %v2223_v27, %v4818_v24 }
 0x85a   : > { %v2234_v54 = vadd.f32 1e-05, %v2230_v20 }
 0x85c   : > { %3651 = vrsqrt.f32 %v2234_v54  ;;  %vm2244_vm2 = vweird.f32 %v2234_v54 }
 0x85f   : > { %v2225_v33 = vpop.xlane.xlu0 %2224 }
 0x860   : > { %v2231_v31 = vmul.f32 %v2225_v33, %v4818_v24  ;;  %v3351_v33 = vld [vmem:[#allocation19 + $0x10] sm:$0xff] }
 0x862   : > { %v3652_v39 = vpop.eup %3651  ;;  %v2235_v48 = vadd.f32 1e-05, %v2231_v31  ;;  %v3360_v31 = vld [vmem:[#allocation19 + $0x58] sm:$0xff] }
 0x863   : > { %v2239_v42 = vmul.f32 %v3652_v39, %v2234_v54  ;;  %vm2245_vm1 = vweird.f32 %v3652_v39  ;;  %v3352_v54 = vld [vmem:[#allocation19 + $0x18] sm:$0xff] }
 0x864   : > { %3653 = vrsqrt.f32 %v2235_v48  ;;  %vm2246_vm3 = vmor %vm2244_vm2, %vm2245_vm1  ;;  %vm2254_vm5 = vweird.f32 %v2235_v48 }
 0x865   : > { %v2240_v15 = vmul.f32 %v3652_v39, %v2239_v42  ;;  %v3358_v42 = vld [vmem:[#allocation19 + $0x48] sm:$0xff] }
 0x867   : > { %v2241_v40 = vmul.f32 0.5, %v2240_v15  ;;  %v3357_v15 = vld [vmem:[#allocation19 + $0x40] sm:$0xff] }
 0x869   : > { %v2242_v18 = vsub.f32 1.5, %v2241_v40  ;;  %v2314_v40 = vld [vmem:[%s5083_s20] sm:$0x3] }
 0x86a   : > { %v3654_v29 = vpop.eup %3653 }
 0x86b   : > { %v2243_v37 = vmul.f32 %v3652_v39, %v2242_v18  ;;  %v2249_v45 = vmul.f32 %v3654_v29, %v2235_v48  ;;  %vm2255_vm4 = vweird.f32 %v3654_v29  ;;  %v3349_v48 = vld [vmem:[#allocation19] sm:$0xff] }
 0x86c   : > { %vm2256_vm6 = vmor %vm2254_vm5, %vm2255_vm4 }
 0x86d   : > { %v2250_v59 = vmul.f32 %v3654_v29, %v2249_v45  ;;  %v2247_v46 = vsel %vm2246_vm3, %v3652_v39, %v2243_v37  ;;  %v3359_v39 = vld [vmem:[#allocation19 + $0x50] sm:$0xff] }
 0x86e   : > { %v2278_v22 = vmul.f32 %v2247_v46, %v4849_v35  ;;  %v2317_v46 = vperm.slane %v2314_v40, 1 }
 0x86f   : > { %v2251_v47 = vmul.f32 0.5, %v2250_v59 }
 0x870   : > { %v2285_v26 = vmul.f32 %v3540_v51, %v2278_v22 }
 0x871   : > { %v2252_v50 = vsub.f32 1.5, %v2251_v47 }
 0x872   : > { %v4878_v10 = vadd.f32 %v3541_v55, %v2285_v26 }
 0x873   : > { %v2253_v52 = vmul.f32 %v3654_v29, %v2252_v50 }
 0x875   : > { %v2257_v4 = vsel %vm2256_vm6, %v3654_v29, %v2253_v52  ;;  %v2316_v29 = vperm.slane %v2314_v40, 0 }
 0x876   : > { %v2279_v7 = vmul.f32 %v2257_v4, %v4854_v57  ;;  %v3356_v57 = vld [vmem:[#allocation19 + $0x38] sm:$0xff] }
 0x877   : > { %2582 = vmatpush.bf16.msrb.mxu3 %v3356_v57 }
 0x878   : > { %v2286_v19 = vmul.f32 %v3540_v51, %v2279_v7 }
 0x87a   : > { %v4880_v12 = vadd.f32 %v3541_v55, %v2286_v19 }
 0x87b   : > { %2583 = vmatpush.bf16.msrb.mxu3 %v3355_v44 }
 0x87c   : > { %v2296_v35 = vpack.c.bf16 %v4880_v12, %v4878_v10 }
 0x87e   : > { %2408 = vmatmul.bf16.vlgmr.msrb.gmra.mxu1 %v2296_v35  ;;  %2427 = vmatmul.bf16.vlgmr.msra.gmra.mxu2 %v2296_v35 }
 0x87f   : > { %2584 = vmatpush.bf16.msrb.mxu3 %v3354_v23 }
 0x883   : > { %2585 = vmatpush.bf16.msrb.mxu3 %v3353_v63 }
 0x887   : > { %2586 = vmatpush.bf16.msrb.mxu3 %v3352_v54 }
 0x88b   : > { %2587 = vmatpush.bf16.msrb.mxu3 %v3351_v33 }
 0x895   : > { %v2227_v30 = vpop.xlane.xlu2 %2226 }
 0x896   : > { %v2232_v56 = vmul.f32 %v2227_v30, %v4818_v24 }
 0x898   : > { %v2236_v60 = vadd.f32 1e-05, %v2232_v56 }
 0x89a   : > { %3655 = vrsqrt.f32 %v2236_v60  ;;  %vm2264_vm8 = vweird.f32 %v2236_v60 }
 0x89d   : > { %v2229_v32 = vpop.xlane.xlu1 %2228 }
 0x89e   : > { %v2233_v62 = vmul.f32 %v2229_v32, %v4818_v24 }
 0x8a0   : > { %v3656_v1 = vpop.eup %3655  ;;  %v2237_v2 = vadd.f32 1e-05, %v2233_v62 }
 0x8a1   : > { %v2259_v49 = vmul.f32 %v3656_v1, %v2236_v60  ;;  %vm2265_vm7 = vweird.f32 %v3656_v1 }
 0x8a2   : > { %3657 = vrsqrt.f32 %v2237_v2  ;;  %vm2266_vm9 = vmor %vm2264_vm8, %vm2265_vm7  ;;  %vm2274_vm11 = vweird.f32 %v2237_v2 }
 0x8a3   : > { %v2260_v8 = vmul.f32 %v3656_v1, %v2259_v49 }
 0x8a5   : > { %v2261_v9 = vmul.f32 0.5, %v2260_v8 }
 0x8a7   : > { %v2262_v13 = vsub.f32 1.5, %v2261_v9 }
 0x8a8   : > { %v3658_v5 = vpop.eup %3657 }
 0x8a9   : > { %v2263_v16 = vmul.f32 %v3656_v1, %v2262_v13  ;;  %v2269_v17 = vmul.f32 %v3658_v5, %v2237_v2  ;;  %vm2275_vm10 = vweird.f32 %v3658_v5 }
 0x8aa   : > { %vm2276_vm12 = vmor %vm2274_vm11, %vm2275_vm10 }
 0x8ab   : > { %v2270_v6 = vmul.f32 %v3658_v5, %v2269_v17  ;;  %v2267_v14 = vsel %vm2266_vm9, %v3656_v1, %v2263_v16 }
 0x8ac   : > { %v2280_v38 = vmul.f32 %v2267_v14, %v4859_v41  ;;  %v3361_v41 = vld [vmem:[#allocation19 + $0x60] sm:$0xff] }
 0x8ad   : > { %v2271_v43 = vmul.f32 0.5, %v2270_v6  ;;  %2604 = vmatpush.bf16.msra.mxu0 %v3361_v41 }
 0x8ae   : > { %v2287_v58 = vmul.f32 %v3540_v51, %v2280_v38 }
 0x8af   : > { %v2272_v21 = vsub.f32 1.5, %v2271_v43 }
 0x8b0   : > { %v4888_v20 = vadd.f32 %v3541_v55, %v2287_v58 }
 0x8b1   : > { %v2273_v25 = vmul.f32 %v3658_v5, %v2272_v21  ;;  %2605 = vmatpush.bf16.msra.mxu0 %v3360_v31 }
 0x8b3   : > { %v2277_v27 = vsel %vm2276_vm12, %v3658_v5, %v2273_v25 }
 0x8b4   : > { %v2281_v28 = vmul.f32 %v2277_v27, %v4864_v11  ;;  %v3350_v11 = vld [vmem:[#allocation19 + $0x8] sm:$0xff] }
 0x8b5   : > { %2588 = vmatpush.bf16.msrb.mxu3 %v3350_v11  ;;  %2606 = vmatpush.bf16.msra.mxu0 %v3359_v39 }
 0x8b6   : > { %v2288_v53 = vmul.f32 %v3540_v51, %v2281_v28 }
 0x8b8   : > { %v4890_v34 = vadd.f32 %v3541_v55, %v2288_v53 }
 0x8b9   : > { %2589 = vmatpush.bf16.msrb.mxu3 %v3349_v48  ;;  %2607 = vmatpush.bf16.msra.mxu0 %v3358_v42 }
 0x8ba   : > { %v2297_v36 = vpack.c.bf16 %v4890_v34, %v4888_v20 }
 0x8bc   : > { %2413 = vmatmul.bf16.gmra.mxu1 %v2297_v36  ;;  %2432 = vmatmul.bf16.gmra.mxu2 %v2297_v36 }
 0x8bd   : > { %2608 = vmatpush.bf16.msra.mxu0 %v3357_v15 }
 0x8fb   : > { %v2409_v18 = vpop.f32.mrf.mxu1 }
 0x8fc   : > { %v2410_v45 = vadd.f32 %v2409_v18, %v2316_v29 }
 0x8fe   : > { %v2438_v50 = vmax.f32 %v2410_v45, 0.0 }
 0x901   : > { %v2428_v37 = vpop.f32.mrf.mxu2 }
 0x902   : > { %v2429_v51 = vadd.f32 %v2428_v37, %v2317_v46 }
 0x903   : > { %v2411_v59 = vpop.f32.mrf.mxu1 }
 0x904   : > { %v2412_v47 = vadd.f32 %v2411_v59, %v2316_v29  ;;  %v2439_v26 = vmax.f32 %v2429_v51, 0.0 }
 0x906   : > { %v2440_v22 = vmax.f32 %v2412_v47, 0.0 }
 0x908   : > { %v2446_v52 = vpack.c.bf16 %v2440_v22, %v2438_v50 }
 0x909   : > { %v2430_v4 = vpop.f32.mrf.mxu2 }
 0x90a   : > { %v2431_v7 = vadd.f32 %v2430_v4, %v2317_v46  ;;  %2590 = vmatmul.bf16.vlgmr.msrb.gmra.mxu3 %v2446_v52 }
 0x90c   : > { %v2441_v55 = vmax.f32 %v2431_v7, 0.0 }
 0x90e   : > { %v2447_v19 = vpack.c.bf16 %v2441_v55, %v2439_v26 }
 0x910   : > { %2609 = vmatmul.bf16.vlgmr.msra.gmra.mxu0 %v2447_v19 }
 0x939   : > { %v2414_v35 = vpop.f32.mrf.mxu1 }
 0x93a   : > { %v2415_v56 = vadd.f32 %v2414_v35, %v2316_v29 }
 0x93c   : > { %v2442_v61 = vmax.f32 %v2415_v56, 0.0  ;;  %v3543_v56 = vld [vmem:[%s5085_s12] ss:$0 sm:$0xff] }
 0x93f   : > { %v2433_v30 = vpop.f32.mrf.mxu2 }
 0x940   : > { %v2434_v62 = vadd.f32 %v2433_v30, %v2317_v46 }
 0x941   : > { %v2416_v60 = vpop.f32.mrf.mxu1 }
 0x942   : > { %v2417_v57 = vadd.f32 %v2416_v60, %v2316_v29  ;;  %v2443_v2 = vmax.f32 %v2434_v62, 0.0 }
 0x944   : > { %v2444_v32 = vmax.f32 %v2417_v57, 0.0 }
 0x946   : > { %v2448_v44 = vpack.c.bf16 %v2444_v32, %v2442_v61  ;;  %v3544_v61 = vld [vmem:[%s5086_s15] ss:$0 sm:$0xff] }
 0x947   : > { %v2435_v0 = vpop.f32.mrf.mxu2 }
 0x948   : > { %v2436_v1 = vadd.f32 %v2435_v0, %v2317_v46  ;;  %2595 = vmatmul.bf16.gmra.mxu3 %v2448_v44 }
 0x94a   : > { %v2445_v49 = vmax.f32 %v2436_v1, 0.0 }
 0x94c   : > { %v2449_v23 = vpack.c.bf16 %v2445_v49, %v2443_v2 }
 0x94e   : > { %2614 = vmatmul.bf16.gmra.mxu0 %v2449_v23 }
 0x98d   : > { %v2591_v8 = vpop.f32.mrf.mxu3  ;;  %v2610_v9 = vpop.f32.mrf.mxu0 }
 0x98e   : > { %v2592_v63 = vadd.f32 %v3542_v3, %v2591_v8 }
 0x990   : > { %v2611_v13 = vadd.f32 %v2610_v9, %v2592_v63 }
 0x992   : > { %v2620_v5 = vadd.f32 %v2611_v13, %v4878_v10 }
 0x994   : > { %2626 = vadd.xlane.f32.xlu0 %v2620_v5 }
 0x995   : > { %v2593_v16 = vpop.f32.mrf.mxu3  ;;  %v2612_v6 = vpop.f32.mrf.mxu0 }
 0x996   : > { %v2594_v17 = vadd.f32 %v3542_v3, %v2593_v16 }
 0x998   : > { %v2613_v43 = vadd.f32 %v2612_v6, %v2594_v17 }
 0x99a   : > { %v2621_v14 = vadd.f32 %v2613_v43, %v4880_v12 }
 0x99c   : > { %2628 = vadd.xlane.f32.xlu2 %v2621_v14 }
 0x9cb   : > { %v2596_v21 = vpop.f32.mrf.mxu3  ;;  %v2615_v38 = vpop.f32.mrf.mxu0 }
 0x9cc   : > { %v2597_v25 = vadd.f32 %v3542_v3, %v2596_v21 }
 0x9ce   : > { %v2616_v27 = vadd.f32 %v2615_v38, %v2597_v25 }
 0x9d0   : > { %v2622_v28 = vadd.f32 %v2616_v27, %v4888_v20 }
 0x9d2   : > { %2630 = vadd.xlane.f32.xlu1 %v2622_v28 }
 0x9d3   : > { %v2598_v58 = vpop.f32.mrf.mxu3  ;;  %v2617_v36 = vpop.f32.mrf.mxu0 }
 0x9d4   : > { %v2599_v53 = vadd.f32 %v3542_v3, %v2598_v58 }
 0x9d6   : > { %v2618_v54 = vadd.f32 %v2617_v36, %v2599_v53 }
 0x9d8   : > { %v2623_v10 = vadd.f32 %v2618_v54, %v4890_v34 }
 0x9da   : > { %2632 = vadd.xlane.f32.xlu0 %v2623_v10 }
 0xa07   : > { %v2627_v41 = vpop.xlane.xlu0 %2626 }
 0xa08   : > { %v2634_v33 = vmul.f32 %v2627_v41, %v4818_v24 }
 0xa0a   : > { %v2638_v31 = vsub.f32 %v2620_v5, %v2634_v33 }
 0xa0c   : > { %v2642_v12 = vmul.f32 %v2638_v31, %v2638_v31 }
 0xa0e   : > { %2646 = vadd.xlane.f32.xlu2 %v2642_v12 }
 0xa0f   : > { %v2629_v11 = vpop.xlane.xlu2 %2628 }
 0xa10   : > { %v2635_v39 = vmul.f32 %v2629_v11, %v4818_v24 }
 0xa12   : > { %v2639_v48 = vsub.f32 %v2621_v14, %v2635_v39 }
 0xa14   : > { %v2643_v42 = vmul.f32 %v2639_v48, %v2639_v48 }
 0xa16   : > { %2648 = vadd.xlane.f32.xlu1 %v2643_v42 }
 0xa45   : > { %v2631_v20 = vpop.xlane.xlu1 %2630 }
 0xa46   : > { %v2636_v15 = vmul.f32 %v2631_v20, %v4818_v24 }
 0xa48   : > { %v4907_v40 = vsub.f32 %v2622_v28, %v2636_v15 }
 0xa4a   : > { %v2644_v34 = vmul.f32 %v4907_v40, %v4907_v40 }
 0xa4c   : > { %2650 = vadd.xlane.f32.xlu0 %v2644_v34 }
 0xa4d   : > { %v2633_v18 = vpop.xlane.xlu0 %2632 }
 0xa4e   : > { %v2637_v29 = vmul.f32 %v2633_v18, %v4818_v24 }
 0xa50   : > { %v4912_v37 = vsub.f32 %v2623_v10, %v2637_v29 }
 0xa52   : > { %v2645_v45 = vmul.f32 %v4912_v37, %v4912_v37 }
 0xa54   : > { %2652 = vadd.xlane.f32.xlu2 %v2645_v45 }
 0xa81   : > { %v2647_v59 = vpop.xlane.xlu2 %2646 }
 0xa82   : > { %v2654_v46 = vmul.f32 %v2647_v59, %v4818_v24 }
 0xa84   : > { %v2658_v47 = vadd.f32 1e-05, %v2654_v46 }
 0xa86   : > { %3659 = vrsqrt.f32 %v2658_v47  ;;  %vm2668_vm14 = vweird.f32 %v2658_v47 }
 0xa89   : > { %v2649_v50 = vpop.xlane.xlu1 %2648 }
 0xa8a   : > { %v2655_v22 = vmul.f32 %v2649_v50, %v4818_v24 }
 0xa8c   : > { %v3660_v51 = vpop.eup %3659  ;;  %v2659_v52 = vadd.f32 1e-05, %v2655_v22 }
 0xa8d   : > { %v2663_v4 = vmul.f32 %v3660_v51, %v2658_v47  ;;  %vm2669_vm13 = vweird.f32 %v3660_v51 }
 0xa8e   : > { %3661 = vrsqrt.f32 %v2659_v52  ;;  %vm2670_vm15 = vmor %vm2668_vm14, %vm2669_vm13  ;;  %vm2678_vm1 = vweird.f32 %v2659_v52 }
 0xa8f   : > { %v2664_v7 = vmul.f32 %v3660_v51, %v2663_v4 }
 0xa91   : > { %v2665_v26 = vmul.f32 0.5, %v2664_v7 }
 0xa93   : > { %v2666_v55 = vsub.f32 1.5, %v2665_v26 }
 0xa94   : > { %v3662_v19 = vpop.eup %3661 }
 0xa95   : > { %v2667_v35 = vmul.f32 %v3660_v51, %v2666_v55  ;;  %v2673_v30 = vmul.f32 %v3662_v19, %v2659_v52  ;;  %vm2679_vm0 = vweird.f32 %v3662_v19 }
 0xa96   : > { %vm2680_vm2 = vmor %vm2678_vm1, %vm2679_vm0 }
 0xa97   : > { %v2671_v60 = vsel %vm2670_vm15, %v3660_v51, %v2667_v35  ;;  %v2674_v57 = vmul.f32 %v3662_v19, %v2673_v30 }
 0xa98   : > { %v2702_v32 = vmul.f32 %v2671_v60, %v2638_v31 }
 0xa99   : > { %v2675_v62 = vmul.f32 0.5, %v2674_v57 }
 0xa9a   : > { %v2709_v44 = vmul.f32 %v3543_v56, %v2702_v32 }
 0xa9b   : > { %v2676_v0 = vsub.f32 1.5, %v2675_v62 }
 0xa9c   : > { %v2716_v1 = vadd.f32 %v3544_v61, %v2709_v44 }
 0xa9d   : > { %v2677_v2 = vmul.f32 %v3662_v19, %v2676_v0 }
 0xa9e   : > { %2720 = vst [vmem:[%s4925_s27] sm:$0xff] %v2716_v1 }
 0xa9f   : > { %v2681_v49 = vsel %vm2680_vm2, %v3662_v19, %v2677_v2 }
 0xaa0   : > { %v2703_v23 = vmul.f32 %v2681_v49, %v2639_v48 }
 0xaa2   : > { %v2710_v3 = vmul.f32 %v3543_v56, %v2703_v23 }
 0xaa4   : > { %v2717_v8 = vadd.f32 %v3544_v61, %v2710_v3 }
 0xaa6   : > { %2721 = vst [vmem:[%s4925_s27 + $0x8] sm:$0xff] %v2717_v8 }
 0xabf   : > { %v2651_v9 = vpop.xlane.xlu0 %2650 }
 0xac0   : > { %v2656_v63 = vmul.f32 %v2651_v9, %v4818_v24 }
 0xac2   : > { %v2660_v13 = vadd.f32 1e-05, %v2656_v63 }
 0xac4   : > { %3663 = vrsqrt.f32 %v2660_v13  ;;  %vm2688_vm4 = vweird.f32 %v2660_v13 }
 0xac7   : > { %v2653_v5 = vpop.xlane.xlu2 %2652 }
 0xac8   : > { %v2657_v16 = vmul.f32 %v2653_v5, %v4818_v24 }
 0xaca   : > { %v3664_v17 = vpop.eup %3663  ;;  %v2661_v6 = vadd.f32 1e-05, %v2657_v16 }
 0xacb   : > { %v2683_v43 = vmul.f32 %v3664_v17, %v2660_v13  ;;  %vm2689_vm3 = vweird.f32 %v3664_v17 }
 0xacc   : > { %3665 = vrsqrt.f32 %v2661_v6  ;;  %vm2690_vm5 = vmor %vm2688_vm4, %vm2689_vm3  ;;  %vm2698_vm7 = vweird.f32 %v2661_v6 }
 0xacd   : > { %v2684_v14 = vmul.f32 %v3664_v17, %v2683_v43 }
 0xacf   : > { %v2685_v21 = vmul.f32 0.5, %v2684_v14 }
 0xad1   : > { %v2686_v38 = vsub.f32 1.5, %v2685_v21 }
 0xad2   : > { %v3666_v25 = vpop.eup %3665 }
 0xad3   : > { %v2687_v27 = vmul.f32 %v3664_v17, %v2686_v38  ;;  %v2693_v28 = vmul.f32 %v3666_v25, %v2661_v6  ;;  %vm2699_vm6 = vweird.f32 %v3666_v25 }
 0xad4   : > { %vm2700_vm8 = vmor %vm2698_vm7, %vm2699_vm6 }
 0xad5   : > { %v2691_v58 = vsel %vm2690_vm5, %v3664_v17, %v2687_v27  ;;  %v2694_v53 = vmul.f32 %v3666_v25, %v2693_v28 }
 0xad6   : > { %v2704_v24 = vmul.f32 %v2691_v58, %v4907_v40 }
 0xad7   : > { %v2695_v36 = vmul.f32 0.5, %v2694_v53 }
 0xad8   : > { %v2711_v54 = vmul.f32 %v3543_v56, %v2704_v24 }
 0xad9   : > { %v2696_v10 = vsub.f32 1.5, %v2695_v36 }
 0xada   : > { %v2718_v41 = vadd.f32 %v3544_v61, %v2711_v54 }
 0xadb   : > { %v2697_v33 = vmul.f32 %v3666_v25, %v2696_v10 }
 0xadc   : > { %2722 = vst [vmem:[%s4925_s27 + $0x10] sm:$0xff] %v2718_v41 }
 0xadd   : > { %v2701_v31 = vsel %vm2700_vm8, %v3666_v25, %v2697_v33 }
 0xade   : > { %v2705_v12 = vmul.f32 %v2701_v31, %v4912_v37 }
 0xae0   : > { %v2712_v11 = vmul.f32 %v3543_v56, %v2705_v12 }
 0xae2   : > { %v2719_v39 = vadd.f32 %v3544_v61, %v2712_v11 }
 0xae4   : > { %2723 = vst [vmem:[%s4925_s27 + $0x18] sm:$0xff] %v2719_v39 }
 0xae5   : > { %4028 = shalt.err (!%p4025_p3)
}
 0xae6   : > { %s4103_s18 = smov 128   ;;  %s4104_s21 = smov 8  }
 0xae7   : > { %3401 = dma.vmem_to_hbm [thread:$0]  (%p4310_p0), %s2739_s5, 512, %s2741_s7, %s2725_s6, %s4103_s18, %s4103_s18, %s4104_s21  }
 0xae8 PF: > { %s5089_s22 = sld [smem:[#allocation28_spill]]  ;;  %p5091_p8 = scmp.ge.s32.totalorder %s4087_s25, 2 }
 0xaea   : > { %p3439_p9 = pnand %p5091_p8, %p4318_p5 }
 0xaec   : > { %p3440_p12 = pneg %p3439_p9 }
 0xaee   : > { %s2755_s4 = sand.u32 1, %s5089_s22  }
 0xaef   : > { %s2756_s12 = scalar_lea.sflag [#allocation4], %s2755_s4 }
 0xaf0   : > { %4070 = dma.done.wait (%p3440_p12), %s2756_s12, 512  }
 0xaf1   : > { %4072 = vsyncadd (%p3440_p12), %s2756_s12, 4294966784  ;;  %s5092_s25 = sld [smem:[#allocation30_spill]]  ;;  %s5095_s4 = smov %s4079_s30 }
 0xaf2   : > { %s5093_s16 = sld [smem:[#allocation29_spill]] }
 0xaf3   : > { %s5094_s24 = sld [smem:[#allocation31_spill]] }
 0xaf7   : > { %p45_p2 = scmp.ge.s32.totalorder %s5092_s25, 4  }
 0xaf8   : > { %s5096_s30 = smov %s5093_s16 }
 0xaf9   :  { %47 = sbr.rel (!%p45_p2) target bundleno = 37 (0x25), region = 236 }
 0xafe   :  { %2762 = vsyncpa [#allocation3], 1 }
 0xaff   :  { %2764 = vsyncpa [#allocation3 + $0x1], 1 }
 0xb00   :  { %2765 = vsyncpa [#allocation6], 1 }
 0xb01   :  { %2767 = vsyncpa [#allocation6 + $0x1], 1 }
 0xb02   :  { %2768 = vsyncpa [#allocation9], 1 }
 0xb03   :  { %2770 = vsyncpa [#allocation9 + $0x1], 1 }
 0xb04   :  { %2771 = vsyncpa [#allocation12], 1 }
 0xb05   :  { %2772 = vsyncpa [#allocation15], 1 }
 0xb06   :  { %2773 = vsyncpa [#allocation18], 1 }
 0xb07   :  { %2774 = vsyncpa [#allocation4], 1 }
 0xb08   :  { %2776 = vsyncpa [#allocation4 + $0x1], 1 }

</bundles_post_ra>
